<compile_context>
chip_gen: v7x
topology: tpu7x:2x2x1
jax: 0.10.0
libtpu: 0.0.40
codegen_flags: <defaults>
</compile_context>

<pallas_src>
import functools

import jax
import jax.numpy as jnp
from jax.experimental import pallas as pl
from jax.experimental.pallas import tpu as pltpu


CLASSES = 10
CHANNELS = 1
IMG_SIZE = 28
LATENT_DIM = 100
LATENT_PAD = 128                       # 100 -> 128 (lane aligned K)
IMG_FLAT = CHANNELS * IMG_SIZE * IMG_SIZE  # 784
GEN_OUT_PAD = 896                      # 784 -> 7 * 128 (lane-dense store)
DISC_OUT_PAD = 128                     # 1 -> 128 (lane-dense store)
BN_EPS = 1e-5

GEN_ACTS = ("leaky", "leaky", "leaky", "leaky", "tanh")
DISC_ACTS = ("leaky", "leaky", "leaky", "none", "sigmoid")


# ----------------------------------------------------------------------------
# Fused 5-layer MLP kernel.
#   refs = (x, r1, w1, w2, b2, w3, b3, w4, b4, w5, b5, out)
#   h1 = act0( x @ w1 + r1 )          (r1 = folded embedding row-bias + b1)
#   h_{i+1} = act_i( h_i @ w_{i+1} + b_{i+1} )
# x and all weights are bf16; activations / accumulation in f32.
# ----------------------------------------------------------------------------
def _fused_mlp_kernel(*refs, acts):
    x_ref, r1_ref = refs[0], refs[1]
    out_ref = refs[-1]
    w_refs = refs[2:-1]  # (w1, w2, b2, w3, b3, w4, b4, w5, b5)

    def mm(a_bf16, w_ref):
        return jnp.dot(a_bf16, w_ref[...], preferred_element_type=jnp.float32)

    def apply_act(y, name):
        if name == "leaky":  # LeakyReLU(0.2)
            return jnp.where(y > 0, y, jnp.float32(0.2) * y)
        if name == "tanh":
            return jnp.tanh(y)
        if name == "sigmoid":
            # 1 / (1 + exp(-y)) with the divide on the EUP (vrcp); clamp keeps
            # the approx reciprocal inside the exact sigmoid range [0, 1].
            s = pl.reciprocal(1.0 + jnp.exp(-y), approx=True)
            return jnp.clip(s, 0.0, 1.0)
        return y  # "none"

    # Layer 1: single matmul + per-sample row bias (embedding already folded).
    h = mm(x_ref[...], w_refs[0]) + r1_ref[...]
    h = apply_act(h, acts[0])

    # Layers 2..5 (unrolled at trace time).
    for li in range(4):
        w_ref = w_refs[1 + 2 * li]
        b_ref = w_refs[2 + 2 * li]
        h = apply_act(mm(h.astype(jnp.bfloat16), w_ref) + b_ref[...], acts[li + 1])

    out_ref[...] = h.astype(out_ref.dtype)


def fused_mlp(x, r1, weights, acts, out_dim, tb):
    """One pallas_call running the whole 5-layer branch.

    x:   [B_pad, K]      bf16, batch-tiled with the grid
    r1:  [B_pad, out1]   f32 per-sample first-layer row bias, batch-tiled
    weights: VMEM-resident (constant index_map) bf16 weights / f32 biases
    """
    B = x.shape[0]
    assert B % tb == 0
    grid = (B // tb,)

    in_specs = [
        pl.BlockSpec((tb, x.shape[1]), lambda i: (i, 0)),
        pl.BlockSpec((tb, r1.shape[1]), lambda i: (i, 0)),
    ] + [pl.BlockSpec(w.shape, lambda i: (0, 0)) for w in weights]
    out_specs = pl.BlockSpec((tb, out_dim), lambda i: (i, 0))

    return pl.pallas_call(
        functools.partial(_fused_mlp_kernel, acts=tuple(acts)),
        out_shape=jax.ShapeDtypeStruct((B, out_dim), jnp.float32),
        grid_spec=pl.GridSpec(grid=grid, in_specs=in_specs, out_specs=out_specs),
        compiler_params=pltpu.CompilerParams(
            dimension_semantics=("parallel",),
            # ~3 MiB bf16 weights per branch (double-buffered) + [TB, <=1024]
            # activation blocks: << 32 MiB, safe even on v7x (64 MiB physical).
            vmem_limit_bytes=32 * 1024 * 1024,
        ),
    )(x, r1, *weights)


# ----------------------------------------------------------------------------
# Deterministic parameter construction (shapes follow CGAN.__init__), with
# eval-mode BN folded into W/b, embedding folded into a per-class row-bias
# table, lane-padded heads, and bf16 weight storage.
# ----------------------------------------------------------------------------
def _make_wb(key, size_in, size_out, batchnorm):
    w = jax.random.normal(key, (size_in, size_out), jnp.float32) * 0.05
    b = jnp.zeros((size_out,), jnp.float32)
    if batchnorm:
        # eval-mode BN (gamma=1, beta=0, mean=0, var=1): y = x / sqrt(1 + eps)
        # TODO(synk): if trained BN stats are loaded, fold (mean, var, gamma,
        # beta) here instead of the fresh-stats identity fold.
        scale = 1.0 / jnp.sqrt(jnp.float32(1.0 + BN_EPS))
        w = w * scale
        b = b * scale
    return w, b


def init_cgan_params(key):
    keys = jax.random.split(key, 16)
    params = {}
    # nn.Embedding(10, 10)
    emb = jax.random.normal(keys[0], (CLASSES, CLASSES), jnp.float32)
    params["embedding"] = emb

    # ---- Generator: Linear+LReLU, (Linear+BN+LReLU) x3, Linear+Tanh ----
    gen_defs = [
        (LATENT_DIM + CLASSES, 128, False),
        (128, 256, True),
        (256, 512, True),
        (512, 1024, True),
        (1024, IMG_FLAT, False),
    ]
    gen_wb = [
        _make_wb(keys[1 + i], si, so, bn) for i, (si, so, bn) in enumerate(gen_defs)
    ]
    # forward: z = cat(embed(labels), noise) -> first 10 rows of W1 hit emb.
    w1, b1 = gen_wb[0]
    # Embedding fold: per-class first-layer row bias table [10, 128] (f32).
    params["gen_row_bias"] = emb @ w1[:CLASSES] + b1
    # Noise part of W1, K padded 100 -> 128 with zero rows.
    w1n = jnp.zeros((LATENT_PAD, 128), jnp.float32).at[:LATENT_DIM].set(w1[CLASSES:])
    gen_flat = [w1n.astype(jnp.bfloat16)]
    for w, b in gen_wb[1:-1]:
        gen_flat += [w.astype(jnp.bfloat16), b.reshape(1, -1)]
    # Final (1024 -> 784) layer: pad output to 896 lanes (zero-weight columns).
    w5, b5 = gen_wb[-1]
    w5p = jnp.zeros((1024, GEN_OUT_PAD), jnp.float32).at[:, :IMG_FLAT].set(w5)
    b5p = jnp.zeros((GEN_OUT_PAD,), jnp.float32).at[:IMG_FLAT].set(b5)
    gen_flat += [w5p.astype(jnp.bfloat16), b5p.reshape(1, -1)]
    params["gen"] = gen_flat

    # ---- Discriminator: Linear+LReLU, (Linear+Dropout+LReLU) x2, Linear,
    #      Linear+Sigmoid ----
    # TODO(synk): nn.Dropout(0.4) is stochastic in train mode; implemented as
    # eval-mode identity here.
    disc_defs = [
        (CLASSES + IMG_FLAT, 1024, False),
        (1024, 512, False),
        (512, 256, False),
        (256, 128, False),
        (128, 1, False),
    ]
    disc_wb = [
        _make_wb(keys[6 + i], si, so, bn) for i, (si, so, bn) in enumerate(disc_defs)
    ]
    # forward: x = cat(flatten(img), embed(labels)) -> last 10 rows of W1 hit emb.
    w1, b1 = disc_wb[0]
    params["disc_row_bias"] = emb @ w1[IMG_FLAT:] + b1  # [10, 1024] (f32)
    disc_flat = [w1[:IMG_FLAT].astype(jnp.bfloat16)]    # image part [784, 1024]
    for w, b in disc_wb[1:-1]:
        disc_flat += [w.astype(jnp.bfloat16), b.reshape(1, -1)]
    # Final (128 -> 1) layer: pad output to 128 lanes (zero-weight columns).
    w5, b5 = disc_wb[-1]
    w5p = jnp.zeros((128, DISC_OUT_PAD), jnp.float32).at[:, :1].set(w5)
    b5p = jnp.zeros((DISC_OUT_PAD,), jnp.float32).at[:1].set(b5)
    disc_flat += [w5p.astype(jnp.bfloat16), b5p.reshape(1, -1)]
    params["disc"] = disc_flat
    return params


# ----------------------------------------------------------------------------
# CGAN forward (mirrors the PyTorch module's forward)
# ----------------------------------------------------------------------------
def _pick_batch_tile(B):
    if B <= 16:
        return 16                      # bf16 sublane pack minimum
    if B <= 128:
        return ((B + 15) // 16) * 16   # single block, sublane-aligned
    return 128                         # MXU-friendly tile on v5e/v6e/v7x


def cgan_forward(params, x, labels):
    B = x.shape[0]
    tb = _pick_batch_tile(B)
    b_pad = ((B + tb - 1) // tb) * tb
    pad = b_pad - B

    if x.ndim == 2:
        # Generator branch: embedding contribution folded into a row bias.
        row_bias = jnp.take(params["gen_row_bias"], labels, axis=0)      # [B, 128]
        row_bias = jnp.pad(row_bias, ((0, pad), (0, 0)))
        z = jnp.pad(x, ((0, pad), (0, LATENT_PAD - LATENT_DIM)))
        z = z.astype(jnp.bfloat16)
        out = fused_mlp(z, row_bias, params["gen"], GEN_ACTS, GEN_OUT_PAD, tb)
        return out[:B, :IMG_FLAT].reshape(B, CHANNELS, IMG_SIZE, IMG_SIZE)
    elif x.ndim == 4:
        # Discriminator branch: embedding contribution folded into a row bias.
        row_bias = jnp.take(params["disc_row_bias"], labels, axis=0)     # [B, 1024]
        row_bias = jnp.pad(row_bias, ((0, pad), (0, 0)))
        img = jnp.pad(x.reshape(B, -1), ((0, pad), (0, 0)))
        img = img.astype(jnp.bfloat16)
        out = fused_mlp(img, row_bias, params["disc"], DISC_ACTS, DISC_OUT_PAD, tb)
        return out[:B, :1]  # column 0 is the real sigmoid output
    else:
        raise ValueError("input must be rank 2 (noise) or rank 4 (images)")


if __name__ == "__main__":
    root = jax.random.PRNGKey(0)
    k_params, k_z, k_lbl, k_img = jax.random.split(root, 4)

    params = init_cgan_params(k_params)

    B = 4
    z = jax.random.normal(k_z, (B, LATENT_DIM), jnp.float32)
    labels = jax.random.randint(k_lbl, (B,), 0, CLASSES, dtype=jnp.int32)
    imgs = jax.random.normal(k_img, (B, CHANNELS, IMG_SIZE, IMG_SIZE), jnp.float32)

    # Generator path (input.dim() == 2)
    gen_out = cgan_forward(params, z, labels)
    # Discriminator path (input.dim() == 4)
    disc_out = cgan_forward(params, imgs, labels)

    jax.block_until_ready((gen_out, disc_out))

    assert gen_out.shape == (B, CHANNELS, IMG_SIZE, IMG_SIZE)
    assert gen_out.dtype == jnp.float32
    assert disc_out.shape == (B, 1)
    assert bool(jnp.all(jnp.isfinite(gen_out)))
    assert bool(jnp.all((disc_out >= 0.0) & (disc_out <= 1.0)))
    assert bool(jnp.all((gen_out >= -1.0) & (gen_out <= 1.0)))

    print("KERNEL_OK")
</pallas_src>

<mosaic_0001>
module attributes {stable_mosaic.version = 11 : i64} {
  func.func @_fused_mlp_kernel(%arg0: i32, %arg1: memref<16x128xbf16, #tpu.memory_space<vmem>>, %arg2: memref<16x128xf32, #tpu.memory_space<vmem>>, %arg3: memref<128x128xbf16, #tpu.memory_space<vmem>>, %arg4: memref<128x256xbf16, #tpu.memory_space<vmem>>, %arg5: memref<1x256xf32, #tpu.memory_space<vmem>>, %arg6: memref<256x512xbf16, #tpu.memory_space<vmem>>, %arg7: memref<1x512xf32, #tpu.memory_space<vmem>>, %arg8: memref<512x1024xbf16, #tpu.memory_space<vmem>>, %arg9: memref<1x1024xf32, #tpu.memory_space<vmem>>, %arg10: memref<1024x896xbf16, #tpu.memory_space<vmem>>, %arg11: memref<1x896xf32, #tpu.memory_space<vmem>>, %arg12: memref<16x896xf32, #tpu.memory_space<vmem>>) attributes {dimension_semantics = [#tpu.dimension_semantics<parallel>], iteration_bounds = array<i64: 1>, scalar_prefetch = 0 : i64, scratch_operands = 0 : i64, tpu.core_type = #tpu.core_type<tc>, window_params = [{transform_indices = @transform_0, window_bounds = array<i64: 16, 128>}, {transform_indices = @transform_1, window_bounds = array<i64: 16, 128>}, {pipeline_mode = #tpu.pipeline_mode<synchronous>, transform_indices = @transform_2, window_bounds = array<i64: 128, 128>}, {pipeline_mode = #tpu.pipeline_mode<synchronous>, transform_indices = @transform_3, window_bounds = array<i64: 128, 256>}, {pipeline_mode = #tpu.pipeline_mode<synchronous>, transform_indices = @transform_4, window_bounds = array<i64: 1, 256>}, {pipeline_mode = #tpu.pipeline_mode<synchronous>, transform_indices = @transform_5, window_bounds = array<i64: 256, 512>}, {pipeline_mode = #tpu.pipeline_mode<synchronous>, transform_indices = @transform_6, window_bounds = array<i64: 1, 512>}, {pipeline_mode = #tpu.pipeline_mode<synchronous>, transform_indices = @transform_7, window_bounds = array<i64: 512, 1024>}, {pipeline_mode = #tpu.pipeline_mode<synchronous>, transform_indices = @transform_8, window_bounds = array<i64: 1, 1024>}, {pipeline_mode = #tpu.pipeline_mode<synchronous>, transform_indices = @transform_9, window_bounds = array<i64: 1024, 896>}, {pipeline_mode = #tpu.pipeline_mode<synchronous>, transform_indices = @transform_10, window_bounds = array<i64: 1, 896>}, {transform_indices = @transform_11, window_bounds = array<i64: 16, 896>}]} {
    %c0 = arith.constant 0 : index
    %c0_0 = arith.constant 0 : index
    %0 = vector.load %arg1[%c0, %c0_0] : memref<16x128xbf16, #tpu.memory_space<vmem>>, vector<16x128xbf16>
    %c0_1 = arith.constant 0 : index
    %c0_2 = arith.constant 0 : index
    %1 = vector.load %arg3[%c0_1, %c0_2] : memref<128x128xbf16, #tpu.memory_space<vmem>>, vector<128x128xbf16>
    %cst = arith.constant dense<0.000000e+00> : vector<16x128xf32>
    %2 = tpu.matmul %0, %1, %cst {dimension_numbers = #tpu.dot_dimension_numbers<[1], [0], [0], [1], [0, 0, 1, 1], [], []>} : vector<16x128xbf16>, vector<128x128xbf16>, vector<16x128xf32> -> vector<16x128xf32>
    %c0_3 = arith.constant 0 : index
    %c0_4 = arith.constant 0 : index
    %3 = vector.load %arg2[%c0_3, %c0_4] : memref<16x128xf32, #tpu.memory_space<vmem>>, vector<16x128xf32>
    %4 = arith.addf %2, %3 : vector<16x128xf32>
    %cst_5 = arith.constant 0.000000e+00 : f32
    %5 = vector.broadcast %cst_5 : f32 to vector<16x128xf32>
    %6 = arith.cmpf ogt, %4, %5 : vector<16x128xf32>
    %cst_6 = arith.constant 2.000000e-01 : f32
    %7 = vector.broadcast %cst_6 : f32 to vector<16x128xf32>
    %8 = arith.mulf %7, %4 : vector<16x128xf32>
    %9 = arith.select %6, %4, %8 : vector<16x128xi1>, vector<16x128xf32>
    %10 = arith.truncf %9 : vector<16x128xf32> to vector<16x128xbf16>
    %c0_7 = arith.constant 0 : index
    %c0_8 = arith.constant 0 : index
    %11 = vector.load %arg4[%c0_7, %c0_8] : memref<128x256xbf16, #tpu.memory_space<vmem>>, vector<128x256xbf16>
    %cst_9 = arith.constant dense<0.000000e+00> : vector<16x256xf32>
    %12 = tpu.matmul %10, %11, %cst_9 {dimension_numbers = #tpu.dot_dimension_numbers<[1], [0], [0], [1], [0, 0, 1, 1], [], []>} : vector<16x128xbf16>, vector<128x256xbf16>, vector<16x256xf32> -> vector<16x256xf32>
    %c0_10 = arith.constant 0 : index
    %c0_11 = arith.constant 0 : index
    %13 = vector.load %arg5[%c0_10, %c0_11] : memref<1x256xf32, #tpu.memory_space<vmem>>, vector<1x256xf32>
    %14 = vector.broadcast %13 : vector<1x256xf32> to vector<16x256xf32>
    %15 = arith.addf %12, %14 : vector<16x256xf32>
    %cst_12 = arith.constant 0.000000e+00 : f32
    %16 = vector.broadcast %cst_12 : f32 to vector<16x256xf32>
    %17 = arith.cmpf ogt, %15, %16 : vector<16x256xf32>
    %cst_13 = arith.constant 2.000000e-01 : f32
    %18 = vector.broadcast %cst_13 : f32 to vector<16x256xf32>
    %19 = arith.mulf %18, %15 : vector<16x256xf32>
    %20 = arith.select %17, %15, %19 : vector<16x256xi1>, vector<16x256xf32>
    %21 = arith.truncf %20 : vector<16x256xf32> to vector<16x256xbf16>
    %c0_14 = arith.constant 0 : index
    %c0_15 = arith.constant 0 : index
    %22 = vector.load %arg6[%c0_14, %c0_15] : memref<256x512xbf16, #tpu.memory_space<vmem>>, vector<256x512xbf16>
    %cst_16 = arith.constant dense<0.000000e+00> : vector<16x512xf32>
    %23 = tpu.matmul %21, %22, %cst_16 {dimension_numbers = #tpu.dot_dimension_numbers<[1], [0], [0], [1], [0, 0, 1, 1], [], []>} : vector<16x256xbf16>, vector<256x512xbf16>, vector<16x512xf32> -> vector<16x512xf32>
    %c0_17 = arith.constant 0 : index
    %c0_18 = arith.constant 0 : index
    %24 = vector.load %arg7[%c0_17, %c0_18] : memref<1x512xf32, #tpu.memory_space<vmem>>, vector<1x512xf32>
    %25 = vector.broadcast %24 : vector<1x512xf32> to vector<16x512xf32>
    %26 = arith.addf %23, %25 : vector<16x512xf32>
    %cst_19 = arith.constant 0.000000e+00 : f32
    %27 = vector.broadcast %cst_19 : f32 to vector<16x512xf32>
    %28 = arith.cmpf ogt, %26, %27 : vector<16x512xf32>
    %cst_20 = arith.constant 2.000000e-01 : f32
    %29 = vector.broadcast %cst_20 : f32 to vector<16x512xf32>
    %30 = arith.mulf %29, %26 : vector<16x512xf32>
    %31 = arith.select %28, %26, %30 : vector<16x512xi1>, vector<16x512xf32>
    %32 = arith.truncf %31 : vector<16x512xf32> to vector<16x512xbf16>
    %c0_21 = arith.constant 0 : index
    %c0_22 = arith.constant 0 : index
    %33 = vector.load %arg8[%c0_21, %c0_22] : memref<512x1024xbf16, #tpu.memory_space<vmem>>, vector<512x1024xbf16>
    %cst_23 = arith.constant dense<0.000000e+00> : vector<16x1024xf32>
    %34 = tpu.matmul %32, %33, %cst_23 {dimension_numbers = #tpu.dot_dimension_numbers<[1], [0], [0], [1], [0, 0, 1, 1], [], []>} : vector<16x512xbf16>, vector<512x1024xbf16>, vector<16x1024xf32> -> vector<16x1024xf32>
    %c0_24 = arith.constant 0 : index
    %c0_25 = arith.constant 0 : index
    %35 = vector.load %arg9[%c0_24, %c0_25] : memref<1x1024xf32, #tpu.memory_space<vmem>>, vector<1x1024xf32>
    %36 = vector.broadcast %35 : vector<1x1024xf32> to vector<16x1024xf32>
    %37 = arith.addf %34, %36 : vector<16x1024xf32>
    %cst_26 = arith.constant 0.000000e+00 : f32
    %38 = vector.broadcast %cst_26 : f32 to vector<16x1024xf32>
    %39 = arith.cmpf ogt, %37, %38 : vector<16x1024xf32>
    %cst_27 = arith.constant 2.000000e-01 : f32
    %40 = vector.broadcast %cst_27 : f32 to vector<16x1024xf32>
    %41 = arith.mulf %40, %37 : vector<16x1024xf32>
    %42 = arith.select %39, %37, %41 : vector<16x1024xi1>, vector<16x1024xf32>
    %43 = arith.truncf %42 : vector<16x1024xf32> to vector<16x1024xbf16>
    %c0_28 = arith.constant 0 : index
    %c0_29 = arith.constant 0 : index
    %44 = vector.load %arg10[%c0_28, %c0_29] : memref<1024x896xbf16, #tpu.memory_space<vmem>>, vector<1024x896xbf16>
    %cst_30 = arith.constant dense<0.000000e+00> : vector<16x896xf32>
    %45 = tpu.matmul %43, %44, %cst_30 {dimension_numbers = #tpu.dot_dimension_numbers<[1], [0], [0], [1], [0, 0, 1, 1], [], []>} : vector<16x1024xbf16>, vector<1024x896xbf16>, vector<16x896xf32> -> vector<16x896xf32>
    %c0_31 = arith.constant 0 : index
    %c0_32 = arith.constant 0 : index
    %46 = vector.load %arg11[%c0_31, %c0_32] : memref<1x896xf32, #tpu.memory_space<vmem>>, vector<1x896xf32>
    %47 = vector.broadcast %46 : vector<1x896xf32> to vector<16x896xf32>
    %48 = arith.addf %45, %47 : vector<16x896xf32>
    %49 = math.tanh %48 : vector<16x896xf32>
    %c0_33 = arith.constant 0 : index
    %c0_34 = arith.constant 0 : index
    %50 = vector.load %arg12[%c0_33, %c0_34] : memref<16x896xf32, #tpu.memory_space<vmem>>, vector<16x896xf32>
    tpu.vector_store %arg12[%c0_33, %c0_34], %49 {strides = array<i32>} : memref<16x896xf32, #tpu.memory_space<vmem>>, vector<16x896xf32>,
    return
  }
  func.func @transform_0(%arg0: i32) -> (i32, i32) {
    %c0_i32 = arith.constant 0 : i32
    %c0_i32_0 = arith.constant 0 : i32
    return %arg0, %c0_i32 : i32, i32
  }
  func.func @transform_1(%arg0: i32) -> (i32, i32) {
    %c0_i32 = arith.constant 0 : i32
    %c0_i32_0 = arith.constant 0 : i32
    return %arg0, %c0_i32 : i32, i32
  }
  func.func @transform_2(%arg0: i32) -> (i32, i32) {
    %c0_i32 = arith.constant 0 : i32
    %c0_i32_0 = arith.constant 0 : i32
    %c0_i32_1 = arith.constant 0 : i32
    return %c0_i32, %c0_i32_0 : i32, i32
  }
  func.func @transform_3(%arg0: i32) -> (i32, i32) {
    %c0_i32 = arith.constant 0 : i32
    %c0_i32_0 = arith.constant 0 : i32
    %c0_i32_1 = arith.constant 0 : i32
    return %c0_i32, %c0_i32_0 : i32, i32
  }
  func.func @transform_4(%arg0: i32) -> (i32, i32) {
    %c0_i32 = arith.constant 0 : i32
    %c0_i32_0 = arith.constant 0 : i32
    %c0_i32_1 = arith.constant 0 : i32
    return %c0_i32, %c0_i32_0 : i32, i32
  }
  func.func @transform_5(%arg0: i32) -> (i32, i32) {
    %c0_i32 = arith.constant 0 : i32
    %c0_i32_0 = arith.constant 0 : i32
    %c0_i32_1 = arith.constant 0 : i32
    return %c0_i32, %c0_i32_0 : i32, i32
  }
  func.func @transform_6(%arg0: i32) -> (i32, i32) {
    %c0_i32 = arith.constant 0 : i32
    %c0_i32_0 = arith.constant 0 : i32
    %c0_i32_1 = arith.constant 0 : i32
    return %c0_i32, %c0_i32_0 : i32, i32
  }
  func.func @transform_7(%arg0: i32) -> (i32, i32) {
    %c0_i32 = arith.constant 0 : i32
    %c0_i32_0 = arith.constant 0 : i32
    %c0_i32_1 = arith.constant 0 : i32
    return %c0_i32, %c0_i32_0 : i32, i32
  }
  func.func @transform_8(%arg0: i32) -> (i32, i32) {
    %c0_i32 = arith.constant 0 : i32
    %c0_i32_0 = arith.constant 0 : i32
    %c0_i32_1 = arith.constant 0 : i32
    return %c0_i32, %c0_i32_0 : i32, i32
  }
  func.func @transform_9(%arg0: i32) -> (i32, i32) {
    %c0_i32 = arith.constant 0 : i32
    %c0_i32_0 = arith.constant 0 : i32
    %c0_i32_1 = arith.constant 0 : i32
    return %c0_i32, %c0_i32_0 : i32, i32
  }
  func.func @transform_10(%arg0: i32) -> (i32, i32) {
    %c0_i32 = arith.constant 0 : i32
    %c0_i32_0 = arith.constant 0 : i32
    %c0_i32_1 = arith.constant 0 : i32
    return %c0_i32, %c0_i32_0 : i32, i32
  }
  func.func @transform_11(%arg0: i32) -> (i32, i32) {
    %c0_i32 = arith.constant 0 : i32
    %c0_i32_0 = arith.constant 0 : i32
    return %arg0, %c0_i32 : i32, i32
  }
}

</mosaic_0001>

<bundles_post_ra>
// kernel: tpu_custom_call.1
= control target key start
LH: loop header
LB: loop body
LE: loop exit
PB: predicated region body
PF: predicated region fallthrough
CT: control target
= control target key end

     0   :  { %16 = vsyncpa [#allocation3], 0  ;;  %s9046_s0 = inlined_call_operand.hbm [shape: bf16[16,128], index: 0, kind: input, shape index: {}]   ;;  %s9047_s1 = inlined_call_operand.hbm [shape: f32[16,128], index: 1, kind: input, shape index: {}]   ;;  %s9048_s2 = inlined_call_operand.hbm [shape: bf16[128,128], index: 2, kind: input, shape index: {}]   ;;  %s9049_s3 = inlined_call_operand.hbm [shape: bf16[128,256], index: 3, kind: input, shape index: {}]   ;;  %s9050_s4 = inlined_call_operand.hbm [shape: f32[1,256], index: 4, kind: input, shape index: {}]   ;;  %s9051_s5 = inlined_call_operand.hbm [shape: bf16[256,512], index: 5, kind: input, shape index: {}]   ;;  %s9052_s6 = inlined_call_operand.hbm [shape: f32[1,512], index: 6, kind: input, shape index: {}]   ;;  %s9053_s7 = inlined_call_operand.hbm [shape: bf16[512,1024], index: 7, kind: input, shape index: {}]   ;;  %s9054_s8 = inlined_call_operand.hbm [shape: f32[1,1024], index: 8, kind: input, shape index: {}]   ;;  %s9055_s9 = inlined_call_operand.hbm [shape: bf16[1024,896], index: 9, kind: input, shape index: {}]   ;;  %s9056_s10 = inlined_call_operand.hbm [shape: f32[1,896], index: 10, kind: input, shape index: {}]   ;;  %s9057_s11 = inlined_call_operand.hbm [shape: f32[16,896], index: 11, kind: output, shape index: {}]  }
   0x1   :  { %17 = vsyncpa [#allocation6], 0 }
   0x2   :  { %18 = vsyncpa [#allocation9], 0 }
   0x3   :  { %19 = vsyncpa [#allocation12], 0 }
   0x4   :  { %20 = vsyncpa [#allocation15], 0 }
   0x5   :  { %21 = vsyncpa [#allocation18], 0 }
   0x6   :  { %22 = vsyncpa [#allocation4], 0  ;;  %s8641_s17 = smov [#allocation5]   ;;  %s8363_s21 = scalar_lea.hbm %s9047_s1, 256 }
   0x7   :  { %s40_s18 = sshll.u32 %s8641_s17, 4  ;;  %p8364_p0 = scmp.ne.s32.totalorder %s9047_s1, %s8363_s21  ;;  %s41_s18 = int_to_ptr.vmem [resolvable:$true] %s40_s18 }
   0x8   :  { %p8367_p1 = scmp.lt.u32.totalorder %s8363_s21, %s9047_s1 }
   0xa   :  { %p8369_p2 = pnand %p8367_p1, %p8364_p0 }
   0xc   :  { %8372 = shalt.err (!%p8369_p2)
}
   0xd   :  { %s8373_s26 = scalar_lea.vmem %s41_s18, 256  ;;  %p8378_p4 = scmp.lt.s32.totalorder %s41_s18, %s41_s18 }
   0xe   :  { %p8374_p3 = scmp.ne.s32.totalorder %s41_s18, %s8373_s26  ;;  %p8379_p5 = scmp.lt.s32.totalorder %s8373_s26, %s8373_s26 }
  0x10   :  { %p8380_p6 = por %p8379_p5, %p8378_p4 }
  0x12   :  { %p8381_p7 = pnand %p8380_p6, %p8374_p3 }
  0x14   :  { %8384 = shalt.err (!%p8381_p7)
}
  0x15   :  { %s8642_s27 = smov 128   ;;  %s8643_s28 = smov 8  }
  0x16   :  { %46 = dma.hbm_to_vmem [thread:$0]  %s9047_s1, 256, %s41_s18, [#allocation6], %s8642_s27, %s8642_s27, %s8643_s28  }
  0x17   :  { %s8644_s12 = smov [#allocation8]   ;;  %s8645_s14 = smov [#allocation11]  }
  0x18   :  { %s64_s13 = sshll.u32 %s8644_s12, 4  ;;  %s86_s15 = sshll.u32 %s8645_s14, 4  ;;  %s65_s13 = int_to_ptr.vmem [resolvable:$true] %s64_s13  ;;  %s87_s15 = int_to_ptr.vmem [resolvable:$true] %s86_s15 }
  0x19   :  { %s8385_s19 = scalar_lea.hbm %s9049_s3, 2048 }
  0x1a   :  { %p8386_p8 = scmp.ne.s32.totalorder %s9049_s3, %s8385_s19  ;;  %p8389_p9 = scmp.lt.u32.totalorder %s8385_s19, %s9049_s3 }
  0x1c   :  { %p8391_p10 = pnand %p8389_p9, %p8386_p8 }
  0x1e   :  { %8394 = shalt.err (!%p8391_p10)
}
  0x1f   :  { %s8395_s1 = scalar_lea.vmem %s65_s13, 2048  ;;  %p8400_p12 = scmp.lt.s32.totalorder %s65_s13, %s65_s13 }
  0x20   :  { %p8396_p11 = scmp.ne.s32.totalorder %s65_s13, %s8395_s1  ;;  %p8401_p13 = scmp.lt.s32.totalorder %s8395_s1, %s8395_s1 }
  0x22   :  { %p8402_p0 = por %p8401_p13, %p8400_p12 }
  0x24   :  { %p8403_p1 = pnand %p8402_p0, %p8396_p11 }
  0x26   :  { %8406 = shalt.err (!%p8403_p1)
}
  0x27   :  { %70 = dma.hbm_to_vmem [thread:$0]  %s9049_s3, 2048, %s65_s13, [#allocation9], %s8642_s27, %s8642_s27, %s8643_s28  }
  0x28   :  { %s8407_s29 = scalar_lea.hbm %s9051_s5, 8192 }
  0x29   :  { %p8408_p2 = scmp.ne.s32.totalorder %s9051_s5, %s8407_s29  ;;  %p8411_p3 = scmp.lt.u32.totalorder %s8407_s29, %s9051_s5 }
  0x2b   :  { %p8413_p4 = pnand %p8411_p3, %p8408_p2 }
  0x2d   :  { %8416 = shalt.err (!%p8413_p4)
}
  0x2e   :  { %s8417_s17 = scalar_lea.vmem %s87_s15, 8192  ;;  %p8422_p6 = scmp.lt.s32.totalorder %s87_s15, %s87_s15 }
  0x2f   :  { %p8418_p5 = scmp.ne.s32.totalorder %s87_s15, %s8417_s17  ;;  %p8423_p7 = scmp.lt.s32.totalorder %s8417_s17, %s8417_s17 }
  0x31   :  { %p8424_p8 = por %p8423_p7, %p8422_p6 }
  0x33   :  { %p8425_p9 = pnand %p8424_p8, %p8418_p5 }
  0x35   :  { %8428 = shalt.err (!%p8425_p9)
}
  0x36   :  { %s8646_s3 = smov 256   ;;  %s8647_s27 = smov 16  }
  0x37   :  { %92 = dma.hbm_to_vmem [thread:$0]  %s9051_s5, 8192, %s87_s15, [#allocation12], %s8646_s3, %s8646_s3, %s8647_s27  }
  0x38   :  { %s8648_s19 = smov [#allocation14]   ;;  %s8429_s23 = scalar_lea.hbm %s9053_s7, 32768 }
  0x39   :  { %s108_s20 = sshll.u32 %s8648_s19, 4  ;;  %p8430_p10 = scmp.ne.s32.totalorder %s9053_s7, %s8429_s23  ;;  %s109_s20 = int_to_ptr.vmem [resolvable:$true] %s108_s20 }
  0x3a   :  { %p8433_p11 = scmp.lt.u32.totalorder %s8429_s23, %s9053_s7 }
  0x3c   :  { %p8435_p12 = pnand %p8433_p11, %p8430_p10 }
  0x3e   :  { %8438 = shalt.err (!%p8435_p12)
}
  0x3f   :  { %s8439_s26 = scalar_lea.vmem %s109_s20, 32768  ;;  %p8444_p0 = scmp.lt.s32.totalorder %s109_s20, %s109_s20 }
  0x40   :  { %p8440_p13 = scmp.ne.s32.totalorder %s109_s20, %s8439_s26  ;;  %p8445_p1 = scmp.lt.s32.totalorder %s8439_s26, %s8439_s26 }
  0x42   :  { %p8446_p2 = por %p8445_p1, %p8444_p0 }
  0x44   :  { %p8447_p3 = pnand %p8446_p2, %p8440_p13 }
  0x46   :  { %8450 = shalt.err (!%p8447_p3)
}
  0x47   :  { %s8649_s5 = smov 512   ;;  %s8650_s15 = smov 32  }
  0x48   :  { %114 = dma.hbm_to_vmem [thread:$0]  %s9053_s7, 32768, %s109_s20, [#allocation15], %s8649_s5, %s8649_s5, %s8650_s15  }
  0x49   :  { %s8651_s12 = smov [#allocation17]   ;;  %s8451_s3 = scalar_lea.hbm %s9055_s9, 57344 }
  0x4a   :  { %s130_s14 = sshll.u32 %s8651_s12, 4  ;;  %p8452_p4 = scmp.ne.s32.totalorder %s9055_s9, %s8451_s3  ;;  %s131_s14 = int_to_ptr.vmem [resolvable:$true] %s130_s14 }
  0x4b   :  { %p8455_p5 = scmp.lt.u32.totalorder %s8451_s3, %s9055_s9 }
  0x4d   :  { %p8457_p6 = pnand %p8455_p5, %p8452_p4 }
  0x4f   :  { %8460 = shalt.err (!%p8457_p6)
}
  0x50   :  { %s8461_s21 = scalar_lea.vmem %s131_s14, 57344  ;;  %p8466_p8 = scmp.lt.s32.totalorder %s131_s14, %s131_s14 }
  0x51   :  { %p8462_p7 = scmp.ne.s32.totalorder %s131_s14, %s8461_s21  ;;  %p8467_p9 = scmp.lt.s32.totalorder %s8461_s21, %s8461_s21 }
  0x53   :  { %p8468_p10 = por %p8467_p9, %p8466_p8 }
  0x55   :  { %p8469_p11 = pnand %p8468_p10, %p8462_p7 }
  0x57   :  { %8472 = shalt.err (!%p8469_p11)
}
  0x58   :  { %s8652_s7 = smov 448   ;;  %s8653_s20 = smov 28  }
  0x59   :  { %136 = dma.hbm_to_vmem [thread:$0]  %s9055_s9, 57344, %s131_s14, [#allocation18], %s8652_s7, %s8652_s7, %s8653_s20  }
  0x5a   :  { %s8654_s1 = smov [#allocation2]   ;;  %s8473_s26 = scalar_lea.hbm %s9046_s0, 128 }
  0x5b   :  { %s28_s18 = sshll.u32 %s8654_s1, 4  ;;  %p8474_p12 = scmp.ne.s32.totalorder %s9046_s0, %s8473_s26  ;;  %s29_s18 = int_to_ptr.vmem [resolvable:$true] %s28_s18 }
  0x5c   :  { %p8477_p13 = scmp.lt.u32.totalorder %s8473_s26, %s9046_s0 }
  0x5e   :  { %p8479_p0 = pnand %p8477_p13, %p8474_p12 }
  0x60   :  { %8482 = shalt.err (!%p8479_p0)
}
  0x61   :  { %s8483_s12 = scalar_lea.vmem %s29_s18, 128  ;;  %p8488_p2 = scmp.lt.s32.totalorder %s29_s18, %s29_s18 }
  0x62   :  { %p8484_p1 = scmp.ne.s32.totalorder %s29_s18, %s8483_s12  ;;  %p8489_p3 = scmp.lt.s32.totalorder %s8483_s12, %s8483_s12 }
  0x64   :  { %p8490_p4 = por %p8489_p3, %p8488_p2 }
  0x66   :  { %p8491_p5 = pnand %p8490_p4, %p8484_p1 }
  0x68   :  { %8494 = shalt.err (!%p8491_p5)
}
  0x69   :  { %s8655_s9 = smov 64   ;;  %s8656_s14 = smov 4  }
  0x6a   :  { %34 = dma.hbm_to_vmem [thread:$0]  %s9046_s0, 128, %s29_s18, [#allocation3], %s8655_s9, %s8655_s9, %s8656_s14  }
  0x6b   :  { %s8657_s3 = smov [#allocation7]   ;;  %s8658_s28 = smov [#allocation10]  }
  0x6c   :  { %s52_s27 = sshll.u32 %s8657_s3, 4  ;;  %s77_s13 = sshll.u32 %s8658_s28, 4  ;;  %s53_s27 = int_to_ptr.vmem [resolvable:$true] %s52_s27  ;;  %s78_s13 = int_to_ptr.vmem [resolvable:$true] %s77_s13 }
  0x6d   :  { %s8495_s7 = scalar_lea.hbm %s9048_s2, 1024 }
  0x6e   :  { %p8496_p6 = scmp.ne.s32.totalorder %s9048_s2, %s8495_s7  ;;  %p8499_p7 = scmp.lt.u32.totalorder %s8495_s7, %s9048_s2 }
  0x70   :  { %p8501_p8 = pnand %p8499_p7, %p8496_p6 }
  0x72   :  { %8504 = shalt.err (!%p8501_p8)
}
  0x73   :  { %s8505_s0 = scalar_lea.vmem %s53_s27, 1024  ;;  %p8510_p10 = scmp.lt.s32.totalorder %s53_s27, %s53_s27 }
  0x74   :  { %p8506_p9 = scmp.ne.s32.totalorder %s53_s27, %s8505_s0  ;;  %p8511_p11 = scmp.lt.s32.totalorder %s8505_s0, %s8505_s0 }
  0x76   :  { %p8512_p12 = por %p8511_p11, %p8510_p10 }
  0x78   :  { %p8513_p13 = pnand %p8512_p12, %p8506_p9 }
  0x7a   :  { %8516 = shalt.err (!%p8513_p13)
}
  0x7b   :  { %58 = dma.hbm_to_vmem [thread:$0]  %s9048_s2, 1024, %s53_s27, [#allocation6], %s8655_s9, %s8655_s9, %s8656_s14  }
  0x7c   :  { %s8517_s5 = scalar_lea.hbm %s9050_s4, 32 }
  0x7d   :  { %p8518_p0 = scmp.ne.s32.totalorder %s9050_s4, %s8517_s5  ;;  %p8521_p1 = scmp.lt.u32.totalorder %s8517_s5, %s9050_s4 }
  0x7f   :  { %p8523_p2 = pnand %p8521_p1, %p8518_p0 }
  0x81   :  { %8526 = shalt.err (!%p8523_p2)
}
  0x82   :  { %s8527_s16 = scalar_lea.vmem %s78_s13, 32  ;;  %p8532_p4 = scmp.lt.s32.totalorder %s78_s13, %s78_s13 }
  0x83   :  { %p8528_p3 = scmp.ne.s32.totalorder %s78_s13, %s8527_s16  ;;  %p8533_p5 = scmp.lt.s32.totalorder %s8527_s16, %s8527_s16 }
  0x85   :  { %p8534_p6 = por %p8533_p5, %p8532_p4 }
  0x87   :  { %p8535_p7 = pnand %p8534_p6, %p8528_p3 }
  0x89   :  { %8538 = shalt.err (!%p8535_p7)
}
  0x8a   :  { %80 = dma.hbm_to_vmem [thread:$0]  %s9050_s4, 32, %s78_s13, [#allocation9]  }
  0x8b   :  { %s8659_s14 = smov [#allocation13]   ;;  %s8660_s3 = smov [#allocation16]  }
  0x8c   :  { %s99_s17 = sshll.u32 %s8659_s14, 4  ;;  %s121_s27 = sshll.u32 %s8660_s3, 4  ;;  %s100_s17 = int_to_ptr.vmem [resolvable:$true] %s99_s17  ;;  %s122_s27 = int_to_ptr.vmem [resolvable:$true] %s121_s27 }
  0x8d   :  { %s8539_s21 = scalar_lea.hbm %s9052_s6, 64 }
  0x8e   :  { %p8540_p8 = scmp.ne.s32.totalorder %s9052_s6, %s8539_s21  ;;  %p8543_p9 = scmp.lt.u32.totalorder %s8539_s21, %s9052_s6 }
  0x90   :  { %p8545_p10 = pnand %p8543_p9, %p8540_p8 }
  0x92   :  { %8548 = shalt.err (!%p8545_p10)
}
  0x93   :  { %s8549_s4 = scalar_lea.vmem %s100_s17, 64  ;;  %p8554_p12 = scmp.lt.s32.totalorder %s100_s17, %s100_s17 }
  0x94   :  { %p8550_p11 = scmp.ne.s32.totalorder %s100_s17, %s8549_s4  ;;  %p8555_p13 = scmp.lt.s32.totalorder %s8549_s4, %s8549_s4 }
  0x96   :  { %p8556_p0 = por %p8555_p13, %p8554_p12 }
  0x98   :  { %p8557_p1 = pnand %p8556_p0, %p8550_p11 }
  0x9a   :  { %8560 = shalt.err (!%p8557_p1)
}
  0x9b   :  { %102 = dma.hbm_to_vmem [thread:$0]  %s9052_s6, 64, %s100_s17, [#allocation12]  }
  0x9c   :  { %s8561_s24 = scalar_lea.hbm %s9054_s8, 128 }
  0x9d   :  { %p8562_p2 = scmp.ne.s32.totalorder %s9054_s8, %s8561_s24  ;;  %p8565_p3 = scmp.lt.u32.totalorder %s8561_s24, %s9054_s8 }
  0x9f   :  { %p8567_p4 = pnand %p8565_p3, %p8562_p2 }
  0xa1   :  { %8570 = shalt.err (!%p8567_p4)
}
  0xa2   :  { %s8571_s29 = scalar_lea.vmem %s122_s27, 128  ;;  %p8576_p6 = scmp.lt.s32.totalorder %s122_s27, %s122_s27 }
  0xa3   :  { %p8572_p5 = scmp.ne.s32.totalorder %s122_s27, %s8571_s29  ;;  %p8577_p7 = scmp.lt.s32.totalorder %s8571_s29, %s8571_s29 }
  0xa5   :  { %p8578_p8 = por %p8577_p7, %p8576_p6 }
  0xa7   :  { %p8579_p9 = pnand %p8578_p8, %p8572_p5 }
  0xa9   :  { %8582 = shalt.err (!%p8579_p9)
}
  0xaa   :  { %124 = dma.hbm_to_vmem [thread:$0]  %s9054_s8, 128, %s122_s27, [#allocation15]  }
  0xab   :  { %s8661_s12 = smov [#allocation19]   ;;  %s8583_s14 = scalar_lea.hbm %s9056_s10, 112 }
  0xac   :  { %s143_s16 = sshll.u32 %s8661_s12, 4  ;;  %p8584_p10 = scmp.ne.s32.totalorder %s9056_s10, %s8583_s14  ;;  %s144_s16 = int_to_ptr.vmem [resolvable:$true] %s143_s16 }
  0xad   :  { %p8587_p11 = scmp.lt.u32.totalorder %s8583_s14, %s9056_s10 }
  0xaf   :  { %p8589_p12 = pnand %p8587_p11, %p8584_p10 }
  0xb1   :  { %8592 = shalt.err (!%p8589_p12)
}
  0xb2   :  { %s8593_s21 = scalar_lea.vmem %s144_s16, 112  ;;  %s8597_s8 = scalar_lea.vmem %s144_s16, 128 }
  0xb3   :  { %p8594_p13 = scmp.ne.s32.totalorder %s144_s16, %s8593_s21  ;;  %p8598_p0 = scmp.lt.s32.totalorder %s144_s16, %s144_s16 }
  0xb4   :  { %p8599_p1 = scmp.lt.s32.totalorder %s8597_s8, %s8593_s21 }
  0xb6   :  { %p8600_p2 = por %p8599_p1, %p8598_p0 }
  0xb8   :  { %p8601_p3 = pnand %p8600_p2, %p8594_p13 }
  0xba   :  { %8604 = shalt.err (!%p8601_p3)
}
  0xbb   :  { %146 = dma.hbm_to_vmem [thread:$0]  %s9056_s10, 112, %s144_s16, [#allocation18]  }
  0xbc   :  { %8627 = dma.done.wait [#allocation3], 128  }
  0xbd   :  { %8628 = vsyncadd [#allocation3], 4294967168 }
  0xbe   :  { %8629 = dma.done.wait [#allocation6], 1280  }
  0xbf   :  { %8630 = vsyncadd [#allocation6], 4294966016 }
  0xc0   :  { %8631 = dma.done.wait [#allocation9], 2080  }
  0xc1   :  { %8632 = vsyncadd [#allocation9], 4294965216 }
  0xc2   :  { %8633 = dma.done.wait [#allocation12], 8256  }
  0xc3   :  { %8634 = vsyncadd [#allocation12], 4294959040 }
  0xc4   :  { %8635 = dma.done.wait [#allocation15], 32896  }
  0xc5   :  { %8636 = vsyncadd [#allocation15], 4294934400 }
  0xc6   :  { %8637 = dma.done.wait [#allocation18], 57456  }
  0xc7   :  { %8638 = vsyncadd [#allocation18], 4294909840  ;;  %v8662_v0 = vmov 0.0   ;;  %vm8663_vm0 = vmmov 0   ;;  %v7566_v1 = vld [vmem:[#allocation7] sm:$0xff]   ;;  %v7567_v2 = vld [vmem:[#allocation7 + $0x8] sm:$0xff]  }
  0xc8   :  { %7439 = vmatprep.subr.bf16.mxu0 %v8662_v0  ;;  %7455 = vmatprep.mubr.msk.bf16.mxu0 %vm8663_vm0, %v8662_v0  ;;  %v7568_v3 = vld [vmem:[#allocation7 + $0x10] sm:$0xff]   ;;  %v7569_v4 = vld [vmem:[#allocation7 + $0x18] sm:$0xff]   ;;  %v7575_v5 = vld [vmem:[#allocation8 + $0x4] ss:$8 sps:$4 sm:$0xff]   ;;  %v8664_v26 = vmov 0   ;;  %s8665_s10 = smov [#allocation20]  }
  0xc9   :  { %7440 = vmatpush3.bf16.msra.mxu0 %v7566_v1  ;;  %v7577_v6 = vld [vmem:[#allocation8] ss:$8 sps:$4 sm:$0xff]   ;;  %411 = vmatprep.subr.bf16.mxu1 %v7575_v5  ;;  %v7578_v7 = vld [vmem:[#allocation8 + $0x14] ss:$8 sps:$4 sm:$0xff]   ;;  %v7580_v8 = vld [vmem:[#allocation8 + $0x10] ss:$8 sps:$4 sm:$0xff]  }
  0xca   :  { %7441 = vmatprep.subr.bf16.mxu0 %v8662_v0  ;;  %412 = vmatpush1.bf16.msra.mxu1 %v7577_v6  ;;  %v7581_v9 = vld [vmem:[#allocation8 + $0x24] ss:$8 sps:$4 sm:$0xff]   ;;  %v7583_v12 = vld [vmem:[#allocation8 + $0x20] ss:$8 sps:$4 sm:$0xff]   ;;  %v7584_v13 = vld [vmem:[#allocation8 + $0x34] ss:$8 sps:$4 sm:$0xff]  }
  0xcb   :  { %413 = vmatprep.subr.bf16.mxu1 %v7578_v7  ;;  %v7570_v10 = vld [vmem:[#allocation7 + $0x20] sm:$0xff]   ;;  %v7571_v11 = vld [vmem:[#allocation7 + $0x28] sm:$0xff]   ;;  %v7586_v14 = vld [vmem:[#allocation8 + $0x30] ss:$8 sps:$4 sm:$0xff]   ;;  %443 = vmatprep.mubr.bf16.mxu1 %v8664_v26  ;;  %s6532_s20 = sshll.u32 %s8665_s10, 4  ;;  %s6533_s20 = int_to_ptr.vmem [resolvable:$true] %s6532_s20 }
  0xcc   :  { %v7587_v15 = vld [vmem:[#allocation8 + $0x44] ss:$8 sps:$4 sm:$0xff]   ;;  %v7572_v16 = vld [vmem:[#allocation7 + $0x30] sm:$0xff]   ;;  %v7589_v17 = vld [vmem:[#allocation8 + $0x40] ss:$8 sps:$4 sm:$0xff]   ;;  %s8605_s22 = scalar_lea.vmem %s6533_s20, 1792  ;;  %p8610_p5 = scmp.lt.s32.totalorder %s6533_s20, %s6533_s20 }
  0xcd   :  { %7442 = vmatpush3.bf16.msra.mxu0 %v7567_v2  ;;  %v7590_v18 = vld [vmem:[#allocation8 + $0x54] ss:$8 sps:$4 sm:$0xff]   ;;  %v7592_v20 = vld [vmem:[#allocation8 + $0x50] ss:$8 sps:$4 sm:$0xff]   ;;  %v7574_v21 = vld [vmem:[#allocation2] sm:$0xff]   ;;  %p8606_p4 = scmp.ne.s32.totalorder %s6533_s20, %s8605_s22  ;;  %p8611_p6 = scmp.lt.s32.totalorder %s8605_s22, %s8605_s22 }
  0xce   :  { %7443 = vmatprep.subr.bf16.mxu0 %v8662_v0  ;;  %414 = vmatpush1.bf16.msra.mxu1 %v7580_v8  ;;  %v7573_v19 = vld [vmem:[#allocation7 + $0x38] sm:$0xff]   ;;  %v7593_v22 = vld [vmem:[#allocation8 + $0x64] ss:$8 sps:$4 sm:$0xff]   ;;  %v7595_v23 = vld [vmem:[#allocation8 + $0x60] ss:$8 sps:$4 sm:$0xff]  }
  0xcf   :  { %415 = vmatprep.subr.bf16.mxu1 %v7581_v9  ;;  %v7596_v24 = vld [vmem:[#allocation8 + $0x74] ss:$8 sps:$4 sm:$0xff]   ;;  %v7598_v25 = vld [vmem:[#allocation8 + $0x70] ss:$8 sps:$4 sm:$0xff]   ;;  %v988_v9 = vld [vmem:[#allocation14] sm:$0xff]  ;;  %p8612_p7 = por %p8611_p6, %p8610_p5 }
  0xd0   :  { %v7601_v27 = vld [vmem:[#allocation11 + $0x4] ss:$16 sps:$4 sm:$0xff]   ;;  %v7599_v40 = vld [vmem:[#allocation11] ss:$16 sps:$4 sm:$0xff]   ;;  %v7649_v8 = vld [vmem:[#allocation11 + $0xc] ss:$16 sps:$4 sm:$0xff]  }
  0xd1   :  { %7444 = vmatpush3.bf16.msra.mxu0 %v7568_v3  ;;  %v199_v28 = vld [vmem:[#allocation5] sm:$0xff]  ;;  %v200_v30 = vld [vmem:[#allocation5 + $0x8] sm:$0xff]  ;;  %v1024_v26 = vld [vmem:[#allocation14 + $0x120] sm:$0xff]  ;;  %p8613_p8 = pnand %p8612_p7, %p8606_p4 }
  0xd2   :  { %7445 = vmatprep.subr.bf16.mxu0 %v8662_v0  ;;  %416 = vmatpush1.bf16.msra.mxu1 %v7583_v12  ;;  %v7604_v42 = vld [vmem:[#allocation11 + $0x24] ss:$16 sps:$4 sm:$0xff]   ;;  %v7602_v43 = vld [vmem:[#allocation11 + $0x20] ss:$16 sps:$4 sm:$0xff]  }
  0xd3   :  { %417 = vmatprep.subr.bf16.mxu1 %v7584_v13  ;;  %v7607_v44 = vld [vmem:[#allocation11 + $0x44] ss:$16 sps:$4 sm:$0xff]   ;;  %v7605_v45 = vld [vmem:[#allocation11 + $0x40] ss:$16 sps:$4 sm:$0xff]  }
  0xd4   :  { %v7610_v46 = vld [vmem:[#allocation11 + $0x64] ss:$16 sps:$4 sm:$0xff]   ;;  %v7608_v47 = vld [vmem:[#allocation11 + $0x60] ss:$16 sps:$4 sm:$0xff]  }
  0xd5   :  { %7446 = vmatpush3.bf16.msra.mxu0 %v7569_v4  ;;  %v7613_v48 = vld [vmem:[#allocation11 + $0x84] ss:$16 sps:$4 sm:$0xff]   ;;  %v7611_v49 = vld [vmem:[#allocation11 + $0x80] ss:$16 sps:$4 sm:$0xff]  }
  0xd6   :  { %7447 = vmatprep.subr.bf16.mxu0 %v8662_v0  ;;  %418 = vmatpush1.bf16.msra.mxu1 %v7586_v14  ;;  %v7616_v50 = vld [vmem:[#allocation11 + $0xa4] ss:$16 sps:$4 sm:$0xff]   ;;  %v7614_v51 = vld [vmem:[#allocation11 + $0xa0] ss:$16 sps:$4 sm:$0xff]  }
  0xd7   :  { %419 = vmatprep.subr.bf16.mxu1 %v7587_v15  ;;  %v7619_v52 = vld [vmem:[#allocation11 + $0xc4] ss:$16 sps:$4 sm:$0xff]   ;;  %v7617_v53 = vld [vmem:[#allocation11 + $0xc0] ss:$16 sps:$4 sm:$0xff]  }
  0xd8   :  { %v7622_v54 = vld [vmem:[#allocation11 + $0xe4] ss:$16 sps:$4 sm:$0xff]   ;;  %v7620_v55 = vld [vmem:[#allocation11 + $0xe0] ss:$16 sps:$4 sm:$0xff]  }
  0xd9   :  { %7448 = vmatpush3.bf16.msra.mxu0 %v7570_v10  ;;  %v7625_v56 = vld [vmem:[#allocation11 + $0x104] ss:$16 sps:$4 sm:$0xff]   ;;  %v7623_v57 = vld [vmem:[#allocation11 + $0x100] ss:$16 sps:$4 sm:$0xff]  }
  0xda   :  { %7449 = vmatprep.subr.bf16.mxu0 %v8662_v0  ;;  %420 = vmatpush1.bf16.msra.mxu1 %v7589_v17  ;;  %v7628_v58 = vld [vmem:[#allocation11 + $0x124] ss:$16 sps:$4 sm:$0xff]   ;;  %v7626_v59 = vld [vmem:[#allocation11 + $0x120] ss:$16 sps:$4 sm:$0xff]  }
  0xdb   :  { %421 = vmatprep.subr.bf16.mxu1 %v7590_v18  ;;  %v7631_v60 = vld [vmem:[#allocation11 + $0x144] ss:$16 sps:$4 sm:$0xff]   ;;  %v7629_v61 = vld [vmem:[#allocation11 + $0x140] ss:$16 sps:$4 sm:$0xff]  }
  0xdc   :  { %v7634_v62 = vld [vmem:[#allocation11 + $0x164] ss:$16 sps:$4 sm:$0xff]   ;;  %v7632_v63 = vld [vmem:[#allocation11 + $0x160] ss:$16 sps:$4 sm:$0xff]  }
  0xdd   :  { %7450 = vmatpush3.bf16.msra.mxu0 %v7571_v11  ;;  %v7635_v1 = vld [vmem:[#allocation11 + $0x180] ss:$16 sps:$4 sm:$0xff]   ;;  %v7640_v2 = vld [vmem:[#allocation11 + $0x1a4] ss:$16 sps:$4 sm:$0xff]  }
  0xde   :  { %7451 = vmatprep.subr.bf16.mxu0 %v8662_v0  ;;  %422 = vmatpush1.bf16.msra.mxu1 %v7592_v20  ;;  %v7638_v3 = vld [vmem:[#allocation11 + $0x1a0] ss:$16 sps:$4 sm:$0xff]   ;;  %v7643_v4 = vld [vmem:[#allocation11 + $0x1c4] ss:$16 sps:$4 sm:$0xff]  }
  0xdf   :  { %423 = vmatprep.subr.bf16.mxu1 %v7593_v22  ;;  %v7641_v5 = vld [vmem:[#allocation11 + $0x1c0] ss:$16 sps:$4 sm:$0xff]   ;;  %v7646_v6 = vld [vmem:[#allocation11 + $0x1e4] ss:$16 sps:$4 sm:$0xff]  }
  0xe0   :  { %v7644_v7 = vld [vmem:[#allocation11 + $0x1e0] ss:$16 sps:$4 sm:$0xff]   ;;  %v992_v10 = vld [vmem:[#allocation14 + $0x20] sm:$0xff] }
  0xe1   :  { %7452 = vmatpush3.bf16.msra.mxu0 %v7572_v16  ;;  %v6638_v11 = vcombine.low %v988_v9, %v992_v10  ;;  %v6639_v12 = vcombine.high %v988_v9, %v992_v10  ;;  %v996_v13 = vld [vmem:[#allocation14 + $0x40] sm:$0xff] }
  0xe2   :  { %7453 = vmatprep.subr.bf16.mxu0 %v8662_v0  ;;  %424 = vmatpush1.bf16.msra.mxu1 %v7595_v23  ;;  %v7637_v0 = vld [vmem:[#allocation11 + $0x184] ss:$16 sps:$4 sm:$0xff]  }
  0xe3   :  { %425 = vmatprep.subr.bf16.mxu1 %v7596_v24  ;;  %v1000_v14 = vld [vmem:[#allocation14 + $0x60] sm:$0xff] }
  0xe4   :  { %v6647_v15 = vcombine.high %v996_v13, %v1000_v14  ;;  %v6646_v16 = vcombine.low %v996_v13, %v1000_v14  ;;  %v1004_v17 = vld [vmem:[#allocation14 + $0x80] sm:$0xff] }
  0xe5   :  { %7454 = vmatpush3.bf16.msra.mxu0 %v7573_v19  ;;  %v1008_v18 = vld [vmem:[#allocation14 + $0xa0] sm:$0xff] }
  0xe6   :  { %426 = vmatpush1.bf16.msra.mxu1 %v7598_v25  ;;  %2566 = vmatprep.subr.bf16.mxu0 %v6639_v12  ;;  %v6655_v19 = vcombine.high %v1004_v17, %v1008_v18  ;;  %v6654_v20 = vcombine.low %v1004_v17, %v1008_v18  ;;  %v1016_v22 = vld [vmem:[#allocation14 + $0xe0] sm:$0xff] }
  0xe7   :  { %874 = vmatprep.subr.bf16.mxu1 %v7601_v27  ;;  %v1020_v25 = vld [vmem:[#allocation14 + $0x100] sm:$0xff] }
  0xe8   :  { %7456 = vmatmul.mubr.bf16.vlgmr.msra.gmra.mrb[0].mxu0 %v7574_v21  ;;  %v1012_v21 = vld [vmem:[#allocation14 + $0xc0] sm:$0xff]  ;;  %v6671_v27 = vcombine.high %v1020_v25, %v1024_v26 }
  0xe9   :  { %2567 = vmatpush1.bf16.msra.mxu0 %v6638_v11  ;;  %v6663_v23 = vcombine.high %v1012_v21, %v1016_v22  ;;  %v6662_v24 = vcombine.low %v1012_v21, %v1016_v22 }
  0xea   :  { %2568 = vmatprep.subr.bf16.mxu0 %v6647_v15 }
  0xed   :  { %2569 = vmatpush1.bf16.msra.mxu0 %v6646_v16 }
  0xee   :  { %2570 = vmatprep.subr.bf16.mxu0 %v6655_v19 }
  0xf1   :  { %2571 = vmatpush1.bf16.msra.mxu0 %v6654_v20 }
  0xf2   :  { %2572 = vmatprep.subr.bf16.mxu0 %v6663_v23 }
  0xf5   :  { %2573 = vmatpush1.bf16.msra.mxu0 %v6662_v24 }
  0xf6   :  { %2574 = vmatprep.subr.bf16.mxu0 %v6671_v27  ;;  %v7652_v27 = vld [vmem:[#allocation11 + $0x2c] ss:$16 sps:$4 sm:$0xff]  }
 0x1bb   :  { %v289_v29 = vpop.f32.mrb[0].mxu0 }
 0x1bc   :  { %v290_v31 = vadd.f32 %v289_v29, %v199_v28  ;;  %v7457_v32 = vpop.f32.mrb[1].mxu0  ;;  %v6670_v28 = vcombine.low %v1020_v25, %v1024_v26  ;;  %v1028_v29 = vld [vmem:[#allocation14 + $0x140] sm:$0xff] }
 0x1bd   :  { %v292_v33 = vpop.f32.mrb[2].mxu0  ;;  %v7647_v26 = vld [vmem:[#allocation11 + $0x8] ss:$16 sps:$4 sm:$0xff]  }
 0x1be   :  { %v298_v34 = vmul.f32 0.2, %v290_v31  ;;  %v293_v35 = vadd.f32 %v292_v33, %v200_v30  ;;  %v7458_v36 = vpop.f32.mrb[3].mxu0  ;;  %vm296_vm1 = vcmp.gt.f32.partialorder %v290_v31, 0.0  ;;  %v1032_v30 = vld [vmem:[#allocation14 + $0x160] sm:$0xff]  ;;  %2575 = vmatpush1.bf16.msra.mxu0 %v6670_v28 }
 0x1bf   :  { %v6678_v32 = vcombine.low %v1028_v29, %v1032_v30  ;;  %v1036_v33 = vld [vmem:[#allocation14 + $0x180] sm:$0xff] }
 0x1c0   :  { %vm297_vm2 = vcmp.gt.f32.partialorder %v293_v35, 0.0  ;;  %v299_v37 = vmul.f32 0.2, %v293_v35  ;;  %v300_v38 = vsel %vm296_vm1, %v290_v31, %v298_v34  ;;  %v6679_v31 = vcombine.high %v1028_v29, %v1032_v30  ;;  %v1040_v34 = vld [vmem:[#allocation14 + $0x1a0] sm:$0xff]  ;;  %v7655_v29 = vld [vmem:[#allocation11 + $0x4c] ss:$16 sps:$4 sm:$0xff]  }
 0x1c1   :  { %v6686_v36 = vcombine.low %v1036_v33, %v1040_v34  ;;  %v7650_v28 = vld [vmem:[#allocation11 + $0x28] ss:$16 sps:$4 sm:$0xff]  }
 0x1c2   :  { %v301_v39 = vsel %vm297_vm2, %v293_v35, %v299_v37  ;;  %2576 = vmatprep.subr.bf16.mxu0 %v6679_v31  ;;  %v6687_v35 = vcombine.high %v1036_v33, %v1040_v34  ;;  %v1044_v37 = vld [vmem:[#allocation14 + $0x1c0] sm:$0xff]  ;;  %v7658_v31 = vld [vmem:[#allocation11 + $0x6c] ss:$16 sps:$4 sm:$0xff]  }
 0x1c3   :  { %v302_v41 = vpack.c.bf16 %v301_v39, %v300_v38  ;;  %2577 = vmatpush1.bf16.msra.mxu0 %v6678_v32  ;;  %v1048_v38 = vld [vmem:[#allocation14 + $0x1e0] sm:$0xff]  ;;  %v7661_v33 = vld [vmem:[#allocation11 + $0x8c] ss:$16 sps:$4 sm:$0xff]  }
 0x1c4   :  { %2578 = vmatprep.subr.bf16.mxu0 %v6687_v35  ;;  %v6695_v39 = vcombine.high %v1044_v37, %v1048_v38  ;;  %v7653_v30 = vld [vmem:[#allocation11 + $0x48] ss:$16 sps:$4 sm:$0xff]   ;;  %v7664_v35 = vld [vmem:[#allocation11 + $0xac] ss:$16 sps:$4 sm:$0xff]  }
 0x1c5   :  { %444 = vmatmul.mubr.bf16.vlgmr.msra.gmra.mrb[0].mxu1 %v302_v41  ;;  %v1052_v41 = vld [vmem:[#allocation14 + $0x200] sm:$0xff] }
 0x1c6   :  { %875 = vmatpush1.bf16.msra.mxu1 %v7599_v40  ;;  %v6694_v40 = vcombine.low %v1044_v37, %v1048_v38  ;;  %v7656_v32 = vld [vmem:[#allocation11 + $0x68] ss:$16 sps:$4 sm:$0xff]   ;;  %v7667_v37 = vld [vmem:[#allocation11 + $0xcc] ss:$16 sps:$4 sm:$0xff]  }
 0x1c7   :  { %876 = vmatprep.subr.bf16.mxu1 %v7604_v42  ;;  %2579 = vmatpush1.bf16.msra.mxu0 %v6686_v36  ;;  %v1056_v42 = vld [vmem:[#allocation14 + $0x220] sm:$0xff] }
 0x1c8   :  { %2580 = vmatprep.subr.bf16.mxu0 %v6695_v39  ;;  %v7659_v34 = vld [vmem:[#allocation11 + $0x88] ss:$16 sps:$4 sm:$0xff]   ;;  %v7670_v39 = vld [vmem:[#allocation11 + $0xec] ss:$16 sps:$4 sm:$0xff]  }
 0x1c9   :  { %v7662_v36 = vld [vmem:[#allocation11 + $0xa8] ss:$16 sps:$4 sm:$0xff]  }
 0x1ca   :  { %877 = vmatpush1.bf16.msra.mxu1 %v7602_v43  ;;  %v6703_v43 = vcombine.high %v1052_v41, %v1056_v42  ;;  %v7665_v38 = vld [vmem:[#allocation11 + $0xc8] ss:$16 sps:$4 sm:$0xff]  }
 0x1cb   :  { %878 = vmatprep.subr.bf16.mxu1 %v7607_v44  ;;  %2581 = vmatpush1.bf16.msra.mxu0 %v6694_v40  ;;  %v6702_v44 = vcombine.low %v1052_v41, %v1056_v42  ;;  %v7668_v40 = vld [vmem:[#allocation11 + $0xe8] ss:$16 sps:$4 sm:$0xff]   ;;  %v7673_v41 = vld [vmem:[#allocation11 + $0x10c] ss:$16 sps:$4 sm:$0xff]  }
 0x1cc   :  { %2582 = vmatprep.subr.bf16.mxu0 %v6703_v43  ;;  %v7671_v42 = vld [vmem:[#allocation11 + $0x108] ss:$16 sps:$4 sm:$0xff]   ;;  %v7676_v43 = vld [vmem:[#allocation11 + $0x12c] ss:$16 sps:$4 sm:$0xff]  }
 0x1ce   :  { %879 = vmatpush1.bf16.msra.mxu1 %v7605_v45  ;;  %v1060_v45 = vld [vmem:[#allocation14 + $0x240] sm:$0xff] }
 0x1cf   :  { %880 = vmatprep.subr.bf16.mxu1 %v7610_v46  ;;  %v1064_v46 = vld [vmem:[#allocation14 + $0x260] sm:$0xff]  ;;  %2583 = vmatpush1.bf16.msra.mxu0 %v6702_v44 }
 0x1d0   :  { %v7674_v44 = vld [vmem:[#allocation11 + $0x128] ss:$16 sps:$4 sm:$0xff]  }
 0x1d2   :  { %881 = vmatpush1.bf16.msra.mxu1 %v7608_v47  ;;  %v6711_v47 = vcombine.high %v1060_v45, %v1064_v46 }
 0x1d3   :  { %882 = vmatprep.subr.bf16.mxu1 %v7613_v48  ;;  %v6710_v48 = vcombine.low %v1060_v45, %v1064_v46  ;;  %v7679_v45 = vld [vmem:[#allocation11 + $0x14c] ss:$16 sps:$4 sm:$0xff]   ;;  %v7677_v46 = vld [vmem:[#allocation11 + $0x148] ss:$16 sps:$4 sm:$0xff]  }
 0x1d4   :  { %2584 = vmatprep.subr.bf16.mxu0 %v6711_v47  ;;  %v7682_v47 = vld [vmem:[#allocation11 + $0x16c] ss:$16 sps:$4 sm:$0xff]  }
 0x1d5   :  { %2585 = vmatpush1.bf16.msra.mxu0 %v6710_v48  ;;  %v7680_v48 = vld [vmem:[#allocation11 + $0x168] ss:$16 sps:$4 sm:$0xff]  }
 0x1d6   :  { %883 = vmatpush1.bf16.msra.mxu1 %v7611_v49  ;;  %v321_v49 = vlaneseq }
 0x1d7   :  { %884 = vmatprep.subr.bf16.mxu1 %v7616_v50  ;;  %v1068_v50 = vld [vmem:[#allocation14 + $0x280] sm:$0xff] }
 0x1da   :  { %885 = vmatpush1.bf16.msra.mxu1 %v7614_v51  ;;  %v1072_v51 = vld [vmem:[#allocation14 + $0x2a0] sm:$0xff] }
 0x1db   :  { %886 = vmatprep.subr.bf16.mxu1 %v7619_v52  ;;  %v6719_v52 = vcombine.high %v1068_v50, %v1072_v51 }
 0x1dd   :  { %2586 = vmatprep.subr.bf16.mxu0 %v6719_v52  ;;  %v7686_v52 = vld [vmem:[#allocation11 + $0x1a8] ss:$16 sps:$4 sm:$0xff]  }
 0x1de   :  { %887 = vmatpush1.bf16.msra.mxu1 %v7617_v53  ;;  %v6718_v53 = vcombine.low %v1068_v50, %v1072_v51  ;;  %v7683_v50 = vld [vmem:[#allocation11 + $0x188] ss:$16 sps:$4 sm:$0xff]   ;;  %v7688_v51 = vld [vmem:[#allocation11 + $0x1ac] ss:$16 sps:$4 sm:$0xff]  }
 0x1df   :  { %888 = vmatprep.subr.bf16.mxu1 %v7622_v54  ;;  %v8860_v54 = vshrl.u32 %v321_v49, 7  ;;  %v7685_v49 = vld [vmem:[#allocation11 + $0x18c] ss:$16 sps:$4 sm:$0xff]  }
 0x1e0   :  { %2587 = vmatpush1.bf16.msra.mxu0 %v6718_v53  ;;  %v7691_v53 = vld [vmem:[#allocation11 + $0x1cc] ss:$16 sps:$4 sm:$0xff]  }
 0x1e2   :  { %889 = vmatpush1.bf16.msra.mxu1 %v7620_v55  ;;  %v1076_v55 = vld [vmem:[#allocation14 + $0x2c0] sm:$0xff] }
 0x1e3   :  { %890 = vmatprep.subr.bf16.mxu1 %v7625_v56  ;;  %v1080_v56 = vld [vmem:[#allocation14 + $0x2e0] sm:$0xff] }
 0x1e6   :  { %891 = vmatpush1.bf16.msra.mxu1 %v7623_v57  ;;  %v6727_v57 = vcombine.high %v1076_v55, %v1080_v56 }
 0x1e7   :  { %892 = vmatprep.subr.bf16.mxu1 %v7628_v58  ;;  %v6726_v58 = vcombine.low %v1076_v55, %v1080_v56  ;;  %v7689_v55 = vld [vmem:[#allocation11 + $0x1c8] ss:$16 sps:$4 sm:$0xff]   ;;  %v7694_v56 = vld [vmem:[#allocation11 + $0x1ec] ss:$16 sps:$4 sm:$0xff]  }
 0x1e8   :  { %2588 = vmatprep.subr.bf16.mxu0 %v6727_v57  ;;  %v989_v57 = vld [vmem:[#allocation14 + $0x8] sm:$0xff] }
 0x1e9   :  { %2589 = vmatpush1.bf16.msra.mxu0 %v6726_v58  ;;  %v993_v58 = vld [vmem:[#allocation14 + $0x28] sm:$0xff] }
 0x1ea   :  { %893 = vmatpush1.bf16.msra.mxu1 %v7626_v59  ;;  %v8863_v59 = vsub.s32 0, %v8860_v54 }
 0x1eb   :  { %894 = vmatprep.subr.bf16.mxu1 %v7631_v60  ;;  %v1084_v60 = vld [vmem:[#allocation14 + $0x300] sm:$0xff] }
 0x1ee   :  { %895 = vmatpush1.bf16.msra.mxu1 %v7629_v61  ;;  %v1088_v61 = vld [vmem:[#allocation14 + $0x320] sm:$0xff] }
 0x1ef   :  { %896 = vmatprep.subr.bf16.mxu1 %v7634_v62  ;;  %v319_v62 = vld [vmem:[#allocation10] sm:$0x3] }
 0x1f2   :  { %897 = vmatpush1.bf16.msra.mxu1 %v7632_v63  ;;  %v8866_v63 = vsub.s32 1, %v8860_v54 }
 0x1f3   :  { %898 = vmatprep.subr.bf16.mxu1 %v7637_v0  ;;  %v6735_v0 = vcombine.high %v1084_v60, %v1088_v61 }
 0x1f5   :  { %2590 = vmatprep.subr.bf16.mxu0 %v6735_v0  ;;  %v1001_v0 = vld [vmem:[#allocation14 + $0x68] sm:$0xff] }
 0x1f6   :  { %899 = vmatpush1.bf16.msra.mxu1 %v7635_v1  ;;  %v6734_v1 = vcombine.low %v1084_v60, %v1088_v61  ;;  %v7692_v60 = vld [vmem:[#allocation11 + $0x1e8] ss:$16 sps:$4 sm:$0xff]   ;;  %v6641_v61 = vcombine.high %v989_v57, %v993_v58 }
 0x1f7   :  { %900 = vmatprep.subr.bf16.mxu1 %v7640_v2  ;;  %v324_v2 = vrot.slane %v319_v62, %v8863_v59 }
 0x1f8   :  { %2591 = vmatpush1.bf16.msra.mxu0 %v6734_v1  ;;  %v6640_v1 = vcombine.low %v989_v57, %v993_v58 }
 0x1fa   :  { %901 = vmatpush1.bf16.msra.mxu1 %v7638_v3  ;;  %v1092_v3 = vld [vmem:[#allocation14 + $0x340] sm:$0xff] }
 0x1fb   :  { %902 = vmatprep.subr.bf16.mxu1 %v7643_v4  ;;  %v1096_v4 = vld [vmem:[#allocation14 + $0x360] sm:$0xff] }
 0x1fe   :  { %903 = vmatpush1.bf16.msra.mxu1 %v7641_v5  ;;  %v328_v5 = vrot.slane %v319_v62, %v8866_v63  ;;  %v997_v62 = vld [vmem:[#allocation14 + $0x48] sm:$0xff] }
 0x1ff   :  { %904 = vmatprep.subr.bf16.mxu1 %v7646_v6  ;;  %v6743_v6 = vcombine.high %v1092_v3, %v1096_v4 }
 0x201   :  { %2592 = vmatprep.subr.bf16.mxu0 %v6743_v6 }
 0x202   :  { %905 = vmatpush1.bf16.msra.mxu1 %v7644_v7 }
 0x203   :  { %917 = vmatprep.subr.bf16.mxu1 %v7649_v8  ;;  %v6742_v8 = vcombine.low %v1092_v3, %v1096_v4  ;;  %v1005_v3 = vld [vmem:[#allocation14 + $0x88] sm:$0xff] }
 0x204   :  { %v1009_v4 = vld [vmem:[#allocation14 + $0xa8] sm:$0xff] }
 0x205   :  { %2593 = vmatpush1.bf16.msra.mxu0 %v6742_v8  ;;  %v6657_v6 = vcombine.high %v1005_v3, %v1009_v4  ;;  %v1017_v8 = vld [vmem:[#allocation14 + $0xe8] sm:$0xff] }
 0x298   :  { %v445_v7 = vpop.f32.mrb[0].mxu1 }
 0x299   :  { %v446_v9 = vadd.f32 %v445_v7, %v324_v2  ;;  %v447_v10 = vpop.f32.mrb[1].mxu1  ;;  %v1013_v7 = vld [vmem:[#allocation14 + $0xc8] sm:$0xff] }
 0x29a   :  { %v448_v11 = vadd.f32 %v447_v10, %v328_v5  ;;  %v449_v12 = vpop.f32.mrb[2].mxu1  ;;  %v6665_v10 = vcombine.high %v1013_v7, %v1017_v8 }
 0x29b   :  { %v458_v13 = vmul.f32 0.2, %v446_v9  ;;  %v450_v14 = vadd.f32 %v449_v12, %v324_v2  ;;  %v451_v15 = vpop.f32.mrb[3].mxu1  ;;  %vm454_vm3 = vcmp.gt.f32.partialorder %v446_v9, 0.0  ;;  %v6649_v2 = vcombine.high %v997_v62, %v1001_v0  ;;  %v1025_v12 = vld [vmem:[#allocation14 + $0x128] sm:$0xff] }
 0x29c   :  { %v459_v16 = vmul.f32 0.2, %v448_v11  ;;  %v452_v17 = vadd.f32 %v451_v15, %v328_v5  ;;  %vm455_vm4 = vcmp.gt.f32.partialorder %v448_v11, 0.0  ;;  %v6648_v5 = vcombine.low %v997_v62, %v1001_v0  ;;  %v1029_v15 = vld [vmem:[#allocation14 + $0x148] sm:$0xff] }
 0x29d   :  { %vm456_vm5 = vcmp.gt.f32.partialorder %v450_v14, 0.0  ;;  %v460_v18 = vmul.f32 0.2, %v450_v14  ;;  %v462_v20 = vsel %vm454_vm3, %v446_v9, %v458_v13  ;;  %v6656_v9 = vcombine.low %v1005_v3, %v1009_v4 }
 0x29e   :  { %vm457_vm6 = vcmp.gt.f32.partialorder %v452_v17, 0.0  ;;  %v461_v19 = vmul.f32 0.2, %v452_v17  ;;  %v463_v23 = vsel %vm455_vm4, %v448_v11, %v459_v16  ;;  %v1021_v11 = vld [vmem:[#allocation14 + $0x108] sm:$0xff]  ;;  %v6664_v13 = vcombine.low %v1013_v7, %v1017_v8 }
 0x29f   :  { %v464_v21 = vsel %vm456_vm5, %v450_v14, %v460_v18  ;;  %v6673_v14 = vcombine.high %v1021_v11, %v1025_v12  ;;  %v1033_v16 = vld [vmem:[#allocation14 + $0x168] sm:$0xff] }
 0x2a0   :  { %v8870_v22 = vpack.c.bf16 %v464_v21, %v462_v20  ;;  %v465_v24 = vsel %vm457_vm6, %v452_v17, %v461_v19  ;;  %v6672_v17 = vcombine.low %v1021_v11, %v1025_v12  ;;  %v6681_v18 = vcombine.high %v1029_v15, %v1033_v16  ;;  %v1037_v19 = vld [vmem:[#allocation14 + $0x188] sm:$0xff] }
 0x2a1   :  { %v467_v25 = vpack.c.bf16 %v465_v24, %v463_v23  ;;  %v1041_v20 = vld [vmem:[#allocation14 + $0x1a8] sm:$0xff]  ;;  %v6680_v21 = vcombine.low %v1029_v15, %v1033_v16  ;;  %v8890_v15 = vld [vmem:[#allocation13] sm:$0xf] }
 0x2a2   :  { %v1045_v23 = vld [vmem:[#allocation14 + $0x1c8] sm:$0xff]  ;;  %v537_v16 = vrot.slane %v8890_v15, %v8863_v59 }
 0x2a3   :  { %906 = vmatprep.mubr.bf16.mxu1 %v467_v25  ;;  %v1049_v24 = vld [vmem:[#allocation14 + $0x1e8] sm:$0xff] }
 0x2a4   :  { %907 = vmatmul.mubr.bf16.vlgmr.msra.gmra.mrb[4].mxu1 %v8870_v22 }
 0x2a5   :  { %918 = vmatpush1.bf16.msra.mxu1 %v7647_v26  ;;  %949 = vmatprep.mubr.bf16.mxu1 %v467_v25  ;;  %v1100_v25 = vld [vmem:[#allocation14 + $0x380] sm:$0xff] }
 0x2a6   :  { %919 = vmatprep.subr.bf16.mxu1 %v7652_v27  ;;  %v1104_v26 = vld [vmem:[#allocation14 + $0x3a0] sm:$0xff]  ;;  %v6688_v27 = vcombine.low %v1037_v19, %v1041_v20 }
 0x2a9   :  { %920 = vmatpush1.bf16.msra.mxu1 %v7650_v28  ;;  %v6751_v28 = vcombine.high %v1100_v25, %v1104_v26 }
 0x2aa   :  { %921 = vmatprep.subr.bf16.mxu1 %v7655_v29  ;;  %v6697_v29 = vcombine.high %v1045_v23, %v1049_v24 }
 0x2ab   :  { %2594 = vmatprep.subr.bf16.mxu0 %v6751_v28 }
 0x2ad   :  { %922 = vmatpush1.bf16.msra.mxu1 %v7653_v30  ;;  %v6750_v30 = vcombine.low %v1100_v25, %v1104_v26 }
 0x2ae   :  { %923 = vmatprep.subr.bf16.mxu1 %v7658_v31  ;;  %v1053_v31 = vld [vmem:[#allocation14 + $0x208] sm:$0xff] }
 0x2af   :  { %2595 = vmatpush1.bf16.msra.mxu0 %v6750_v30  ;;  %v1124_v30 = vld [vmem:[#allocation14 + $0x440] sm:$0xff] }
 0x2b1   :  { %924 = vmatpush1.bf16.msra.mxu1 %v7656_v32  ;;  %v1057_v32 = vld [vmem:[#allocation14 + $0x228] sm:$0xff] }
 0x2b2   :  { %925 = vmatprep.subr.bf16.mxu1 %v7661_v33  ;;  %v1108_v33 = vld [vmem:[#allocation14 + $0x3c0] sm:$0xff] }
 0x2b5   :  { %926 = vmatpush1.bf16.msra.mxu1 %v7659_v34  ;;  %v1112_v34 = vld [vmem:[#allocation14 + $0x3e0] sm:$0xff] }
 0x2b6   :  { %927 = vmatprep.subr.bf16.mxu1 %v7664_v35  ;;  %v6696_v35 = vcombine.low %v1045_v23, %v1049_v24 }
 0x2b9   :  { %928 = vmatpush1.bf16.msra.mxu1 %v7662_v36  ;;  %v6759_v36 = vcombine.high %v1108_v33, %v1112_v34 }
 0x2ba   :  { %929 = vmatprep.subr.bf16.mxu1 %v7667_v37  ;;  %v6705_v37 = vcombine.high %v1053_v31, %v1057_v32 }
 0x2bb   :  { %2596 = vmatprep.subr.bf16.mxu0 %v6759_v36 }
 0x2bd   :  { %930 = vmatpush1.bf16.msra.mxu1 %v7665_v38  ;;  %v6758_v38 = vcombine.low %v1108_v33, %v1112_v34  ;;  %v1128_v33 = vld [vmem:[#allocation14 + $0x460] sm:$0xff]  ;;  %v1125_v34 = vld [vmem:[#allocation14 + $0x448] sm:$0xff] }
 0x2be   :  { %931 = vmatprep.subr.bf16.mxu1 %v7670_v39  ;;  %v1061_v39 = vld [vmem:[#allocation14 + $0x248] sm:$0xff] }
 0x2bf   :  { %2597 = vmatpush1.bf16.msra.mxu0 %v6758_v38 }
 0x2c1   :  { %932 = vmatpush1.bf16.msra.mxu1 %v7668_v40  ;;  %v1065_v40 = vld [vmem:[#allocation14 + $0x268] sm:$0xff] }
 0x2c2   :  { %933 = vmatprep.subr.bf16.mxu1 %v7673_v41  ;;  %v8874_v41 = vld [vmem:[#allocation14 + $0x400] sm:$0xff] }
 0x2c5   :  { %934 = vmatpush1.bf16.msra.mxu1 %v7671_v42  ;;  %v8876_v42 = vld [vmem:[#allocation14 + $0x420] sm:$0xff] }
 0x2c6   :  { %935 = vmatprep.subr.bf16.mxu1 %v7676_v43  ;;  %v8878_v43 = vld [vmem:[#allocation14 + $0x408] sm:$0xff] }
 0x2c9   :  { %936 = vmatpush1.bf16.msra.mxu1 %v7674_v44  ;;  %v6704_v44 = vcombine.low %v1053_v31, %v1057_v32 }
 0x2ca   :  { %937 = vmatprep.subr.bf16.mxu1 %v7679_v45  ;;  %v6767_v45 = vcombine.high %v8874_v41, %v8876_v42 }
 0x2cc   :  { %2609 = vmatprep.subr.bf16.mxu0 %v6767_v45  ;;  %v1132_v45 = vld [vmem:[#allocation14 + $0x480] sm:$0xff] }
 0x2cd   :  { %938 = vmatpush1.bf16.msra.mxu1 %v7677_v46  ;;  %v8882_v46 = vld [vmem:[#allocation14 + $0x428] sm:$0xff] }
 0x2ce   :  { %939 = vmatprep.subr.bf16.mxu1 %v7682_v47  ;;  %v6713_v47 = vcombine.high %v1061_v39, %v1065_v40 }
 0x2d1   :  { %940 = vmatpush1.bf16.msra.mxu1 %v7680_v48  ;;  %v6766_v48 = vcombine.low %v8874_v41, %v8876_v42 }
 0x2d2   :  { %941 = vmatprep.subr.bf16.mxu1 %v7685_v49  ;;  %v6768_v49 = vcombine.low %v8878_v43, %v8882_v46 }
 0x2d5   :  { %942 = vmatpush1.bf16.msra.mxu1 %v7683_v50  ;;  %v1069_v50 = vld [vmem:[#allocation14 + $0x288] sm:$0xff] }
 0x2d6   :  { %943 = vmatprep.subr.bf16.mxu1 %v7688_v51  ;;  %v1073_v51 = vld [vmem:[#allocation14 + $0x2a8] sm:$0xff] }
 0x2d7   :  { %v6720_v57 = vcombine.low %v1069_v50, %v1073_v51 }
 0x2d9   :  { %944 = vmatpush1.bf16.msra.mxu1 %v7686_v52  ;;  %v6712_v52 = vcombine.low %v1061_v39, %v1065_v40  ;;  %v6775_v40 = vcombine.high %v1124_v30, %v1128_v33 }
 0x2da   :  { %945 = vmatprep.subr.bf16.mxu1 %v7691_v53  ;;  %v6721_v53 = vcombine.high %v1069_v50, %v1073_v51  ;;  %v1133_v50 = vld [vmem:[#allocation14 + $0x488] sm:$0xff] }
 0x2db   :  { %v1137_v51 = vld [vmem:[#allocation14 + $0x4a8] sm:$0xff] }
 0x2dd   :  { %946 = vmatpush1.bf16.msra.mxu1 %v7689_v55  ;;  %v1077_v55 = vld [vmem:[#allocation14 + $0x2c8] sm:$0xff] }
 0x2de   :  { %947 = vmatprep.subr.bf16.mxu1 %v7694_v56  ;;  %v1081_v56 = vld [vmem:[#allocation14 + $0x2e8] sm:$0xff] }
 0x2df   :  { %v6729_v58 = vcombine.high %v1077_v55, %v1081_v56  ;;  %v6728_v62 = vcombine.low %v1077_v55, %v1081_v56  ;;  %v6785_v56 = vcombine.high %v1133_v50, %v1137_v51 }
 0x2e1   :  { %948 = vmatpush1.bf16.msra.mxu1 %v7692_v60  ;;  %v1085_v60 = vld [vmem:[#allocation14 + $0x308] sm:$0xff] }
 0x2e2   :  { %2652 = vmatprep.subr.bf16.mxu1 %v6641_v61  ;;  %v1089_v61 = vld [vmem:[#allocation14 + $0x328] sm:$0xff] }
 0x2e3   :  { %v6737_v0 = vcombine.high %v1085_v60, %v1089_v61  ;;  %v6736_v3 = vcombine.low %v1085_v60, %v1089_v61  ;;  %v1141_v60 = vld [vmem:[#allocation14 + $0x4c8] sm:$0xff] }
 0x2e4   :  { %950 = vmatmul.mubr.bf16.vlgmr.msra.gmra.mrb[8].mxu1 %v8870_v22  ;;  %v6689_v22 = vcombine.high %v1037_v19, %v1041_v20  ;;  %v1145_v61 = vld [vmem:[#allocation14 + $0x4e8] sm:$0xff] }
 0x2e5   :  { %2653 = vmatpush1.bf16.msra.mxu1 %v6640_v1  ;;  %v1093_v1 = vld [vmem:[#allocation14 + $0x348] sm:$0xff]  ;;  %v6793_v42 = vcombine.high %v1141_v60, %v1145_v61 }
 0x2e6   :  { %2654 = vmatprep.subr.bf16.mxu1 %v6649_v2  ;;  %v1097_v2 = vld [vmem:[#allocation14 + $0x368] sm:$0xff] }
 0x2e7   :  { %v6745_v4 = vcombine.high %v1093_v1, %v1097_v2  ;;  %v6744_v7 = vcombine.low %v1093_v1, %v1097_v2  ;;  %v6792_v2 = vcombine.low %v1141_v60, %v1145_v61 }
 0x2e9   :  { %2655 = vmatpush1.bf16.msra.mxu1 %v6648_v5  ;;  %v1101_v5 = vld [vmem:[#allocation14 + $0x388] sm:$0xff] }
 0x2ea   :  { %2656 = vmatprep.subr.bf16.mxu1 %v6657_v6  ;;  %v1105_v6 = vld [vmem:[#allocation14 + $0x3a8] sm:$0xff] }
 0x2eb   :  { %v6753_v8 = vcombine.high %v1101_v5, %v1105_v6  ;;  %v6752_v11 = vcombine.low %v1101_v5, %v1105_v6  ;;  %v1156_v5 = vld [vmem:[#allocation14 + $0x540] sm:$0xff] }
 0x2ec   :  { %v1160_v6 = vld [vmem:[#allocation14 + $0x560] sm:$0xff] }
 0x2ed   :  { %2657 = vmatpush1.bf16.msra.mxu1 %v6656_v9  ;;  %v1109_v9 = vld [vmem:[#allocation14 + $0x3c8] sm:$0xff] }
 0x2ee   :  { %2658 = vmatprep.subr.bf16.mxu1 %v6665_v10  ;;  %v1113_v10 = vld [vmem:[#allocation14 + $0x3e8] sm:$0xff] }
 0x2ef   :  { %v6761_v12 = vcombine.high %v1109_v9, %v1113_v10 }
 0x2f1   :  { %2659 = vmatpush1.bf16.msra.mxu1 %v6664_v13  ;;  %v6760_v13 = vcombine.low %v1109_v9, %v1113_v10 }
 0x2f2   :  { %2660 = vmatprep.subr.bf16.mxu1 %v6673_v14  ;;  %v6769_v14 = vcombine.high %v8878_v43, %v8882_v46  ;;  %v1148_v43 = vld [vmem:[#allocation14 + $0x500] sm:$0xff] }
 0x2f3   :  { %v1152_v46 = vld [vmem:[#allocation14 + $0x520] sm:$0xff] }
 0x2f4   :  { %v6798_v9 = vcombine.low %v1148_v43, %v1152_v46 }
 0x2f5   :  { %2661 = vmatpush1.bf16.msra.mxu1 %v6672_v17  ;;  %v541_v17 = vrot.slane %v8890_v15, %v8866_v63 }
 0x2f6   :  { %2662 = vmatprep.subr.bf16.mxu1 %v6681_v18 }
 0x2f9   :  { %2663 = vmatpush1.bf16.msra.mxu1 %v6680_v21 }
 0x2fa   :  { %2664 = vmatprep.subr.bf16.mxu1 %v6689_v22 }
 0x2fd   :  { %2665 = vmatpush1.bf16.msra.mxu1 %v6688_v27 }
 0x2fe   :  { %2666 = vmatprep.subr.bf16.mxu1 %v6697_v29 }
 0x301   :  { %2667 = vmatpush1.bf16.msra.mxu1 %v6696_v35  ;;  %v1129_v35 = vld [vmem:[#allocation14 + $0x468] sm:$0xff] }
 0x302   :  { %2668 = vmatprep.subr.bf16.mxu1 %v6705_v37 }
 0x305   :  { %2669 = vmatpush1.bf16.msra.mxu1 %v6704_v44  ;;  %v6777_v44 = vcombine.high %v1125_v34, %v1129_v35 }
 0x306   :  { %2670 = vmatprep.subr.bf16.mxu1 %v6713_v47  ;;  %v1136_v47 = vld [vmem:[#allocation14 + $0x4a0] sm:$0xff] }
 0x307   :  { %v6783_v55 = vcombine.high %v1132_v45, %v1136_v47 }
 0x309   :  { %2671 = vmatpush1.bf16.msra.mxu1 %v6712_v52  ;;  %v6774_v52 = vcombine.low %v1124_v30, %v1128_v33  ;;  %v1180_v30 = vld [vmem:[#allocation14 + $0x600] sm:$0xff]  ;;  %v1185_v33 = vld [vmem:[#allocation14 + $0x628] sm:$0xff] }
 0x30a   :  { %2672 = vmatprep.subr.bf16.mxu1 %v6721_v53  ;;  %v6776_v53 = vcombine.low %v1125_v34, %v1129_v35 }
 0x30d   :  { %2673 = vmatpush1.bf16.msra.mxu1 %v6720_v57  ;;  %v1140_v57 = vld [vmem:[#allocation14 + $0x4c0] sm:$0xff] }
 0x30e   :  { %2674 = vmatprep.subr.bf16.mxu1 %v6729_v58  ;;  %v1144_v58 = vld [vmem:[#allocation14 + $0x4e0] sm:$0xff] }
 0x30f   :  { %v6791_v41 = vcombine.high %v1140_v57, %v1144_v58  ;;  %v6790_v1 = vcombine.low %v1140_v57, %v1144_v58  ;;  %v1197_v57 = vld [vmem:[#allocation14 + $0x688] sm:$0xff] }
 0x310   :  { %v1201_v58 = vld [vmem:[#allocation14 + $0x6a8] sm:$0xff] }
 0x311   :  { %2675 = vmatpush1.bf16.msra.mxu1 %v6728_v62  ;;  %v6782_v62 = vcombine.low %v1132_v45, %v1136_v47  ;;  %v1189_v45 = vld [vmem:[#allocation14 + $0x648] sm:$0xff] }
 0x312   :  { %2676 = vmatprep.subr.bf16.mxu1 %v6737_v0  ;;  %v6784_v0 = vcombine.low %v1133_v50, %v1137_v51  ;;  %v1193_v47 = vld [vmem:[#allocation14 + $0x668] sm:$0xff] }
 0x313   :  { %v6840_v61 = vcombine.low %v1189_v45, %v1193_v47 }
 0x315   :  { %2677 = vmatpush1.bf16.msra.mxu1 %v6736_v3  ;;  %v6799_v3 = vcombine.high %v1148_v43, %v1152_v46  ;;  %v1205_v43 = vld [vmem:[#allocation14 + $0x6c8] sm:$0xff] }
 0x316   :  { %2678 = vmatprep.subr.bf16.mxu1 %v6745_v4  ;;  %v1209_v46 = vld [vmem:[#allocation14 + $0x6e8] sm:$0xff] }
 0x319   :  { %2679 = vmatpush1.bf16.msra.mxu1 %v6744_v7  ;;  %v1157_v7 = vld [vmem:[#allocation14 + $0x548] sm:$0xff] }
 0x31a   :  { %2680 = vmatprep.subr.bf16.mxu1 %v6753_v8  ;;  %v1161_v8 = vld [vmem:[#allocation14 + $0x568] sm:$0xff] }
 0x31d   :  { %2681 = vmatpush1.bf16.msra.mxu1 %v6752_v11  ;;  %v6807_v11 = vcombine.high %v1156_v5, %v1160_v6 }
 0x31e   :  { %2682 = vmatprep.subr.bf16.mxu1 %v6761_v12  ;;  %v6809_v12 = vcombine.high %v1157_v7, %v1161_v8 }
 0x321   :  { %2683 = vmatpush1.bf16.msra.mxu1 %v6760_v13  ;;  %v1164_v13 = vld [vmem:[#allocation14 + $0x580] sm:$0xff] }
 0x322   :  { %2695 = vmatprep.subr.bf16.mxu1 %v6769_v14  ;;  %v1168_v14 = vld [vmem:[#allocation14 + $0x5a0] sm:$0xff] }
 0x377   :  { %v908_v18 = vpop.f32.mrb[4].mxu1 }
 0x378   :  { %v909_v19 = vadd.f32 %v908_v18, %v537_v16  ;;  %v910_v20 = vpop.f32.mrb[5].mxu1  ;;  %v6806_v18 = vcombine.low %v1156_v5, %v1160_v6  ;;  %v1213_v5 = vld [vmem:[#allocation14 + $0x708] sm:$0xff] }
 0x379   :  { %v911_v21 = vadd.f32 %v910_v20, %v541_v17  ;;  %v912_v22 = vpop.f32.mrb[6].mxu1  ;;  %v6815_v20 = vcombine.high %v1164_v13, %v1168_v14  ;;  %v1217_v6 = vld [vmem:[#allocation14 + $0x728] sm:$0xff] }
 0x37a   :  { %v968_v23 = vmul.f32 0.2, %v909_v19  ;;  %v913_v24 = vadd.f32 %v912_v22, %v537_v16  ;;  %v914_v25 = vpop.f32.mrb[7].mxu1  ;;  %vm960_vm7 = vcmp.gt.f32.partialorder %v909_v19, 0.0  ;;  %v1165_v16 = vld [vmem:[#allocation14 + $0x588] sm:$0xff]  ;;  %v1172_v22 = vld [vmem:[#allocation14 + $0x5c0] sm:$0xff] }
 0x37b   :  { %v969_v26 = vmul.f32 0.2, %v911_v21  ;;  %v915_v27 = vadd.f32 %v914_v25, %v541_v17  ;;  %vm961_vm8 = vcmp.gt.f32.partialorder %v911_v21, 0.0  ;;  %v1169_v17 = vld [vmem:[#allocation14 + $0x5a8] sm:$0xff] }
 0x37c   :  { %vm964_vm9 = vcmp.gt.f32.partialorder %v913_v24, 0.0  ;;  %v972_v28 = vmul.f32 0.2, %v913_v24  ;;  %v976_v31 = vsel %vm960_vm7, %v909_v19, %v968_v23  ;;  %v6808_v19 = vcombine.low %v1157_v7, %v1161_v8  ;;  %v1176_v23 = vld [vmem:[#allocation14 + $0x5e0] sm:$0xff]  ;;  %v1177_v25 = vld [vmem:[#allocation14 + $0x5e8] sm:$0xff] }
 0x37d   :  { %vm965_vm10 = vcmp.gt.f32.partialorder %v915_v27, 0.0  ;;  %v973_v29 = vmul.f32 0.2, %v915_v27  ;;  %v977_v36 = vsel %vm961_vm8, %v911_v21, %v969_v26  ;;  %v6817_v21 = vcombine.high %v1165_v16, %v1169_v17 }
 0x37e   :  { %v980_v32 = vsel %vm964_vm9, %v913_v24, %v972_v28  ;;  %v1173_v24 = vld [vmem:[#allocation14 + $0x5c8] sm:$0xff]  ;;  %v6814_v26 = vcombine.low %v1164_v13, %v1168_v14  ;;  %v6823_v28 = vcombine.high %v1172_v22, %v1176_v23  ;;  %v6822_v34 = vcombine.low %v1172_v22, %v1176_v23  ;;  %v1228_v22 = vld [vmem:[#allocation14 + $0x780] sm:$0xff] }
 0x37f   :  { %v8896_v37 = vpack.c.bf16 %v980_v32, %v976_v31  ;;  %v981_v38 = vsel %vm965_vm10, %v915_v27, %v973_v29  ;;  %v6816_v27 = vcombine.low %v1165_v16, %v1169_v17  ;;  %v6825_v29 = vcombine.high %v1173_v24, %v1177_v25  ;;  %v1184_v31 = vld [vmem:[#allocation14 + $0x620] sm:$0xff]  ;;  %v1181_v32 = vld [vmem:[#allocation14 + $0x608] sm:$0xff] }
 0x380   :  { %v8898_v39 = vpack.c.bf16 %v981_v38, %v977_v36  ;;  %v6824_v35 = vcombine.low %v1173_v24, %v1177_v25  ;;  %v6831_v36 = vcombine.high %v1180_v30, %v1184_v31  ;;  %v6833_v38 = vcombine.high %v1181_v32, %v1185_v33  ;;  %v1221_v13 = vld [vmem:[#allocation14 + $0x748] sm:$0xff]  ;;  %v1232_v23 = vld [vmem:[#allocation14 + $0x7a0] sm:$0xff] }
 0x381   :  { %v6830_v50 = vcombine.low %v1180_v30, %v1184_v31  ;;  %v6832_v51 = vcombine.low %v1181_v32, %v1185_v33  ;;  %v6856_v8 = vcombine.low %v1205_v43, %v1209_v46  ;;  %v1225_v14 = vld [vmem:[#allocation14 + $0x768] sm:$0xff]  ;;  %v6864_v17 = vcombine.low %v1213_v5, %v1217_v6  ;;  %v1236_v32 = vld [vmem:[#allocation14 + $0x7c0] sm:$0xff] }
 0x382   :  { %2598 = vmatprep.mubr.bf16.mxu0 %v8898_v39  ;;  %2684 = vmatprep.mubr.bf16.mxu1 %v8898_v39  ;;  %v1229_v24 = vld [vmem:[#allocation14 + $0x788] sm:$0xff]  ;;  %v6879_v30 = vcombine.high %v1228_v22, %v1232_v23  ;;  %v1240_v33 = vld [vmem:[#allocation14 + $0x7e0] sm:$0xff] }
 0x383   :  { %2599 = vmatmul.mubr.bf16.vlgmr.msra.gmra.mrb[4].mxu0 %v8896_v37  ;;  %2685 = vmatmul.mubr.bf16.vlgmr.msra.gmra.mrb[12].mxu1 %v8896_v37  ;;  %v1233_v25 = vld [vmem:[#allocation14 + $0x7a8] sm:$0xff] }
 0x384   :  { %2610 = vmatpush1.bf16.msra.mxu0 %v6766_v48  ;;  %2696 = vmatpush1.bf16.msra.mxu1 %v6768_v49  ;;  %v1149_v48 = vld [vmem:[#allocation14 + $0x508] sm:$0xff]  ;;  %v6881_v31 = vcombine.high %v1229_v24, %v1233_v25 }
 0x385   :  { %2611 = vmatprep.subr.bf16.mxu0 %v6775_v40  ;;  %2697 = vmatprep.subr.bf16.mxu1 %v6777_v44  ;;  %v1153_v49 = vld [vmem:[#allocation14 + $0x528] sm:$0xff]  ;;  %v1188_v40 = vld [vmem:[#allocation14 + $0x640] sm:$0xff] }
 0x386   :  { %v6801_v4 = vcombine.high %v1149_v48, %v1153_v49  ;;  %v6800_v10 = vcombine.low %v1149_v48, %v1153_v49  ;;  %v1192_v44 = vld [vmem:[#allocation14 + $0x660] sm:$0xff]  ;;  %v6848_v49 = vcombine.low %v1197_v57, %v1201_v58 }
 0x387   :  { %v6838_v60 = vcombine.low %v1188_v40, %v1192_v44 }
 0x388   :  { %2612 = vmatpush1.bf16.msra.mxu0 %v6774_v52  ;;  %2698 = vmatpush1.bf16.msra.mxu1 %v6776_v53  ;;  %v6839_v52 = vcombine.high %v1188_v40, %v1192_v44  ;;  %v6841_v53 = vcombine.high %v1189_v45, %v1193_v47  ;;  %v6878_v44 = vcombine.low %v1228_v22, %v1232_v23 }
 0x389   :  { %2613 = vmatprep.subr.bf16.mxu0 %v6783_v55  ;;  %2699 = vmatprep.subr.bf16.mxu1 %v6785_v56  ;;  %v1196_v55 = vld [vmem:[#allocation14 + $0x680] sm:$0xff]  ;;  %v6880_v45 = vcombine.low %v1229_v24, %v1233_v25  ;;  %v1014_v25 = vld [vmem:[#allocation14 + $0xd0] sm:$0xff] }
 0x38a   :  { %v1200_v56 = vld [vmem:[#allocation14 + $0x6a0] sm:$0xff] }
 0x38b   :  { %v6846_v48 = vcombine.low %v1196_v55, %v1200_v56 }
 0x38c   :  { %2614 = vmatpush1.bf16.msra.mxu0 %v6782_v62  ;;  %2700 = vmatpush1.bf16.msra.mxu1 %v6784_v0  ;;  %v6847_v62 = vcombine.high %v1196_v55, %v1200_v56  ;;  %v6849_v0 = vcombine.high %v1197_v57, %v1201_v58  ;;  %v994_v57 = vld [vmem:[#allocation14 + $0x30] sm:$0xff]  ;;  %v991_v58 = vld [vmem:[#allocation14 + $0x18] sm:$0xff] }
 0x38d   :  { %2615 = vmatprep.subr.bf16.mxu0 %v6791_v41  ;;  %2701 = vmatprep.subr.bf16.mxu1 %v6793_v42  ;;  %v1204_v41 = vld [vmem:[#allocation14 + $0x6c0] sm:$0xff] }
 0x38e   :  { %v1208_v42 = vld [vmem:[#allocation14 + $0x6e0] sm:$0xff] }
 0x38f   :  { %v6854_v7 = vcombine.low %v1204_v41, %v1208_v42 }
 0x390   :  { %2616 = vmatpush1.bf16.msra.mxu0 %v6790_v1  ;;  %2702 = vmatpush1.bf16.msra.mxu1 %v6792_v2  ;;  %v6855_v1 = vcombine.high %v1204_v41, %v1208_v42  ;;  %v6857_v2 = vcombine.high %v1205_v43, %v1209_v46 }
 0x391   :  { %2617 = vmatprep.subr.bf16.mxu0 %v6799_v3  ;;  %2703 = vmatprep.subr.bf16.mxu1 %v6801_v4  ;;  %v1212_v3 = vld [vmem:[#allocation14 + $0x700] sm:$0xff] }
 0x392   :  { %v1216_v4 = vld [vmem:[#allocation14 + $0x720] sm:$0xff] }
 0x393   :  { %v6862_v16 = vcombine.low %v1212_v3, %v1216_v4 }
 0x394   :  { %2618 = vmatpush1.bf16.msra.mxu0 %v6798_v9  ;;  %2704 = vmatpush1.bf16.msra.mxu1 %v6800_v10  ;;  %v6863_v9 = vcombine.high %v1212_v3, %v1216_v4  ;;  %v6865_v10 = vcombine.high %v1213_v5, %v1217_v6  ;;  %v1002_v6 = vld [vmem:[#allocation14 + $0x70] sm:$0xff] }
 0x395   :  { %2619 = vmatprep.subr.bf16.mxu0 %v6807_v11  ;;  %2705 = vmatprep.subr.bf16.mxu1 %v6809_v12  ;;  %v1220_v11 = vld [vmem:[#allocation14 + $0x740] sm:$0xff] }
 0x396   :  { %v1224_v12 = vld [vmem:[#allocation14 + $0x760] sm:$0xff] }
 0x398   :  { %2620 = vmatpush1.bf16.msra.mxu0 %v6806_v18  ;;  %2706 = vmatpush1.bf16.msra.mxu1 %v6808_v19  ;;  %v8911_v18 = vsub.s32 2, %v8860_v54  ;;  %v6871_v19 = vcombine.high %v1220_v11, %v1224_v12 }
 0x399   :  { %2621 = vmatprep.subr.bf16.mxu0 %v6815_v20  ;;  %2707 = vmatprep.subr.bf16.mxu1 %v6817_v21  ;;  %v6873_v20 = vcombine.high %v1221_v13, %v1225_v14  ;;  %v8914_v21 = vsub.s32 3, %v8860_v54 }
 0x39c   :  { %2622 = vmatpush1.bf16.msra.mxu0 %v6814_v26  ;;  %2708 = vmatpush1.bf16.msra.mxu1 %v6816_v27  ;;  %v545_v26 = vrot.slane %v8890_v15, %v8911_v18  ;;  %v6870_v27 = vcombine.low %v1220_v11, %v1224_v12 }
 0x39d   :  { %2623 = vmatprep.subr.bf16.mxu0 %v6823_v28  ;;  %2709 = vmatprep.subr.bf16.mxu1 %v6825_v29  ;;  %v6872_v28 = vcombine.low %v1221_v13, %v1225_v14  ;;  %v549_v29 = vrot.slane %v8890_v15, %v8914_v21  ;;  %v990_v15 = vld [vmem:[#allocation14 + $0x10] sm:$0xff] }
 0x39e   :  { %v6643_v46 = vcombine.high %v990_v15, %v994_v57  ;;  %v1006_v14 = vld [vmem:[#allocation14 + $0x90] sm:$0xff] }
 0x3a0   :  { %2624 = vmatpush1.bf16.msra.mxu0 %v6822_v34  ;;  %2710 = vmatpush1.bf16.msra.mxu1 %v6824_v35  ;;  %v1237_v34 = vld [vmem:[#allocation14 + $0x7c8] sm:$0xff] }
 0x3a1   :  { %2625 = vmatprep.subr.bf16.mxu0 %v6831_v36  ;;  %2711 = vmatprep.subr.bf16.mxu1 %v6833_v38  ;;  %v1241_v35 = vld [vmem:[#allocation14 + $0x7e8] sm:$0xff] }
 0x3a2   :  { %v6888_v42 = vcombine.low %v1237_v34, %v1241_v35 }
 0x3a4   :  { %2626 = vmatpush1.bf16.msra.mxu0 %v6830_v50  ;;  %2712 = vmatpush1.bf16.msra.mxu1 %v6832_v51  ;;  %v6887_v51 = vcombine.high %v1236_v32, %v1240_v33 }
 0x3a5   :  { %2627 = vmatprep.subr.bf16.mxu0 %v6839_v52  ;;  %2713 = vmatprep.subr.bf16.mxu1 %v6841_v53  ;;  %v6889_v52 = vcombine.high %v1237_v34, %v1241_v35  ;;  %v1026_v34 = vld [vmem:[#allocation14 + $0x130] sm:$0xff]  ;;  %v1027_v35 = vld [vmem:[#allocation14 + $0x138] sm:$0xff] }
 0x3a8   :  { %2628 = vmatpush1.bf16.msra.mxu0 %v6838_v60  ;;  %2714 = vmatpush1.bf16.msra.mxu1 %v6840_v61  ;;  %v995_v60 = vld [vmem:[#allocation14 + $0x38] sm:$0xff] }
 0x3a9   :  { %2629 = vmatprep.subr.bf16.mxu0 %v6847_v62  ;;  %2715 = vmatprep.subr.bf16.mxu1 %v6849_v0  ;;  %v6886_v0 = vcombine.low %v1236_v32, %v1240_v33  ;;  %v6644_v11 = vcombine.low %v991_v58, %v995_v60  ;;  %v1022_v33 = vld [vmem:[#allocation14 + $0x110] sm:$0xff] }
 0x3ac   :  { %2630 = vmatpush1.bf16.msra.mxu0 %v6846_v48  ;;  %2716 = vmatpush1.bf16.msra.mxu1 %v6848_v49  ;;  %v6645_v48 = vcombine.high %v991_v58, %v995_v60  ;;  %v1039_v58 = vld [vmem:[#allocation14 + $0x198] sm:$0xff] }
 0x3ad   :  { %2631 = vmatprep.subr.bf16.mxu0 %v6855_v1  ;;  %2717 = vmatprep.subr.bf16.mxu1 %v6857_v2  ;;  %v998_v2 = vld [vmem:[#allocation14 + $0x50] sm:$0xff]  ;;  %v1043_v60 = vld [vmem:[#allocation14 + $0x1b8] sm:$0xff] }
 0x3ae   :  { %v6651_v12 = vcombine.high %v998_v2, %v1002_v6 }
 0x3b0   :  { %2632 = vmatpush1.bf16.msra.mxu0 %v6854_v7  ;;  %2718 = vmatpush1.bf16.msra.mxu1 %v6856_v8  ;;  %v999_v7 = vld [vmem:[#allocation14 + $0x58] sm:$0xff] }
 0x3b1   :  { %2633 = vmatprep.subr.bf16.mxu0 %v6863_v9  ;;  %2719 = vmatprep.subr.bf16.mxu1 %v6865_v10  ;;  %v1003_v8 = vld [vmem:[#allocation14 + $0x78] sm:$0xff]  ;;  %v6642_v10 = vcombine.low %v990_v15, %v994_v57  ;;  %v1042_v57 = vld [vmem:[#allocation14 + $0x1b0] sm:$0xff] }
 0x3b2   :  { %v6653_v13 = vcombine.high %v999_v7, %v1003_v8  ;;  %v6652_v22 = vcombine.low %v999_v7, %v1003_v8  ;;  %v1055_v7 = vld [vmem:[#allocation14 + $0x218] sm:$0xff] }
 0x3b3   :  { %v1059_v8 = vld [vmem:[#allocation14 + $0x238] sm:$0xff] }
 0x3b4   :  { %2634 = vmatpush1.bf16.msra.mxu0 %v6862_v16  ;;  %2720 = vmatpush1.bf16.msra.mxu1 %v6864_v17  ;;  %v1010_v16 = vld [vmem:[#allocation14 + $0xb0] sm:$0xff]  ;;  %v1007_v17 = vld [vmem:[#allocation14 + $0x98] sm:$0xff] }
 0x3b5   :  { %2635 = vmatprep.subr.bf16.mxu0 %v6871_v19  ;;  %2721 = vmatprep.subr.bf16.mxu1 %v6873_v20  ;;  %v1011_v19 = vld [vmem:[#allocation14 + $0xb8] sm:$0xff]  ;;  %v6650_v20 = vcombine.low %v998_v2, %v1002_v6  ;;  %v6659_v23 = vcombine.high %v1006_v14, %v1010_v16  ;;  %v1058_v6 = vld [vmem:[#allocation14 + $0x230] sm:$0xff] }
 0x3b6   :  { %v6661_v24 = vcombine.high %v1007_v17, %v1011_v19 }
 0x3b7   :  { %v951_v36 = vpop.f32.mrb[8].mxu1 }
 0x3b8   :  { %v952_v38 = vadd.f32 %v951_v36, %v545_v26  ;;  %v953_v40 = vpop.f32.mrb[9].mxu1  ;;  %2636 = vmatpush1.bf16.msra.mxu0 %v6870_v27  ;;  %2722 = vmatpush1.bf16.msra.mxu1 %v6872_v28  ;;  %v1015_v27 = vld [vmem:[#allocation14 + $0xd8] sm:$0xff] }
 0x3b9   :  { %v954_v47 = vadd.f32 %v953_v40, %v549_v29  ;;  %v955_v50 = vpop.f32.mrb[10].mxu1  ;;  %2637 = vmatprep.subr.bf16.mxu0 %v6879_v30  ;;  %2723 = vmatprep.subr.bf16.mxu1 %v6881_v31  ;;  %v1019_v28 = vld [vmem:[#allocation14 + $0xf8] sm:$0xff]  ;;  %v6660_v30 = vcombine.low %v1007_v17, %v1011_v19  ;;  %v6675_v40 = vcombine.high %v1022_v33, %v1026_v34 }
 0x3ba   :  { %v970_v53 = vmul.f32 0.2, %v952_v38  ;;  %v956_v55 = vadd.f32 %v955_v50, %v545_v26  ;;  %v957_v56 = vpop.f32.mrb[11].mxu1  ;;  %vm962_vm11 = vcmp.gt.f32.partialorder %v952_v38, 0.0  ;;  %v1018_v26 = vld [vmem:[#allocation14 + $0xf0] sm:$0xff]  ;;  %v6669_v32 = vcombine.high %v1015_v27, %v1019_v28  ;;  %v1031_v50 = vld [vmem:[#allocation14 + $0x158] sm:$0xff] }
 0x3bb   :  { %v971_v61 = vmul.f32 0.2, %v954_v47  ;;  %v958_v62 = vadd.f32 %v957_v56, %v549_v29  ;;  %vm963_vm12 = vcmp.gt.f32.partialorder %v954_v47, 0.0  ;;  %v6658_v29 = vcombine.low %v1006_v14, %v1010_v16  ;;  %v1038_v56 = vld [vmem:[#allocation14 + $0x190] sm:$0xff]  ;;  %v1063_v17 = vld [vmem:[#allocation14 + $0x258] sm:$0xff] }
 0x3bc   :  { %vm966_vm13 = vcmp.gt.f32.partialorder %v956_v55, 0.0  ;;  %v974_v41 = vmul.f32 0.2, %v956_v55  ;;  %2638 = vmatpush1.bf16.msra.mxu0 %v6878_v44  ;;  %2724 = vmatpush1.bf16.msra.mxu1 %v6880_v45  ;;  %v978_v49 = vsel %vm962_vm11, %v952_v38, %v970_v53  ;;  %v6667_v31 = vcombine.high %v1014_v25, %v1018_v26  ;;  %v1030_v45 = vld [vmem:[#allocation14 + $0x150] sm:$0xff]  ;;  %v1067_v19 = vld [vmem:[#allocation14 + $0x278] sm:$0xff] }
 0x3bd   :  { %vm967_vm14 = vcmp.gt.f32.partialorder %v958_v62, 0.0  ;;  %v975_v43 = vmul.f32 0.2, %v958_v62  ;;  %2639 = vmatprep.subr.bf16.mxu0 %v6887_v51  ;;  %2725 = vmatprep.subr.bf16.mxu1 %v6889_v52  ;;  %v979_v3 = vsel %vm963_vm12, %v954_v47, %v971_v61  ;;  %v6666_v36 = vcombine.low %v1014_v25, %v1018_v26  ;;  %v1034_v47 = vld [vmem:[#allocation14 + $0x170] sm:$0xff]  ;;  %v1035_v51 = vld [vmem:[#allocation14 + $0x178] sm:$0xff] }
 0x3be   :  { %v982_v1 = vsel %vm966_vm13, %v956_v55, %v974_v41  ;;  %v6668_v38 = vcombine.low %v1015_v27, %v1019_v28  ;;  %v6674_v52 = vcombine.low %v1022_v33, %v1026_v34  ;;  %v6683_v53 = vcombine.high %v1030_v45, %v1034_v47  ;;  %v1062_v14 = vld [vmem:[#allocation14 + $0x250] sm:$0xff]  ;;  %v1071_v27 = vld [vmem:[#allocation14 + $0x298] sm:$0xff] }
 0x3bf   :  { %v8921_v4 = vpack.c.bf16 %v982_v1, %v978_v49  ;;  %v983_v5 = vsel %vm967_vm14, %v958_v62, %v975_v43  ;;  %v6685_v55 = vcombine.high %v1031_v50, %v1035_v51  ;;  %v6682_v61 = vcombine.low %v1030_v45, %v1034_v47  ;;  %v1050_v43 = vld [vmem:[#allocation14 + $0x1f0] sm:$0xff]  ;;  %v1075_v28 = vld [vmem:[#allocation14 + $0x2b8] sm:$0xff] }
 0x3c0   :  { %v8923_v9 = vpack.c.bf16 %v983_v5, %v979_v3  ;;  %2640 = vmatpush1.bf16.msra.mxu0 %v6886_v0  ;;  %2726 = vmatpush1.bf16.msra.mxu1 %v6888_v42  ;;  %v6684_v62 = vcombine.low %v1031_v50, %v1035_v51  ;;  %v6691_v0 = vcombine.high %v1038_v56, %v1042_v57  ;;  %v1046_v42 = vld [vmem:[#allocation14 + $0x1d0] sm:$0xff]  ;;  %v1087_v50 = vld [vmem:[#allocation14 + $0x318] sm:$0xff] }
 0x3c1   :  { %2738 = vmatprep.subr.bf16.mxu0 %v6643_v46  ;;  %2824 = vmatprep.subr.bf16.mxu1 %v6645_v48  ;;  %v6693_v41 = vcombine.high %v1039_v58, %v1043_v60  ;;  %v1047_v46 = vld [vmem:[#allocation14 + $0x1d8] sm:$0xff]  ;;  %v6690_v49 = vcombine.low %v1038_v56, %v1042_v57  ;;  %v6692_v1 = vcombine.low %v1039_v58, %v1043_v60  ;;  %v1054_v5 = vld [vmem:[#allocation14 + $0x210] sm:$0xff] }
 0x3c2   :  { %2641 = vmatprep.mubr.bf16.mxu0 %v8923_v9  ;;  %2727 = vmatprep.mubr.bf16.mxu1 %v8923_v9  ;;  %v1051_v48 = vld [vmem:[#allocation14 + $0x1f8] sm:$0xff]  ;;  %v6699_v2 = vcombine.high %v1046_v42, %v1050_v43  ;;  %v1066_v16 = vld [vmem:[#allocation14 + $0x270] sm:$0xff] }
 0x3c3   :  { %2642 = vmatmul.mubr.bf16.vlgmr.msra.gmra.mrb[4].mxu0 %v8921_v4  ;;  %2728 = vmatmul.mubr.bf16.vlgmr.msra.gmra.mrb[12].mxu1 %v8921_v4  ;;  %v6701_v3 = vcombine.high %v1047_v46, %v1051_v48  ;;  %v1070_v25 = vld [vmem:[#allocation14 + $0x290] sm:$0xff]  ;;  %v1091_v51 = vld [vmem:[#allocation14 + $0x338] sm:$0xff] }
 0x3c4   :  { %2739 = vmatpush1.bf16.msra.mxu0 %v6642_v10  ;;  %2770 = vmatprep.mubr.bf16.mxu0 %v8898_v39  ;;  %v6698_v10 = vcombine.low %v1046_v42, %v1050_v43  ;;  %v1074_v26 = vld [vmem:[#allocation14 + $0x2b0] sm:$0xff]  ;;  %v1095_v58 = vld [vmem:[#allocation14 + $0x358] sm:$0xff] }
 0x3c5   :  { %2825 = vmatpush1.bf16.msra.mxu1 %v6644_v11  ;;  %2856 = vmatprep.mubr.bf16.mxu1 %v8898_v39  ;;  %v1023_v39 = vld [vmem:[#allocation14 + $0x118] sm:$0xff]  ;;  %v6700_v11 = vcombine.low %v1047_v46, %v1051_v48  ;;  %v1078_v33 = vld [vmem:[#allocation14 + $0x2d0] sm:$0xff] }
 0x3c6   :  { %2740 = vmatprep.subr.bf16.mxu0 %v6651_v12  ;;  %2826 = vmatprep.subr.bf16.mxu1 %v6653_v13  ;;  %v6677_v44 = vcombine.high %v1023_v39, %v1027_v35  ;;  %v6676_v15 = vcombine.low %v1023_v39, %v1027_v35  ;;  %v6707_v12 = vcombine.high %v1054_v5, %v1058_v6  ;;  %v1082_v34 = vld [vmem:[#allocation14 + $0x2f0] sm:$0xff]  ;;  %v1079_v39 = vld [vmem:[#allocation14 + $0x2d8] sm:$0xff] }
 0x3c7   :  { %v6709_v13 = vcombine.high %v1055_v7, %v1059_v8  ;;  %v1083_v35 = vld [vmem:[#allocation14 + $0x2f8] sm:$0xff]  ;;  %v1086_v45 = vld [vmem:[#allocation14 + $0x310] sm:$0xff] }
 0x3c8   :  { %2741 = vmatpush1.bf16.msra.mxu0 %v6650_v20  ;;  %v6706_v20 = vcombine.low %v1054_v5, %v1058_v6  ;;  %v1090_v47 = vld [vmem:[#allocation14 + $0x330] sm:$0xff]  ;;  %v1099_v60 = vld [vmem:[#allocation14 + $0x378] sm:$0xff] }
 0x3c9   :  { %2827 = vmatpush1.bf16.msra.mxu1 %v6652_v22  ;;  %2742 = vmatprep.subr.bf16.mxu0 %v6659_v23  ;;  %v6708_v22 = vcombine.low %v1055_v7, %v1059_v8  ;;  %v6715_v23 = vcombine.high %v1062_v14, %v1066_v16  ;;  %v1094_v56 = vld [vmem:[#allocation14 + $0x350] sm:$0xff]  ;;  %v1103_v46 = vld [vmem:[#allocation14 + $0x398] sm:$0xff] }
 0x3ca   :  { %2828 = vmatprep.subr.bf16.mxu1 %v6661_v24  ;;  %v6717_v24 = vcombine.high %v1063_v17, %v1067_v19  ;;  %v1098_v57 = vld [vmem:[#allocation14 + $0x370] sm:$0xff]  ;;  %v1107_v48 = vld [vmem:[#allocation14 + $0x3b8] sm:$0xff] }
 0x3cb   :  { %v1102_v42 = vld [vmem:[#allocation14 + $0x390] sm:$0xff]  ;;  %v1111_v7 = vld [vmem:[#allocation14 + $0x3d8] sm:$0xff] }
 0x3cc   :  { %2743 = vmatpush1.bf16.msra.mxu0 %v6658_v29  ;;  %v6714_v29 = vcombine.low %v1062_v14, %v1066_v16  ;;  %v1106_v43 = vld [vmem:[#allocation14 + $0x3b0] sm:$0xff]  ;;  %v1115_v8 = vld [vmem:[#allocation14 + $0x3f8] sm:$0xff] }
 0x3cd   :  { %2829 = vmatpush1.bf16.msra.mxu1 %v6660_v30  ;;  %2744 = vmatprep.subr.bf16.mxu0 %v6667_v31  ;;  %v6716_v30 = vcombine.low %v1063_v17, %v1067_v19  ;;  %v6723_v31 = vcombine.high %v1070_v25, %v1074_v26  ;;  %v1110_v5 = vld [vmem:[#allocation14 + $0x3d0] sm:$0xff]  ;;  %v1119_v17 = vld [vmem:[#allocation14 + $0x418] sm:$0xff] }
 0x3ce   :  { %2830 = vmatprep.subr.bf16.mxu1 %v6669_v32  ;;  %v6725_v32 = vcombine.high %v1071_v27, %v1075_v28  ;;  %v1114_v6 = vld [vmem:[#allocation14 + $0x3f0] sm:$0xff]  ;;  %v1123_v19 = vld [vmem:[#allocation14 + $0x438] sm:$0xff] }
 0x3cf   :  { %v1118_v14 = vld [vmem:[#allocation14 + $0x410] sm:$0xff] }
 0x3d0   :  { %2745 = vmatpush1.bf16.msra.mxu0 %v6666_v36  ;;  %v6722_v36 = vcombine.low %v1070_v25, %v1074_v26  ;;  %v1122_v16 = vld [vmem:[#allocation14 + $0x430] sm:$0xff] }
 0x3d1   :  { %2831 = vmatpush1.bf16.msra.mxu1 %v6668_v38  ;;  %2746 = vmatprep.subr.bf16.mxu0 %v6675_v40  ;;  %v6724_v38 = vcombine.low %v1071_v27, %v1075_v28  ;;  %v6731_v40 = vcombine.high %v1078_v33, %v1082_v34  ;;  %v1126_v25 = vld [vmem:[#allocation14 + $0x450] sm:$0xff]  ;;  %v6770_v27 = vcombine.low %v1118_v14, %v1122_v16  ;;  %v1127_v28 = vld [vmem:[#allocation14 + $0x458] sm:$0xff] }
 0x3d2   :  { %2832 = vmatprep.subr.bf16.mxu1 %v6677_v44  ;;  %v6733_v44 = vcombine.high %v1079_v39, %v1083_v35  ;;  %v1130_v26 = vld [vmem:[#allocation14 + $0x470] sm:$0xff] }
 0x3d4   :  { %2747 = vmatpush1.bf16.msra.mxu0 %v6674_v52  ;;  %v6730_v52 = vcombine.low %v1078_v33, %v1082_v34  ;;  %v1138_v33 = vld [vmem:[#allocation14 + $0x4b0] sm:$0xff] }
 0x3d5   :  { %2833 = vmatpush1.bf16.msra.mxu1 %v6676_v15  ;;  %2748 = vmatprep.subr.bf16.mxu0 %v6683_v53  ;;  %v6732_v15 = vcombine.low %v1079_v39, %v1083_v35  ;;  %v6739_v53 = vcombine.high %v1086_v45, %v1090_v47  ;;  %v1135_v39 = vld [vmem:[#allocation14 + $0x498] sm:$0xff] }
 0x3d6   :  { %2834 = vmatprep.subr.bf16.mxu1 %v6685_v55  ;;  %v6741_v55 = vcombine.high %v1087_v50, %v1091_v51  ;;  %v1139_v35 = vld [vmem:[#allocation14 + $0x4b8] sm:$0xff] }
 0x3d8   :  { %2749 = vmatpush1.bf16.msra.mxu0 %v6682_v61  ;;  %v6738_v61 = vcombine.low %v1086_v45, %v1090_v47  ;;  %v1142_v45 = vld [vmem:[#allocation14 + $0x4d0] sm:$0xff] }
 0x3d9   :  { %2835 = vmatpush1.bf16.msra.mxu1 %v6684_v62  ;;  %2750 = vmatprep.subr.bf16.mxu0 %v6691_v0  ;;  %v6740_v62 = vcombine.low %v1087_v50, %v1091_v51  ;;  %v6747_v0 = vcombine.high %v1094_v56, %v1098_v57  ;;  %v1146_v47 = vld [vmem:[#allocation14 + $0x4f0] sm:$0xff]  ;;  %v1143_v50 = vld [vmem:[#allocation14 + $0x4d8] sm:$0xff] }
 0x3da   :  { %2836 = vmatprep.subr.bf16.mxu1 %v6693_v41  ;;  %v6749_v41 = vcombine.high %v1095_v58, %v1099_v60  ;;  %v1147_v51 = vld [vmem:[#allocation14 + $0x4f8] sm:$0xff] }
 0x3dc   :  { %2751 = vmatpush1.bf16.msra.mxu0 %v6690_v49  ;;  %v6746_v49 = vcombine.low %v1094_v56, %v1098_v57  ;;  %v1154_v56 = vld [vmem:[#allocation14 + $0x530] sm:$0xff]  ;;  %v1151_v57 = vld [vmem:[#allocation14 + $0x518] sm:$0xff] }
 0x3dd   :  { %2837 = vmatpush1.bf16.msra.mxu1 %v6692_v1  ;;  %2752 = vmatprep.subr.bf16.mxu0 %v6699_v2  ;;  %v6748_v1 = vcombine.low %v1095_v58, %v1099_v60  ;;  %v6755_v2 = vcombine.high %v1102_v42, %v1106_v43  ;;  %v1155_v58 = vld [vmem:[#allocation14 + $0x538] sm:$0xff]  ;;  %v6796_v60 = vcombine.low %v1143_v50, %v1147_v51 }
 0x3de   :  { %2838 = vmatprep.subr.bf16.mxu1 %v6701_v3  ;;  %v6757_v3 = vcombine.high %v1103_v46, %v1107_v48 }
 0x3e0   :  { %2753 = vmatpush1.bf16.msra.mxu0 %v6698_v10  ;;  %v6754_v10 = vcombine.low %v1102_v42, %v1106_v43  ;;  %v1159_v42 = vld [vmem:[#allocation14 + $0x558] sm:$0xff] }
 0x3e1   :  { %2839 = vmatpush1.bf16.msra.mxu1 %v6700_v11  ;;  %2754 = vmatprep.subr.bf16.mxu0 %v6707_v12  ;;  %v6756_v11 = vcombine.low %v1103_v46, %v1107_v48  ;;  %v6763_v12 = vcombine.high %v1110_v5, %v1114_v6  ;;  %v1163_v43 = vld [vmem:[#allocation14 + $0x578] sm:$0xff]  ;;  %v6804_v48 = vcombine.low %v1151_v57, %v1155_v58 }
 0x3e2   :  { %2840 = vmatprep.subr.bf16.mxu1 %v6709_v13  ;;  %v6765_v13 = vcombine.high %v1111_v7, %v1115_v8 }
 0x3e4   :  { %2755 = vmatpush1.bf16.msra.mxu0 %v6706_v20  ;;  %v6762_v20 = vcombine.low %v1110_v5, %v1114_v6  ;;  %v1167_v5 = vld [vmem:[#allocation14 + $0x598] sm:$0xff] }
 0x3e5   :  { %2841 = vmatpush1.bf16.msra.mxu1 %v6708_v22  ;;  %2756 = vmatprep.subr.bf16.mxu0 %v6715_v23  ;;  %v6764_v22 = vcombine.low %v1111_v7, %v1115_v8  ;;  %v6771_v23 = vcombine.high %v1118_v14, %v1122_v16  ;;  %v1171_v6 = vld [vmem:[#allocation14 + $0x5b8] sm:$0xff]  ;;  %v6812_v8 = vcombine.low %v1159_v42, %v1163_v43 }
 0x3e6   :  { %2842 = vmatprep.subr.bf16.mxu1 %v6717_v24  ;;  %v6773_v24 = vcombine.high %v1119_v17, %v1123_v19  ;;  %v1175_v14 = vld [vmem:[#allocation14 + $0x5d8] sm:$0xff] }
 0x3e7   :  { %v1179_v16 = vld [vmem:[#allocation14 + $0x5f8] sm:$0xff] }
 0x3e8   :  { %2757 = vmatpush1.bf16.msra.mxu0 %v6714_v29  ;;  %v1131_v29 = vld [vmem:[#allocation14 + $0x478] sm:$0xff] }
 0x3e9   :  { %2843 = vmatpush1.bf16.msra.mxu1 %v6716_v30  ;;  %2758 = vmatprep.subr.bf16.mxu0 %v6723_v31  ;;  %v6772_v30 = vcombine.low %v1119_v17, %v1123_v19  ;;  %v6779_v31 = vcombine.high %v1126_v25, %v1130_v26  ;;  %v6781_v34 = vcombine.high %v1127_v28, %v1131_v29 }
 0x3ea   :  { %2844 = vmatprep.subr.bf16.mxu1 %v6725_v32  ;;  %v1134_v32 = vld [vmem:[#allocation14 + $0x490] sm:$0xff]  ;;  %v6820_v19 = vcombine.low %v1167_v5, %v1171_v6 }
 0x3ec   :  { %2759 = vmatpush1.bf16.msra.mxu0 %v6722_v36  ;;  %v6778_v36 = vcombine.low %v1126_v25, %v1130_v26  ;;  %v1183_v25 = vld [vmem:[#allocation14 + $0x618] sm:$0xff] }
 0x3ed   :  { %2845 = vmatpush1.bf16.msra.mxu1 %v6724_v38  ;;  %2760 = vmatprep.subr.bf16.mxu0 %v6731_v40  ;;  %v6780_v38 = vcombine.low %v1127_v28, %v1131_v29  ;;  %v6787_v40 = vcombine.high %v1134_v32, %v1138_v33  ;;  %v1187_v26 = vld [vmem:[#allocation14 + $0x638] sm:$0xff]  ;;  %v6828_v28 = vcombine.low %v1175_v14, %v1179_v16 }
 0x3ee   :  { %2846 = vmatprep.subr.bf16.mxu1 %v6733_v44  ;;  %v6789_v44 = vcombine.high %v1135_v39, %v1139_v35 }
 0x3f0   :  { %2761 = vmatpush1.bf16.msra.mxu0 %v6730_v52  ;;  %v6786_v52 = vcombine.low %v1134_v32, %v1138_v33  ;;  %v1194_v32 = vld [vmem:[#allocation14 + $0x670] sm:$0xff]  ;;  %v1191_v33 = vld [vmem:[#allocation14 + $0x658] sm:$0xff] }
 0x3f1   :  { %2847 = vmatpush1.bf16.msra.mxu1 %v6732_v15  ;;  %2762 = vmatprep.subr.bf16.mxu0 %v6739_v53  ;;  %v6795_v15 = vcombine.high %v1142_v45, %v1146_v47  ;;  %v6797_v53 = vcombine.high %v1143_v50, %v1147_v51 }
 0x3f2   :  { %2848 = vmatprep.subr.bf16.mxu1 %v6741_v55  ;;  %v1150_v55 = vld [vmem:[#allocation14 + $0x510] sm:$0xff] }
 0x3f3   :  { %v6802_v46 = vcombine.low %v1150_v55, %v1154_v56 }
 0x3f4   :  { %2763 = vmatpush1.bf16.msra.mxu0 %v6738_v61  ;;  %v6803_v61 = vcombine.high %v1150_v55, %v1154_v56  ;;  %v1207_v55 = vld [vmem:[#allocation14 + $0x6d8] sm:$0xff] }
 0x3f5   :  { %2849 = vmatpush1.bf16.msra.mxu1 %v6740_v62  ;;  %2764 = vmatprep.subr.bf16.mxu0 %v6747_v0  ;;  %v6805_v62 = vcombine.high %v1151_v57, %v1155_v58  ;;  %v1158_v0 = vld [vmem:[#allocation14 + $0x550] sm:$0xff]  ;;  %v1211_v56 = vld [vmem:[#allocation14 + $0x6f8] sm:$0xff] }
 0x3f6   :  { %2850 = vmatprep.subr.bf16.mxu1 %v6749_v41  ;;  %v1162_v41 = vld [vmem:[#allocation14 + $0x570] sm:$0xff] }
 0x3f7   :  { %v6810_v7 = vcombine.low %v1158_v0, %v1162_v41 }
 0x3f8   :  { %2765 = vmatpush1.bf16.msra.mxu0 %v6746_v49  ;;  %v6811_v49 = vcombine.high %v1158_v0, %v1162_v41  ;;  %v1215_v0 = vld [vmem:[#allocation14 + $0x718] sm:$0xff] }
 0x3f9   :  { %2851 = vmatpush1.bf16.msra.mxu1 %v6748_v1  ;;  %2766 = vmatprep.subr.bf16.mxu0 %v6755_v2  ;;  %v6813_v1 = vcombine.high %v1159_v42, %v1163_v43  ;;  %v1166_v2 = vld [vmem:[#allocation14 + $0x590] sm:$0xff]  ;;  %v1219_v41 = vld [vmem:[#allocation14 + $0x738] sm:$0xff]  ;;  %v6860_v43 = vcombine.low %v1207_v55, %v1211_v56 }
 0x3fa   :  { %2852 = vmatprep.subr.bf16.mxu1 %v6757_v3  ;;  %v1170_v3 = vld [vmem:[#allocation14 + $0x5b0] sm:$0xff] }
 0x3fb   :  { %v6818_v17 = vcombine.low %v1166_v2, %v1170_v3 }
 0x3fc   :  { %2767 = vmatpush1.bf16.msra.mxu0 %v6754_v10  ;;  %v6819_v10 = vcombine.high %v1166_v2, %v1170_v3  ;;  %v1223_v2 = vld [vmem:[#allocation14 + $0x758] sm:$0xff] }
 0x3fd   :  { %2853 = vmatpush1.bf16.msra.mxu1 %v6756_v11  ;;  %2768 = vmatprep.subr.bf16.mxu0 %v6763_v12  ;;  %v6821_v11 = vcombine.high %v1167_v5, %v1171_v6  ;;  %v1174_v12 = vld [vmem:[#allocation14 + $0x5d0] sm:$0xff]  ;;  %v1227_v3 = vld [vmem:[#allocation14 + $0x778] sm:$0xff]  ;;  %v6868_v6 = vcombine.low %v1215_v0, %v1219_v41 }
 0x3fe   :  { %2854 = vmatprep.subr.bf16.mxu1 %v6765_v13  ;;  %v1178_v13 = vld [vmem:[#allocation14 + $0x5f0] sm:$0xff] }
 0x400   :  { %2769 = vmatpush1.bf16.msra.mxu0 %v6762_v20  ;;  %v6827_v20 = vcombine.high %v1174_v12, %v1178_v13 }
 0x401   :  { %2855 = vmatpush1.bf16.msra.mxu1 %v6764_v22  ;;  %2781 = vmatprep.subr.bf16.mxu0 %v6771_v23  ;;  %v6829_v22 = vcombine.high %v1175_v14, %v1179_v16  ;;  %v1182_v23 = vld [vmem:[#allocation14 + $0x610] sm:$0xff]  ;;  %v6876_v16 = vcombine.low %v1223_v2, %v1227_v3 }
 0x402   :  { %2867 = vmatprep.subr.bf16.mxu1 %v6773_v24  ;;  %v1186_v24 = vld [vmem:[#allocation14 + $0x630] sm:$0xff] }
 0x403   :  { %2771 = vmatmul.mubr.bf16.vlgmr.msra.gmra.mrb[8].mxu0 %v8896_v37  ;;  %v6835_v29 = vcombine.high %v1182_v23, %v1186_v24 }
 0x404   :  { %2857 = vmatmul.mubr.bf16.vlgmr.msra.gmra.mrb[16].mxu1 %v8896_v37  ;;  %2782 = vmatpush1.bf16.msra.mxu0 %v6770_v27  ;;  %v6788_v37 = vcombine.low %v1135_v39, %v1139_v35  ;;  %v6826_v27 = vcombine.low %v1174_v12, %v1178_v13  ;;  %v6834_v39 = vcombine.low %v1182_v23, %v1186_v24  ;;  %v1231_v12 = vld [vmem:[#allocation14 + $0x798] sm:$0xff] }
 0x405   :  { %2813 = vmatprep.mubr.bf16.mxu0 %v8923_v9  ;;  %2868 = vmatpush1.bf16.msra.mxu1 %v6772_v30  ;;  %v6837_v30 = vcombine.high %v1183_v25, %v1187_v26  ;;  %v6836_v35 = vcombine.low %v1183_v25, %v1187_v26  ;;  %v1235_v13 = vld [vmem:[#allocation14 + $0x7b8] sm:$0xff] }
 0x406   :  { %2899 = vmatprep.mubr.bf16.mxu1 %v8923_v9  ;;  %2783 = vmatprep.subr.bf16.mxu0 %v6779_v31  ;;  %v6794_v9 = vcombine.low %v1142_v45, %v1146_v47  ;;  %v1190_v31 = vld [vmem:[#allocation14 + $0x650] sm:$0xff]  ;;  %v1199_v45 = vld [vmem:[#allocation14 + $0x698] sm:$0xff]  ;;  %v6884_v26 = vcombine.low %v1231_v12, %v1235_v13 }
 0x407   :  { %2869 = vmatprep.subr.bf16.mxu1 %v6781_v34  ;;  %v1195_v34 = vld [vmem:[#allocation14 + $0x678] sm:$0xff]  ;;  %v6842_v50 = vcombine.low %v1190_v31, %v1194_v32 }
 0x408   :  { %2784 = vmatpush1.bf16.msra.mxu0 %v6778_v36  ;;  %v6843_v36 = vcombine.high %v1190_v31, %v1194_v32  ;;  %v1203_v47 = vld [vmem:[#allocation14 + $0x6b8] sm:$0xff]  ;;  %v6844_v51 = vcombine.low %v1191_v33, %v1195_v34  ;;  %v7697_v31 = vld [vmem:[#allocation17 + $0x4] ss:$28 sps:$4 sm:$0xff]   ;;  %v7700_v32 = vld [vmem:[#allocation17 + $0xc] ss:$28 sps:$4 sm:$0xff]  }
 0x409   :  { %2870 = vmatpush1.bf16.msra.mxu1 %v6780_v38  ;;  %2785 = vmatprep.subr.bf16.mxu0 %v6787_v40  ;;  %v6845_v38 = vcombine.high %v1191_v33, %v1195_v34  ;;  %v1198_v40 = vld [vmem:[#allocation14 + $0x690] sm:$0xff]  ;;  %v6852_v58 = vcombine.low %v1199_v45, %v1203_v47  ;;  %v1239_v23 = vld [vmem:[#allocation14 + $0x7d8] sm:$0xff]  ;;  %v7695_v33 = vld [vmem:[#allocation17] ss:$28 sps:$4 sm:$0xff]  }
 0x40a   :  { %2871 = vmatprep.subr.bf16.mxu1 %v6789_v44  ;;  %v1202_v44 = vld [vmem:[#allocation14 + $0x6b0] sm:$0xff]  ;;  %v1243_v24 = vld [vmem:[#allocation14 + $0x7f8] sm:$0xff] }
 0x40b   :  { %v6850_v57 = vcombine.low %v1198_v40, %v1202_v44  ;;  %v7698_v34 = vld [vmem:[#allocation17 + $0x8] ss:$28 sps:$4 sm:$0xff]  }
 0x40c   :  { %2786 = vmatpush1.bf16.msra.mxu0 %v6786_v52  ;;  %v6851_v52 = vcombine.high %v1198_v40, %v1202_v44  ;;  %v7709_v40 = vld [vmem:[#allocation17 + $0x74] ss:$28 sps:$4 sm:$0xff]   ;;  %v7712_v44 = vld [vmem:[#allocation17 + $0x7c] ss:$28 sps:$4 sm:$0xff]  }
 0x40d   :  { %2872 = vmatpush1.bf16.msra.mxu1 %v6788_v37  ;;  %2787 = vmatprep.subr.bf16.mxu0 %v6795_v15  ;;  %v6853_v37 = vcombine.high %v1199_v45, %v1203_v47  ;;  %v1206_v15 = vld [vmem:[#allocation14 + $0x6d0] sm:$0xff]  ;;  %v7710_v47 = vld [vmem:[#allocation17 + $0x78] ss:$28 sps:$4 sm:$0xff]  }
 0x40e   :  { %2873 = vmatprep.subr.bf16.mxu1 %v6797_v53  ;;  %v1210_v53 = vld [vmem:[#allocation14 + $0x6f0] sm:$0xff] }
 0x40f   :  { %v6858_v42 = vcombine.low %v1206_v15, %v1210_v53  ;;  %v7707_v45 = vld [vmem:[#allocation17 + $0x70] ss:$28 sps:$4 sm:$0xff]  }
 0x410   :  { %2788 = vmatpush1.bf16.msra.mxu0 %v6794_v9  ;;  %v6859_v9 = vcombine.high %v1206_v15, %v1210_v53  ;;  %v7724_v15 = vld [vmem:[#allocation17 + $0xec] ss:$28 sps:$4 sm:$0xff]   ;;  %v7719_v53 = vld [vmem:[#allocation17 + $0xe0] ss:$28 sps:$4 sm:$0xff]  }
 0x411   :  { %2874 = vmatpush1.bf16.msra.mxu1 %v6796_v60  ;;  %2789 = vmatprep.subr.bf16.mxu0 %v6803_v61  ;;  %v6861_v60 = vcombine.high %v1207_v55, %v1211_v56  ;;  %v1214_v61 = vld [vmem:[#allocation14 + $0x710] sm:$0xff]  ;;  %v7727_v56 = vld [vmem:[#allocation17 + $0x11c] ss:$28 sps:$4 sm:$0xff]  }
 0x412   :  { %2875 = vmatprep.subr.bf16.mxu1 %v6805_v62  ;;  %v1218_v62 = vld [vmem:[#allocation14 + $0x730] sm:$0xff] }
 0x413   :  { %v6866_v5 = vcombine.low %v1214_v61, %v1218_v62  ;;  %v7722_v55 = vld [vmem:[#allocation17 + $0xe8] ss:$28 sps:$4 sm:$0xff]  }
 0x414   :  { %2790 = vmatpush1.bf16.msra.mxu0 %v6802_v46  ;;  %v6867_v46 = vcombine.high %v1214_v61, %v1218_v62  ;;  %v7736_v61 = vld [vmem:[#allocation17 + $0x15c] ss:$28 sps:$4 sm:$0xff]   ;;  %v7731_v62 = vld [vmem:[#allocation17 + $0x150] ss:$28 sps:$4 sm:$0xff]  }
 0x415   :  { %2876 = vmatpush1.bf16.msra.mxu1 %v6804_v48  ;;  %2791 = vmatprep.subr.bf16.mxu0 %v6811_v49  ;;  %v6869_v48 = vcombine.high %v1215_v0, %v1219_v41  ;;  %v1222_v49 = vld [vmem:[#allocation14 + $0x750] sm:$0xff]  ;;  %v7734_v0 = vld [vmem:[#allocation17 + $0x158] ss:$28 sps:$4 sm:$0xff]  }
 0x416   :  { %2877 = vmatprep.subr.bf16.mxu1 %v6813_v1  ;;  %v1226_v1 = vld [vmem:[#allocation14 + $0x770] sm:$0xff] }
 0x417   :  { %v6874_v14 = vcombine.low %v1222_v49, %v1226_v1  ;;  %v7739_v41 = vld [vmem:[#allocation17 + $0x18c] ss:$28 sps:$4 sm:$0xff]  }
 0x418   :  { %2792 = vmatpush1.bf16.msra.mxu0 %v6810_v7  ;;  %v6875_v7 = vcombine.high %v1222_v49, %v1226_v1  ;;  %v7748_v49 = vld [vmem:[#allocation17 + $0x1cc] ss:$28 sps:$4 sm:$0xff]   ;;  %v7743_v1 = vld [vmem:[#allocation17 + $0x1c0] ss:$28 sps:$4 sm:$0xff]  }
 0x419   :  { %2878 = vmatpush1.bf16.msra.mxu1 %v6812_v8  ;;  %2793 = vmatprep.subr.bf16.mxu0 %v6819_v10  ;;  %v6877_v8 = vcombine.high %v1223_v2, %v1227_v3  ;;  %v1230_v10 = vld [vmem:[#allocation14 + $0x790] sm:$0xff]  ;;  %v7751_v3 = vld [vmem:[#allocation17 + $0x1fc] ss:$28 sps:$4 sm:$0xff]  }
 0x41a   :  { %2879 = vmatprep.subr.bf16.mxu1 %v6821_v11  ;;  %v1234_v11 = vld [vmem:[#allocation14 + $0x7b0] sm:$0xff] }
 0x41b   :  { %v6882_v25 = vcombine.low %v1230_v10, %v1234_v11  ;;  %v7746_v2 = vld [vmem:[#allocation17 + $0x1c8] ss:$28 sps:$4 sm:$0xff]  }
 0x41c   :  { %2794 = vmatpush1.bf16.msra.mxu0 %v6818_v17  ;;  %v6883_v17 = vcombine.high %v1230_v10, %v1234_v11  ;;  %v7760_v10 = vld [vmem:[#allocation17 + $0x23c] ss:$28 sps:$4 sm:$0xff]   ;;  %v7755_v11 = vld [vmem:[#allocation17 + $0x230] ss:$28 sps:$4 sm:$0xff]  }
 0x41d   :  { %2880 = vmatpush1.bf16.msra.mxu1 %v6820_v19  ;;  %2795 = vmatprep.subr.bf16.mxu0 %v6827_v20  ;;  %v6885_v19 = vcombine.high %v1231_v12, %v1235_v13  ;;  %v1238_v20 = vld [vmem:[#allocation14 + $0x7d0] sm:$0xff]  ;;  %v7758_v12 = vld [vmem:[#allocation17 + $0x238] ss:$28 sps:$4 sm:$0xff]  }
 0x41e   :  { %2881 = vmatprep.subr.bf16.mxu1 %v6829_v22  ;;  %v1242_v22 = vld [vmem:[#allocation14 + $0x7f0] sm:$0xff] }
 0x41f   :  { %v7763_v13 = vld [vmem:[#allocation17 + $0x26c] ss:$28 sps:$4 sm:$0xff]  }
 0x420   :  { %2796 = vmatpush1.bf16.msra.mxu0 %v6826_v27  ;;  %v6891_v27 = vcombine.high %v1238_v20, %v1242_v22 }
 0x421   :  { %2882 = vmatpush1.bf16.msra.mxu1 %v6828_v28  ;;  %2797 = vmatprep.subr.bf16.mxu0 %v6835_v29  ;;  %v6893_v28 = vcombine.high %v1239_v23, %v1243_v24  ;;  %v6890_v29 = vcombine.low %v1238_v20, %v1242_v22  ;;  %v7772_v20 = vld [vmem:[#allocation17 + $0x2ac] ss:$28 sps:$4 sm:$0xff]   ;;  %v7767_v22 = vld [vmem:[#allocation17 + $0x2a0] ss:$28 sps:$4 sm:$0xff]  }
 0x422   :  { %2883 = vmatprep.subr.bf16.mxu1 %v6837_v30  ;;  %v6892_v30 = vcombine.low %v1239_v23, %v1243_v24  ;;  %v7770_v23 = vld [vmem:[#allocation17 + $0x2a8] ss:$28 sps:$4 sm:$0xff]   ;;  %v7775_v24 = vld [vmem:[#allocation17 + $0x2dc] ss:$28 sps:$4 sm:$0xff]  }
 0x424   :  { %2798 = vmatpush1.bf16.msra.mxu0 %v6834_v39  ;;  %v7703_v39 = vld [vmem:[#allocation17 + $0x3c] ss:$28 sps:$4 sm:$0xff]  }
 0x425   :  { %2884 = vmatpush1.bf16.msra.mxu1 %v6836_v35  ;;  %2799 = vmatprep.subr.bf16.mxu0 %v6843_v36  ;;  %v7706_v35 = vld [vmem:[#allocation17 + $0x44] ss:$28 sps:$4 sm:$0xff]   ;;  %v7701_v36 = vld [vmem:[#allocation17 + $0x38] ss:$28 sps:$4 sm:$0xff]  }
 0x426   :  { %2885 = vmatprep.subr.bf16.mxu1 %v6845_v38  ;;  %v7704_v38 = vld [vmem:[#allocation17 + $0x40] ss:$28 sps:$4 sm:$0xff]  }
 0x428   :  { %2800 = vmatpush1.bf16.msra.mxu0 %v6842_v50  ;;  %v7715_v50 = vld [vmem:[#allocation17 + $0xac] ss:$28 sps:$4 sm:$0xff]  }
 0x429   :  { %2886 = vmatpush1.bf16.msra.mxu1 %v6844_v51  ;;  %2801 = vmatprep.subr.bf16.mxu0 %v6851_v52  ;;  %v7718_v51 = vld [vmem:[#allocation17 + $0xb4] ss:$28 sps:$4 sm:$0xff]   ;;  %v7713_v52 = vld [vmem:[#allocation17 + $0xa8] ss:$28 sps:$4 sm:$0xff]  }
 0x42a   :  { %2887 = vmatprep.subr.bf16.mxu1 %v6853_v37  ;;  %v7721_v37 = vld [vmem:[#allocation17 + $0xe4] ss:$28 sps:$4 sm:$0xff]  }
 0x42c   :  { %2802 = vmatpush1.bf16.msra.mxu0 %v6850_v57  ;;  %v7730_v57 = vld [vmem:[#allocation17 + $0x124] ss:$28 sps:$4 sm:$0xff]  }
 0x42d   :  { %2888 = vmatpush1.bf16.msra.mxu1 %v6852_v58  ;;  %2803 = vmatprep.subr.bf16.mxu0 %v6859_v9  ;;  %v7725_v58 = vld [vmem:[#allocation17 + $0x118] ss:$28 sps:$4 sm:$0xff]   ;;  %v7728_v9 = vld [vmem:[#allocation17 + $0x120] ss:$28 sps:$4 sm:$0xff]  }
 0x42e   :  { %2889 = vmatprep.subr.bf16.mxu1 %v6861_v60  ;;  %v7733_v60 = vld [vmem:[#allocation17 + $0x154] ss:$28 sps:$4 sm:$0xff]  }
 0x430   :  { %2804 = vmatpush1.bf16.msra.mxu0 %v6858_v42  ;;  %v7742_v42 = vld [vmem:[#allocation17 + $0x194] ss:$28 sps:$4 sm:$0xff]  }
 0x431   :  { %2890 = vmatpush1.bf16.msra.mxu1 %v6860_v43  ;;  %2805 = vmatprep.subr.bf16.mxu0 %v6867_v46  ;;  %v7737_v43 = vld [vmem:[#allocation17 + $0x188] ss:$28 sps:$4 sm:$0xff]   ;;  %v7740_v46 = vld [vmem:[#allocation17 + $0x190] ss:$28 sps:$4 sm:$0xff]  }
 0x432   :  { %2891 = vmatprep.subr.bf16.mxu1 %v6869_v48  ;;  %v7745_v48 = vld [vmem:[#allocation17 + $0x1c4] ss:$28 sps:$4 sm:$0xff]  }
 0x434   :  { %2806 = vmatpush1.bf16.msra.mxu0 %v6866_v5  ;;  %v7754_v5 = vld [vmem:[#allocation17 + $0x204] ss:$28 sps:$4 sm:$0xff]  }
 0x435   :  { %2892 = vmatpush1.bf16.msra.mxu1 %v6868_v6  ;;  %2807 = vmatprep.subr.bf16.mxu0 %v6875_v7  ;;  %v7749_v6 = vld [vmem:[#allocation17 + $0x1f8] ss:$28 sps:$4 sm:$0xff]   ;;  %v7752_v7 = vld [vmem:[#allocation17 + $0x200] ss:$28 sps:$4 sm:$0xff]  }
 0x436   :  { %2893 = vmatprep.subr.bf16.mxu1 %v6877_v8  ;;  %v7757_v8 = vld [vmem:[#allocation17 + $0x234] ss:$28 sps:$4 sm:$0xff]  }
 0x438   :  { %2808 = vmatpush1.bf16.msra.mxu0 %v6874_v14  ;;  %v7766_v14 = vld [vmem:[#allocation17 + $0x274] ss:$28 sps:$4 sm:$0xff]  }
 0x439   :  { %2894 = vmatpush1.bf16.msra.mxu1 %v6876_v16  ;;  %2809 = vmatprep.subr.bf16.mxu0 %v6883_v17  ;;  %v7761_v16 = vld [vmem:[#allocation17 + $0x268] ss:$28 sps:$4 sm:$0xff]   ;;  %v7764_v17 = vld [vmem:[#allocation17 + $0x270] ss:$28 sps:$4 sm:$0xff]  }
 0x43a   :  { %2895 = vmatprep.subr.bf16.mxu1 %v6885_v19  ;;  %v7769_v19 = vld [vmem:[#allocation17 + $0x2a4] ss:$28 sps:$4 sm:$0xff]  }
 0x43c   :  { %2810 = vmatpush1.bf16.msra.mxu0 %v6882_v25  ;;  %v7778_v25 = vld [vmem:[#allocation17 + $0x2e4] ss:$28 sps:$4 sm:$0xff]  }
 0x43d   :  { %2896 = vmatpush1.bf16.msra.mxu1 %v6884_v26  ;;  %2811 = vmatprep.subr.bf16.mxu0 %v6891_v27  ;;  %v7773_v26 = vld [vmem:[#allocation17 + $0x2d8] ss:$28 sps:$4 sm:$0xff]   ;;  %v7776_v27 = vld [vmem:[#allocation17 + $0x2e0] ss:$28 sps:$4 sm:$0xff]  }
 0x43e   :  { %2897 = vmatprep.subr.bf16.mxu1 %v6893_v28  ;;  %v7781_v28 = vld [vmem:[#allocation17 + $0x314] ss:$28 sps:$4 sm:$0xff]  }
 0x440   :  { %2812 = vmatpush1.bf16.msra.mxu0 %v6890_v29  ;;  %v7784_v29 = vld [vmem:[#allocation17 + $0x31c] ss:$28 sps:$4 sm:$0xff]  }
 0x441   :  { %2898 = vmatpush1.bf16.msra.mxu1 %v6892_v30  ;;  %5819 = vmatprep.subr.bf16.mxu0 %v7697_v31  ;;  %v7779_v30 = vld [vmem:[#allocation17 + $0x310] ss:$28 sps:$4 sm:$0xff]   ;;  %v7782_v31 = vld [vmem:[#allocation17 + $0x318] ss:$28 sps:$4 sm:$0xff]  }
 0x442   :  { %5991 = vmatprep.subr.bf16.mxu1 %v7700_v32  ;;  %v7787_v32 = vld [vmem:[#allocation17 + $0x34c] ss:$28 sps:$4 sm:$0xff]  }
 0x443   :  { %2814 = vmatmul.mubr.bf16.vlgmr.msra.gmra.mrb[8].mxu0 %v8921_v4 }
 0x444   :  { %2900 = vmatmul.mubr.bf16.vlgmr.msra.gmra.mrb[16].mxu1 %v8921_v4  ;;  %5820 = vmatpush1.bf16.msra.mxu0 %v7695_v33  ;;  %v7716_v4 = vld [vmem:[#allocation17 + $0xb0] ss:$28 sps:$4 sm:$0xff]  }
 0x445   :  { %5992 = vmatpush1.bf16.msra.mxu1 %v7698_v34  ;;  %5821 = vmatprep.subr.bf16.mxu0 %v7703_v39  ;;  %v7790_v33 = vld [vmem:[#allocation17 + $0x354] ss:$28 sps:$4 sm:$0xff]   ;;  %v7785_v34 = vld [vmem:[#allocation17 + $0x348] ss:$28 sps:$4 sm:$0xff]  }
 0x446   :  { %5993 = vmatprep.subr.bf16.mxu1 %v7706_v35  ;;  %v7788_v39 = vld [vmem:[#allocation17 + $0x350] ss:$28 sps:$4 sm:$0xff]   ;;  %v7793_v35 = vld [vmem:[#allocation17 + $0x384] ss:$28 sps:$4 sm:$0xff]  }
 0x448   :  { %5822 = vmatpush1.bf16.msra.mxu0 %v7701_v36  ;;  %v7796_v36 = vld [vmem:[#allocation17 + $0x38c] ss:$28 sps:$4 sm:$0xff]  }
 0x449   :  { %5994 = vmatpush1.bf16.msra.mxu1 %v7704_v38  ;;  %5823 = vmatprep.subr.bf16.mxu0 %v7709_v40  ;;  %v8937_v38 = vld [vmem:[#allocation16] sm:$0xff] }
 0x44a   :  { %5995 = vmatprep.subr.bf16.mxu1 %v7712_v44  ;;  %v1249_v40 = vrot.slane %v8937_v38, %v8863_v59  ;;  %v1257_v44 = vrot.slane %v8937_v38, %v8911_v18 }
 0x44c   :  { %5824 = vmatpush1.bf16.msra.mxu0 %v7707_v45  ;;  %v1253_v45 = vrot.slane %v8937_v38, %v8866_v63 }
 0x44d   :  { %5996 = vmatpush1.bf16.msra.mxu1 %v7710_v47  ;;  %5825 = vmatprep.subr.bf16.mxu0 %v7715_v50  ;;  %v1261_v47 = vrot.slane %v8937_v38, %v8914_v21 }
 0x44e   :  { %5997 = vmatprep.subr.bf16.mxu1 %v7718_v51 }
 0x450   :  { %5826 = vmatpush1.bf16.msra.mxu0 %v7713_v52 }
 0x451   :  { %5998 = vmatpush1.bf16.msra.mxu1 %v7716_v4  ;;  %5827 = vmatprep.subr.bf16.mxu0 %v7721_v37 }
 0x452   :  { %5999 = vmatprep.subr.bf16.mxu1 %v7724_v15 }
 0x454   :  { %5828 = vmatpush1.bf16.msra.mxu0 %v7719_v53 }
 0x455   :  { %6000 = vmatpush1.bf16.msra.mxu1 %v7722_v55  ;;  %5829 = vmatprep.subr.bf16.mxu0 %v7727_v56 }
 0x456   :  { %6001 = vmatprep.subr.bf16.mxu1 %v7730_v57 }
 0x458   :  { %5830 = vmatpush1.bf16.msra.mxu0 %v7725_v58 }
 0x459   :  { %6002 = vmatpush1.bf16.msra.mxu1 %v7728_v9  ;;  %5831 = vmatprep.subr.bf16.mxu0 %v7733_v60 }
 0x45a   :  { %6003 = vmatprep.subr.bf16.mxu1 %v7736_v61 }
 0x45c   :  { %5832 = vmatpush1.bf16.msra.mxu0 %v7731_v62 }
 0x45d   :  { %6004 = vmatpush1.bf16.msra.mxu1 %v7734_v0  ;;  %5833 = vmatprep.subr.bf16.mxu0 %v7739_v41 }
 0x45e   :  { %6005 = vmatprep.subr.bf16.mxu1 %v7742_v42 }
 0x460   :  { %5834 = vmatpush1.bf16.msra.mxu0 %v7737_v43 }
 0x461   :  { %6006 = vmatpush1.bf16.msra.mxu1 %v7740_v46  ;;  %5835 = vmatprep.subr.bf16.mxu0 %v7745_v48 }
 0x462   :  { %6007 = vmatprep.subr.bf16.mxu1 %v7748_v49 }
 0x464   :  { %5836 = vmatpush1.bf16.msra.mxu0 %v7743_v1 }
 0x465   :  { %6008 = vmatpush1.bf16.msra.mxu1 %v7746_v2  ;;  %5837 = vmatprep.subr.bf16.mxu0 %v7751_v3 }
 0x466   :  { %6009 = vmatprep.subr.bf16.mxu1 %v7754_v5 }
 0x468   :  { %5838 = vmatpush1.bf16.msra.mxu0 %v7749_v6 }
 0x469   :  { %6010 = vmatpush1.bf16.msra.mxu1 %v7752_v7  ;;  %5839 = vmatprep.subr.bf16.mxu0 %v7757_v8 }
 0x46a   :  { %6011 = vmatprep.subr.bf16.mxu1 %v7760_v10 }
 0x46c   :  { %5840 = vmatpush1.bf16.msra.mxu0 %v7755_v11 }
 0x46d   :  { %6012 = vmatpush1.bf16.msra.mxu1 %v7758_v12  ;;  %5841 = vmatprep.subr.bf16.mxu0 %v7763_v13 }
 0x46e   :  { %6013 = vmatprep.subr.bf16.mxu1 %v7766_v14 }
 0x470   :  { %5842 = vmatpush1.bf16.msra.mxu0 %v7761_v16 }
 0x471   :  { %6014 = vmatpush1.bf16.msra.mxu1 %v7764_v17  ;;  %5843 = vmatprep.subr.bf16.mxu0 %v7769_v19  ;;  %v7791_v19 = vld [vmem:[#allocation17 + $0x380] ss:$28 sps:$4 sm:$0xff]  }
 0x472   :  { %6015 = vmatprep.subr.bf16.mxu1 %v7772_v20  ;;  %v7794_v20 = vld [vmem:[#allocation17 + $0x388] ss:$28 sps:$4 sm:$0xff]  }
 0x474   :  { %5844 = vmatpush1.bf16.msra.mxu0 %v7767_v22  ;;  %v7799_v22 = vld [vmem:[#allocation17 + $0x3bc] ss:$28 sps:$4 sm:$0xff]  }
 0x475   :  { %6016 = vmatpush1.bf16.msra.mxu1 %v7770_v23  ;;  %5845 = vmatprep.subr.bf16.mxu0 %v7775_v24  ;;  %v7802_v23 = vld [vmem:[#allocation17 + $0x3c4] ss:$28 sps:$4 sm:$0xff]   ;;  %v7797_v24 = vld [vmem:[#allocation17 + $0x3b8] ss:$28 sps:$4 sm:$0xff]  }
 0x476   :  { %6017 = vmatprep.subr.bf16.mxu1 %v7778_v25  ;;  %v7800_v25 = vld [vmem:[#allocation17 + $0x3c0] ss:$28 sps:$4 sm:$0xff]  }
 0x478   :  { %5846 = vmatpush1.bf16.msra.mxu0 %v7773_v26  ;;  %v7805_v26 = vld [vmem:[#allocation17 + $0x3f4] ss:$28 sps:$4 sm:$0xff]  }
 0x479   :  { %6018 = vmatpush1.bf16.msra.mxu1 %v7776_v27  ;;  %5847 = vmatprep.subr.bf16.mxu0 %v7781_v28  ;;  %v7808_v27 = vld [vmem:[#allocation17 + $0x3fc] ss:$28 sps:$4 sm:$0xff]   ;;  %v7803_v28 = vld [vmem:[#allocation17 + $0x3f0] ss:$28 sps:$4 sm:$0xff]  }
 0x47a   :  { %6019 = vmatprep.subr.bf16.mxu1 %v7784_v29  ;;  %v7806_v29 = vld [vmem:[#allocation17 + $0x3f8] ss:$28 sps:$4 sm:$0xff]  }
 0x47c   :  { %5848 = vmatpush1.bf16.msra.mxu0 %v7779_v30  ;;  %v7811_v30 = vld [vmem:[#allocation17 + $0x42c] ss:$28 sps:$4 sm:$0xff]  }
 0x47d   :  { %6020 = vmatpush1.bf16.msra.mxu1 %v7782_v31  ;;  %5849 = vmatprep.subr.bf16.mxu0 %v7787_v32  ;;  %v7814_v31 = vld [vmem:[#allocation17 + $0x434] ss:$28 sps:$4 sm:$0xff]   ;;  %v7809_v32 = vld [vmem:[#allocation17 + $0x428] ss:$28 sps:$4 sm:$0xff]  }
 0x47e   :  { %6021 = vmatprep.subr.bf16.mxu1 %v7790_v33  ;;  %v7812_v33 = vld [vmem:[#allocation17 + $0x430] ss:$28 sps:$4 sm:$0xff]  }
 0x480   :  { %5850 = vmatpush1.bf16.msra.mxu0 %v7785_v34  ;;  %v7817_v34 = vld [vmem:[#allocation17 + $0x464] ss:$28 sps:$4 sm:$0xff]  }
 0x481   :  { %6022 = vmatpush1.bf16.msra.mxu1 %v7788_v39  ;;  %5862 = vmatprep.subr.bf16.mxu0 %v7793_v35  ;;  %v7820_v39 = vld [vmem:[#allocation17 + $0x46c] ss:$28 sps:$4 sm:$0xff]   ;;  %v7815_v35 = vld [vmem:[#allocation17 + $0x460] ss:$28 sps:$4 sm:$0xff]  }
 0x482   :  { %6034 = vmatprep.subr.bf16.mxu1 %v7796_v36  ;;  %v7818_v36 = vld [vmem:[#allocation17 + $0x468] ss:$28 sps:$4 sm:$0xff]  }
 0x496   :  { %v2643_v50 = vpop.f32.mrb[4].mxu0  ;;  %v2729_v51 = vpop.f32.mrb[12].mxu1 }
 0x497   :  { %v7459_v52 = vadd.f32 %v2643_v50, %v1249_v40  ;;  %v7463_v4 = vadd.f32 %v2729_v51, %v1257_v44  ;;  %v2645_v37 = vpop.f32.mrb[5].mxu0  ;;  %v2731_v15 = vpop.f32.mrb[13].mxu1  ;;  %v7829_v50 = vld [vmem:[#allocation17 + $0x4d4] ss:$28 sps:$4 sm:$0xff]   ;;  %v7832_v51 = vld [vmem:[#allocation17 + $0x4dc] ss:$28 sps:$4 sm:$0xff]  }
 0x498   :  { %v7460_v53 = vadd.f32 %v2645_v37, %v1253_v45  ;;  %v7464_v55 = vadd.f32 %v2731_v15, %v1261_v47  ;;  %v2647_v56 = vpop.f32.mrb[6].mxu0  ;;  %v2733_v57 = vpop.f32.mrb[14].mxu1  ;;  %v7835_v37 = vld [vmem:[#allocation17 + $0x50c] ss:$28 sps:$4 sm:$0xff]   ;;  %v7838_v15 = vld [vmem:[#allocation17 + $0x514] ss:$28 sps:$4 sm:$0xff]  }
 0x499   :  { %vm2910_vm15 = vcmp.gt.f32.partialorder %v7459_v52, 0.0  ;;  %v2926_v58 = vmul.f32 0.2, %v7459_v52  ;;  %vm2912_vm0 = vcmp.gt.f32.partialorder %v7463_v4, 0.0  ;;  %v2928_v9 = vmul.f32 0.2, %v7463_v4 }
 0x49a   :  { %vm2911_vm1 = vcmp.gt.f32.partialorder %v7460_v53, 0.0  ;;  %v2927_v60 = vmul.f32 0.2, %v7460_v53  ;;  %vm2913_vm2 = vcmp.gt.f32.partialorder %v7464_v55, 0.0  ;;  %v2929_v61 = vmul.f32 0.2, %v7464_v55 }
 0x49b   :  { %v7461_v62 = vadd.f32 %v2647_v56, %v1249_v40  ;;  %v7465_v0 = vadd.f32 %v2733_v57, %v1257_v44  ;;  %v2649_v41 = vpop.f32.mrb[7].mxu0  ;;  %v2735_v42 = vpop.f32.mrb[15].mxu1  ;;  %v2942_v43 = vsel %vm2910_vm15, %v7459_v52, %v2926_v58  ;;  %v2944_v46 = vsel %vm2912_vm0, %v7463_v4, %v2928_v9  ;;  %v7823_v40 = vld [vmem:[#allocation17 + $0x49c] ss:$28 sps:$4 sm:$0xff]   ;;  %v7826_v44 = vld [vmem:[#allocation17 + $0x4a4] ss:$28 sps:$4 sm:$0xff]  }
 0x49c   :  { %v7462_v48 = vadd.f32 %v2649_v41, %v1253_v45  ;;  %v7466_v49 = vadd.f32 %v2735_v42, %v1261_v47  ;;  %v2943_v6 = vsel %vm2911_vm1, %v7460_v53, %v2927_v60  ;;  %v2945_v7 = vsel %vm2913_vm2, %v7464_v55, %v2929_v61  ;;  %v7821_v45 = vld [vmem:[#allocation17 + $0x498] ss:$28 sps:$4 sm:$0xff]   ;;  %v7824_v47 = vld [vmem:[#allocation17 + $0x4a0] ss:$28 sps:$4 sm:$0xff]   ;;  %v7827_v52 = vld [vmem:[#allocation17 + $0x4d0] ss:$28 sps:$4 sm:$0xff]  }
 0x49d   :  { %vm2918_vm3 = vcmp.gt.f32.partialorder %v7461_v62, 0.0  ;;  %v2934_v1 = vmul.f32 0.2, %v7461_v62  ;;  %vm2920_vm4 = vcmp.gt.f32.partialorder %v7465_v0, 0.0  ;;  %v2936_v2 = vmul.f32 0.2, %v7465_v0 }
 0x49e   :  { %vm2919_vm5 = vcmp.gt.f32.partialorder %v7462_v48, 0.0  ;;  %v2935_v3 = vmul.f32 0.2, %v7462_v48  ;;  %vm2921_vm6 = vcmp.gt.f32.partialorder %v7466_v49, 0.0  ;;  %v2937_v5 = vmul.f32 0.2, %v7466_v49 }
 0x49f   :  { %v2950_v8 = vsel %vm2918_vm3, %v7461_v62, %v2934_v1  ;;  %v2952_v10 = vsel %vm2920_vm4, %v7465_v0, %v2936_v2  ;;  %v7830_v4 = vld [vmem:[#allocation17 + $0x4d8] ss:$28 sps:$4 sm:$0xff]   ;;  %v7833_v53 = vld [vmem:[#allocation17 + $0x508] ss:$28 sps:$4 sm:$0xff]   ;;  %v7836_v55 = vld [vmem:[#allocation17 + $0x510] ss:$28 sps:$4 sm:$0xff]  }
 0x4a0   :  { %v8949_v11 = vpack.c.bf16 %v2950_v8, %v2942_v43  ;;  %v8951_v12 = vpack.c.bf16 %v2952_v10, %v2944_v46  ;;  %v2951_v13 = vsel %vm2919_vm5, %v7462_v48, %v2935_v3  ;;  %v2953_v14 = vsel %vm2921_vm6, %v7466_v49, %v2937_v5  ;;  %v7841_v56 = vld [vmem:[#allocation17 + $0x544] ss:$28 sps:$4 sm:$0xff]   ;;  %v7844_v57 = vld [vmem:[#allocation17 + $0x54c] ss:$28 sps:$4 sm:$0xff]   ;;  %v7847_v60 = vld [vmem:[#allocation17 + $0x57c] ss:$28 sps:$4 sm:$0xff]  }
 0x4a1   :  { %v8953_v16 = vpack.c.bf16 %v2951_v13, %v2943_v6  ;;  %v8955_v17 = vpack.c.bf16 %v2953_v14, %v2945_v7  ;;  %v7839_v58 = vld [vmem:[#allocation17 + $0x540] ss:$28 sps:$4 sm:$0xff]   ;;  %v7842_v9 = vld [vmem:[#allocation17 + $0x548] ss:$28 sps:$4 sm:$0xff]   ;;  %v7845_v62 = vld [vmem:[#allocation17 + $0x578] ss:$28 sps:$4 sm:$0xff]  }
 0x4a2   :  { %v7850_v61 = vld [vmem:[#allocation17 + $0x584] ss:$28 sps:$4 sm:$0xff]   ;;  %v7853_v41 = vld [vmem:[#allocation17 + $0x5b4] ss:$28 sps:$4 sm:$0xff]   ;;  %v7856_v42 = vld [vmem:[#allocation17 + $0x5bc] ss:$28 sps:$4 sm:$0xff]  }
 0x4a3   :  { %5851 = vmatprep.mubr.bf16.mxu0 %v8953_v16  ;;  %6023 = vmatprep.mubr.bf16.mxu1 %v8953_v16  ;;  %v7848_v0 = vld [vmem:[#allocation17 + $0x580] ss:$28 sps:$4 sm:$0xff]   ;;  %v7851_v43 = vld [vmem:[#allocation17 + $0x5b0] ss:$28 sps:$4 sm:$0xff]   ;;  %v7854_v46 = vld [vmem:[#allocation17 + $0x5b8] ss:$28 sps:$4 sm:$0xff]  }
 0x4a4   :  { %5852 = vmatmul.mubr.bf16.vlgmr.msra.gmra.mrb[12].mxu0 %v8949_v11  ;;  %6024 = vmatmul.mubr.bf16.vlgmr.msra.gmra.mrb[20].mxu1 %v8949_v11  ;;  %v7859_v48 = vld [vmem:[#allocation17 + $0x5ec] ss:$28 sps:$4 sm:$0xff]   ;;  %v7862_v49 = vld [vmem:[#allocation17 + $0x5f4] ss:$28 sps:$4 sm:$0xff]   ;;  %v7865_v3 = vld [vmem:[#allocation17 + $0x624] ss:$28 sps:$4 sm:$0xff]  }
 0x4a5   :  { %5863 = vmatpush1.bf16.msra.mxu0 %v7791_v19  ;;  %6035 = vmatpush1.bf16.msra.mxu1 %v7794_v20  ;;  %v7857_v1 = vld [vmem:[#allocation17 + $0x5e8] ss:$28 sps:$4 sm:$0xff]   ;;  %v7860_v2 = vld [vmem:[#allocation17 + $0x5f0] ss:$28 sps:$4 sm:$0xff]   ;;  %v7863_v6 = vld [vmem:[#allocation17 + $0x620] ss:$28 sps:$4 sm:$0xff]  }
 0x4a6   :  { %5894 = vmatprep.mubr.bf16.mxu0 %v8955_v17  ;;  %6066 = vmatprep.mubr.bf16.mxu1 %v8955_v17  ;;  %v7868_v5 = vld [vmem:[#allocation17 + $0x62c] ss:$28 sps:$4 sm:$0xff]   ;;  %v7871_v8 = vld [vmem:[#allocation17 + $0x65c] ss:$28 sps:$4 sm:$0xff]   ;;  %v7874_v10 = vld [vmem:[#allocation17 + $0x664] ss:$28 sps:$4 sm:$0xff]  }
 0x4a7   :  { %5864 = vmatprep.subr.bf16.mxu0 %v7799_v22  ;;  %6036 = vmatprep.subr.bf16.mxu1 %v7802_v23  ;;  %v7866_v7 = vld [vmem:[#allocation17 + $0x628] ss:$28 sps:$4 sm:$0xff]   ;;  %v7869_v13 = vld [vmem:[#allocation17 + $0x658] ss:$28 sps:$4 sm:$0xff]   ;;  %v7872_v14 = vld [vmem:[#allocation17 + $0x660] ss:$28 sps:$4 sm:$0xff]  }
 0x4a8   :  { %v7877_v19 = vld [vmem:[#allocation17 + $0x694] ss:$28 sps:$4 sm:$0xff]   ;;  %v7880_v20 = vld [vmem:[#allocation17 + $0x69c] ss:$28 sps:$4 sm:$0xff]  }
 0x4a9   :  { %5865 = vmatpush1.bf16.msra.mxu0 %v7797_v24  ;;  %6037 = vmatpush1.bf16.msra.mxu1 %v7800_v25  ;;  %v7875_v22 = vld [vmem:[#allocation17 + $0x690] ss:$28 sps:$4 sm:$0xff]   ;;  %v7878_v23 = vld [vmem:[#allocation17 + $0x698] ss:$28 sps:$4 sm:$0xff]  }
 0x4aa   :  { %5866 = vmatprep.subr.bf16.mxu0 %v7805_v26  ;;  %6038 = vmatprep.subr.bf16.mxu1 %v7808_v27  ;;  %v7883_v24 = vld [vmem:[#allocation17 + $0x6cc] ss:$28 sps:$4 sm:$0xff]   ;;  %v7886_v25 = vld [vmem:[#allocation17 + $0x6d4] ss:$28 sps:$4 sm:$0xff]  }
 0x4ab   :  { %v7881_v26 = vld [vmem:[#allocation17 + $0x6c8] ss:$28 sps:$4 sm:$0xff]   ;;  %v7884_v27 = vld [vmem:[#allocation17 + $0x6d0] ss:$28 sps:$4 sm:$0xff]  }
 0x4ad   :  { %5867 = vmatpush1.bf16.msra.mxu0 %v7803_v28  ;;  %6039 = vmatpush1.bf16.msra.mxu1 %v7806_v29  ;;  %v7889_v28 = vld [vmem:[#allocation17 + $0x704] ss:$28 sps:$4 sm:$0xff]   ;;  %v7892_v29 = vld [vmem:[#allocation17 + $0x70c] ss:$28 sps:$4 sm:$0xff]  }
 0x4ae   :  { %5868 = vmatprep.subr.bf16.mxu0 %v7811_v30  ;;  %6040 = vmatprep.subr.bf16.mxu1 %v7814_v31  ;;  %v7887_v30 = vld [vmem:[#allocation17 + $0x700] ss:$28 sps:$4 sm:$0xff]   ;;  %v7890_v31 = vld [vmem:[#allocation17 + $0x708] ss:$28 sps:$4 sm:$0xff]  }
 0x4b1   :  { %5869 = vmatpush1.bf16.msra.mxu0 %v7809_v32  ;;  %6041 = vmatpush1.bf16.msra.mxu1 %v7812_v33  ;;  %v7895_v32 = vld [vmem:[#allocation17 + $0x73c] ss:$28 sps:$4 sm:$0xff]   ;;  %v7898_v33 = vld [vmem:[#allocation17 + $0x744] ss:$28 sps:$4 sm:$0xff]  }
 0x4b2   :  { %5870 = vmatprep.subr.bf16.mxu0 %v7817_v34  ;;  %6042 = vmatprep.subr.bf16.mxu1 %v7820_v39  ;;  %v7893_v34 = vld [vmem:[#allocation17 + $0x738] ss:$28 sps:$4 sm:$0xff]   ;;  %v7896_v39 = vld [vmem:[#allocation17 + $0x740] ss:$28 sps:$4 sm:$0xff]  }
 0x4b5   :  { %5871 = vmatpush1.bf16.msra.mxu0 %v7815_v35  ;;  %6043 = vmatpush1.bf16.msra.mxu1 %v7818_v36  ;;  %v7901_v35 = vld [vmem:[#allocation17 + $0x774] ss:$28 sps:$4 sm:$0xff]   ;;  %v7904_v36 = vld [vmem:[#allocation17 + $0x77c] ss:$28 sps:$4 sm:$0xff]  }
 0x4b6   :  { %5872 = vmatprep.subr.bf16.mxu0 %v7823_v40  ;;  %6044 = vmatprep.subr.bf16.mxu1 %v7826_v44  ;;  %v7899_v40 = vld [vmem:[#allocation17 + $0x770] ss:$28 sps:$4 sm:$0xff]   ;;  %v7902_v44 = vld [vmem:[#allocation17 + $0x778] ss:$28 sps:$4 sm:$0xff]  }
 0x4b9   :  { %5873 = vmatpush1.bf16.msra.mxu0 %v7821_v45  ;;  %6045 = vmatpush1.bf16.msra.mxu1 %v7824_v47  ;;  %v7907_v45 = vld [vmem:[#allocation17 + $0x7ac] ss:$28 sps:$4 sm:$0xff]   ;;  %v7910_v47 = vld [vmem:[#allocation17 + $0x7b4] ss:$28 sps:$4 sm:$0xff]  }
 0x4ba   :  { %5874 = vmatprep.subr.bf16.mxu0 %v7829_v50  ;;  %6046 = vmatprep.subr.bf16.mxu1 %v7832_v51  ;;  %v7905_v50 = vld [vmem:[#allocation17 + $0x7a8] ss:$28 sps:$4 sm:$0xff]   ;;  %v7908_v51 = vld [vmem:[#allocation17 + $0x7b0] ss:$28 sps:$4 sm:$0xff]  }
 0x4bd   :  { %5875 = vmatpush1.bf16.msra.mxu0 %v7827_v52  ;;  %6047 = vmatpush1.bf16.msra.mxu1 %v7830_v4  ;;  %v7913_v52 = vld [vmem:[#allocation17 + $0x7e4] ss:$28 sps:$4 sm:$0xff]   ;;  %v7916_v4 = vld [vmem:[#allocation17 + $0x7ec] ss:$28 sps:$4 sm:$0xff]  }
 0x4be   :  { %5876 = vmatprep.subr.bf16.mxu0 %v7835_v37  ;;  %6048 = vmatprep.subr.bf16.mxu1 %v7838_v15  ;;  %v7911_v37 = vld [vmem:[#allocation17 + $0x7e0] ss:$28 sps:$4 sm:$0xff]   ;;  %v7914_v15 = vld [vmem:[#allocation17 + $0x7e8] ss:$28 sps:$4 sm:$0xff]  }
 0x4c1   :  { %5877 = vmatpush1.bf16.msra.mxu0 %v7833_v53  ;;  %6049 = vmatpush1.bf16.msra.mxu1 %v7836_v55  ;;  %v7919_v53 = vld [vmem:[#allocation17 + $0x81c] ss:$28 sps:$4 sm:$0xff]   ;;  %v7922_v55 = vld [vmem:[#allocation17 + $0x824] ss:$28 sps:$4 sm:$0xff]  }
 0x4c2   :  { %5878 = vmatprep.subr.bf16.mxu0 %v7841_v56  ;;  %6050 = vmatprep.subr.bf16.mxu1 %v7844_v57  ;;  %v7917_v56 = vld [vmem:[#allocation17 + $0x818] ss:$28 sps:$4 sm:$0xff]   ;;  %v7920_v57 = vld [vmem:[#allocation17 + $0x820] ss:$28 sps:$4 sm:$0xff]  }
 0x4c5   :  { %5879 = vmatpush1.bf16.msra.mxu0 %v7839_v58  ;;  %6051 = vmatpush1.bf16.msra.mxu1 %v7842_v9  ;;  %v7925_v58 = vld [vmem:[#allocation17 + $0x854] ss:$28 sps:$4 sm:$0xff]   ;;  %v7928_v9 = vld [vmem:[#allocation17 + $0x85c] ss:$28 sps:$4 sm:$0xff]  }
 0x4c6   :  { %5880 = vmatprep.subr.bf16.mxu0 %v7847_v60  ;;  %6052 = vmatprep.subr.bf16.mxu1 %v7850_v61  ;;  %v7923_v60 = vld [vmem:[#allocation17 + $0x850] ss:$28 sps:$4 sm:$0xff]   ;;  %v7926_v61 = vld [vmem:[#allocation17 + $0x858] ss:$28 sps:$4 sm:$0xff]  }
 0x4c9   :  { %5881 = vmatpush1.bf16.msra.mxu0 %v7845_v62  ;;  %6053 = vmatpush1.bf16.msra.mxu1 %v7848_v0  ;;  %v7931_v62 = vld [vmem:[#allocation17 + $0x88c] ss:$28 sps:$4 sm:$0xff]   ;;  %v7934_v0 = vld [vmem:[#allocation17 + $0x894] ss:$28 sps:$4 sm:$0xff]  }
 0x4ca   :  { %5882 = vmatprep.subr.bf16.mxu0 %v7853_v41  ;;  %6054 = vmatprep.subr.bf16.mxu1 %v7856_v42  ;;  %v7929_v41 = vld [vmem:[#allocation17 + $0x888] ss:$28 sps:$4 sm:$0xff]   ;;  %v7932_v42 = vld [vmem:[#allocation17 + $0x890] ss:$28 sps:$4 sm:$0xff]  }
 0x4cd   :  { %5883 = vmatpush1.bf16.msra.mxu0 %v7851_v43  ;;  %6055 = vmatpush1.bf16.msra.mxu1 %v7854_v46  ;;  %v7937_v43 = vld [vmem:[#allocation17 + $0x8c4] ss:$28 sps:$4 sm:$0xff]   ;;  %v7940_v46 = vld [vmem:[#allocation17 + $0x8cc] ss:$28 sps:$4 sm:$0xff]  }
 0x4ce   :  { %5884 = vmatprep.subr.bf16.mxu0 %v7859_v48  ;;  %6056 = vmatprep.subr.bf16.mxu1 %v7862_v49  ;;  %v7935_v48 = vld [vmem:[#allocation17 + $0x8c0] ss:$28 sps:$4 sm:$0xff]   ;;  %v7938_v49 = vld [vmem:[#allocation17 + $0x8c8] ss:$28 sps:$4 sm:$0xff]  }
 0x4d1   :  { %5885 = vmatpush1.bf16.msra.mxu0 %v7857_v1  ;;  %6057 = vmatpush1.bf16.msra.mxu1 %v7860_v2  ;;  %v7943_v1 = vld [vmem:[#allocation17 + $0x8fc] ss:$28 sps:$4 sm:$0xff]   ;;  %v7946_v2 = vld [vmem:[#allocation17 + $0x904] ss:$28 sps:$4 sm:$0xff]  }
 0x4d2   :  { %5886 = vmatprep.subr.bf16.mxu0 %v7865_v3  ;;  %6058 = vmatprep.subr.bf16.mxu1 %v7868_v5  ;;  %v7941_v3 = vld [vmem:[#allocation17 + $0x8f8] ss:$28 sps:$4 sm:$0xff]   ;;  %v7944_v5 = vld [vmem:[#allocation17 + $0x900] ss:$28 sps:$4 sm:$0xff]  }
 0x4d5   :  { %5887 = vmatpush1.bf16.msra.mxu0 %v7863_v6  ;;  %6059 = vmatpush1.bf16.msra.mxu1 %v7866_v7  ;;  %v7949_v6 = vld [vmem:[#allocation17 + $0x934] ss:$28 sps:$4 sm:$0xff]   ;;  %v7952_v7 = vld [vmem:[#allocation17 + $0x93c] ss:$28 sps:$4 sm:$0xff]  }
 0x4d6   :  { %5888 = vmatprep.subr.bf16.mxu0 %v7871_v8  ;;  %6060 = vmatprep.subr.bf16.mxu1 %v7874_v10  ;;  %v7947_v8 = vld [vmem:[#allocation17 + $0x930] ss:$28 sps:$4 sm:$0xff]   ;;  %v7950_v10 = vld [vmem:[#allocation17 + $0x938] ss:$28 sps:$4 sm:$0xff]  }
 0x4d9   :  { %5889 = vmatpush1.bf16.msra.mxu0 %v7869_v13  ;;  %6061 = vmatpush1.bf16.msra.mxu1 %v7872_v14  ;;  %v7955_v13 = vld [vmem:[#allocation17 + $0x96c] ss:$28 sps:$4 sm:$0xff]   ;;  %v7958_v14 = vld [vmem:[#allocation17 + $0x974] ss:$28 sps:$4 sm:$0xff]  }
 0x4da   :  { %5890 = vmatprep.subr.bf16.mxu0 %v7877_v19  ;;  %6062 = vmatprep.subr.bf16.mxu1 %v7880_v20  ;;  %v7953_v19 = vld [vmem:[#allocation17 + $0x968] ss:$28 sps:$4 sm:$0xff]   ;;  %v7956_v20 = vld [vmem:[#allocation17 + $0x970] ss:$28 sps:$4 sm:$0xff]  }
 0x4dd   :  { %5891 = vmatpush1.bf16.msra.mxu0 %v7875_v22  ;;  %6063 = vmatpush1.bf16.msra.mxu1 %v7878_v23  ;;  %v7961_v22 = vld [vmem:[#allocation17 + $0x9a4] ss:$28 sps:$4 sm:$0xff]   ;;  %v7964_v23 = vld [vmem:[#allocation17 + $0x9ac] ss:$28 sps:$4 sm:$0xff]  }
 0x4de   :  { %5892 = vmatprep.subr.bf16.mxu0 %v7883_v24  ;;  %6064 = vmatprep.subr.bf16.mxu1 %v7886_v25  ;;  %v1264_v24 = vsub.s32 4, %v8860_v54  ;;  %v1272_v25 = vsub.s32 6, %v8860_v54 }
 0x4e1   :  { %5893 = vmatpush1.bf16.msra.mxu0 %v7881_v26  ;;  %6065 = vmatpush1.bf16.msra.mxu1 %v7884_v27  ;;  %v1268_v26 = vsub.s32 5, %v8860_v54  ;;  %v7959_v27 = vld [vmem:[#allocation17 + $0x9a0] ss:$28 sps:$4 sm:$0xff]  }
 0x4e2   :  { %5905 = vmatprep.subr.bf16.mxu0 %v7889_v28  ;;  %6077 = vmatprep.subr.bf16.mxu1 %v7892_v29  ;;  %v7962_v28 = vld [vmem:[#allocation17 + $0x9a8] ss:$28 sps:$4 sm:$0xff]   ;;  %v1276_v29 = vsub.s32 7, %v8860_v54 }
 0x4e4   :  { %5895 = vmatmul.mubr.bf16.vlgmr.msra.gmra.mrb[12].mxu0 %v8951_v12  ;;  %6067 = vmatmul.mubr.bf16.vlgmr.msra.gmra.mrb[20].mxu1 %v8951_v12 }
 0x4e5   :  { %5906 = vmatpush1.bf16.msra.mxu0 %v7887_v30  ;;  %6078 = vmatpush1.bf16.msra.mxu1 %v7890_v31  ;;  %v7967_v30 = vld [vmem:[#allocation17 + $0x9dc] ss:$28 sps:$4 sm:$0xff]   ;;  %v7970_v31 = vld [vmem:[#allocation17 + $0x9e4] ss:$28 sps:$4 sm:$0xff]  }
 0x4e6   :  { %5907 = vmatprep.subr.bf16.mxu0 %v7895_v32  ;;  %6079 = vmatprep.subr.bf16.mxu1 %v7898_v33  ;;  %v1265_v32 = vrot.slane %v8937_v38, %v1264_v24  ;;  %v1273_v33 = vrot.slane %v8937_v38, %v1272_v25 }
 0x4e9   :  { %5908 = vmatpush1.bf16.msra.mxu0 %v7893_v34  ;;  %6080 = vmatpush1.bf16.msra.mxu1 %v7896_v39  ;;  %v1269_v34 = vrot.slane %v8937_v38, %v1268_v26  ;;  %v7965_v39 = vld [vmem:[#allocation17 + $0x9d8] ss:$28 sps:$4 sm:$0xff]  }
 0x4ea   :  { %5909 = vmatprep.subr.bf16.mxu0 %v7901_v35  ;;  %6081 = vmatprep.subr.bf16.mxu1 %v7904_v36  ;;  %v7968_v35 = vld [vmem:[#allocation17 + $0x9e0] ss:$28 sps:$4 sm:$0xff]   ;;  %v1277_v36 = vrot.slane %v8937_v38, %v1276_v29 }
 0x4ed   :  { %5910 = vmatpush1.bf16.msra.mxu0 %v7899_v40  ;;  %6082 = vmatpush1.bf16.msra.mxu1 %v7902_v44  ;;  %v7973_v44 = vld [vmem:[#allocation17 + $0xa14] ss:$28 sps:$4 sm:$0xff]  }
 0x4ee   :  { %5911 = vmatprep.subr.bf16.mxu0 %v7907_v45  ;;  %6083 = vmatprep.subr.bf16.mxu1 %v7910_v47  ;;  %v7976_v45 = vld [vmem:[#allocation17 + $0xa1c] ss:$28 sps:$4 sm:$0xff]  }
 0x4f1   :  { %5912 = vmatpush1.bf16.msra.mxu0 %v7905_v50  ;;  %6084 = vmatpush1.bf16.msra.mxu1 %v7908_v51 }
 0x4f2   :  { %5913 = vmatprep.subr.bf16.mxu0 %v7913_v52  ;;  %6085 = vmatprep.subr.bf16.mxu1 %v7916_v4 }
 0x4f5   :  { %5914 = vmatpush1.bf16.msra.mxu0 %v7911_v37  ;;  %6086 = vmatpush1.bf16.msra.mxu1 %v7914_v15 }
 0x4f6   :  { %5915 = vmatprep.subr.bf16.mxu0 %v7919_v53  ;;  %6087 = vmatprep.subr.bf16.mxu1 %v7922_v55  ;;  %v7971_v53 = vld [vmem:[#allocation17 + $0xa10] ss:$28 sps:$4 sm:$0xff]  }
 0x4f9   :  { %5916 = vmatpush1.bf16.msra.mxu0 %v7917_v56  ;;  %6088 = vmatpush1.bf16.msra.mxu1 %v7920_v57 }
 0x4fa   :  { %5917 = vmatprep.subr.bf16.mxu0 %v7925_v58  ;;  %6089 = vmatprep.subr.bf16.mxu1 %v7928_v9  ;;  %v7974_v9 = vld [vmem:[#allocation17 + $0xa18] ss:$28 sps:$4 sm:$0xff]  }
 0x4fd   :  { %5918 = vmatpush1.bf16.msra.mxu0 %v7923_v60  ;;  %6090 = vmatpush1.bf16.msra.mxu1 %v7926_v61  ;;  %v7979_v60 = vld [vmem:[#allocation17 + $0xa4c] ss:$28 sps:$4 sm:$0xff]   ;;  %v7982_v61 = vld [vmem:[#allocation17 + $0xa54] ss:$28 sps:$4 sm:$0xff]  }
 0x4fe   :  { %5919 = vmatprep.subr.bf16.mxu0 %v7931_v62  ;;  %6091 = vmatprep.subr.bf16.mxu1 %v7934_v0 }
 0x501   :  { %5920 = vmatpush1.bf16.msra.mxu0 %v7929_v41  ;;  %6092 = vmatpush1.bf16.msra.mxu1 %v7932_v42  ;;  %v7977_v41 = vld [vmem:[#allocation17 + $0xa48] ss:$28 sps:$4 sm:$0xff]   ;;  %v7980_v42 = vld [vmem:[#allocation17 + $0xa50] ss:$28 sps:$4 sm:$0xff]  }
 0x502   :  { %5921 = vmatprep.subr.bf16.mxu0 %v7937_v43  ;;  %6093 = vmatprep.subr.bf16.mxu1 %v7940_v46 }
 0x505   :  { %5922 = vmatpush1.bf16.msra.mxu0 %v7935_v48  ;;  %6094 = vmatpush1.bf16.msra.mxu1 %v7938_v49 }
 0x506   :  { %5923 = vmatprep.subr.bf16.mxu0 %v7943_v1  ;;  %6095 = vmatprep.subr.bf16.mxu1 %v7946_v2 }
 0x509   :  { %5924 = vmatpush1.bf16.msra.mxu0 %v7941_v3  ;;  %6096 = vmatpush1.bf16.msra.mxu1 %v7944_v5  ;;  %v7985_v3 = vld [vmem:[#allocation17 + $0xa84] ss:$28 sps:$4 sm:$0xff]   ;;  %v7988_v5 = vld [vmem:[#allocation17 + $0xa8c] ss:$28 sps:$4 sm:$0xff]  }
 0x50a   :  { %5925 = vmatprep.subr.bf16.mxu0 %v7949_v6  ;;  %6097 = vmatprep.subr.bf16.mxu1 %v7952_v7 }
 0x50d   :  { %5926 = vmatpush1.bf16.msra.mxu0 %v7947_v8  ;;  %6098 = vmatpush1.bf16.msra.mxu1 %v7950_v10 }
 0x50e   :  { %5927 = vmatprep.subr.bf16.mxu0 %v7955_v13  ;;  %6099 = vmatprep.subr.bf16.mxu1 %v7958_v14 }
 0x511   :  { %5928 = vmatpush1.bf16.msra.mxu0 %v7953_v19  ;;  %6100 = vmatpush1.bf16.msra.mxu1 %v7956_v20 }
 0x512   :  { %5929 = vmatprep.subr.bf16.mxu0 %v7961_v22  ;;  %6101 = vmatprep.subr.bf16.mxu1 %v7964_v23 }
 0x515   :  { %5930 = vmatpush1.bf16.msra.mxu0 %v7959_v27  ;;  %6102 = vmatpush1.bf16.msra.mxu1 %v7962_v28 }
 0x516   :  { %5931 = vmatprep.subr.bf16.mxu0 %v7967_v30  ;;  %6103 = vmatprep.subr.bf16.mxu1 %v7970_v31  ;;  %v2815_v40 = vpop.f32.mrb[8].mxu0  ;;  %v7983_v31 = vld [vmem:[#allocation17 + $0xa80] ss:$28 sps:$4 sm:$0xff]  }
 0x517   :  { %v7467_v47 = vadd.f32 %v2815_v40, %v1265_v32  ;;  %v2901_v50 = vpop.f32.mrb[16].mxu1  ;;  %v2817_v51 = vpop.f32.mrb[9].mxu0  ;;  %v7997_v40 = vld [vmem:[#allocation17 + $0xaf4] ss:$28 sps:$4 sm:$0xff]  }
 0x518   :  { %v7471_v52 = vadd.f32 %v2901_v50, %v1273_v33  ;;  %v7468_v4 = vadd.f32 %v2817_v51, %v1269_v34  ;;  %v2903_v37 = vpop.f32.mrb[17].mxu1  ;;  %v2819_v15 = vpop.f32.mrb[10].mxu0  ;;  %v8003_v50 = vld [vmem:[#allocation17 + $0xb2c] ss:$28 sps:$4 sm:$0xff]   ;;  %v8006_v51 = vld [vmem:[#allocation17 + $0xb34] ss:$28 sps:$4 sm:$0xff]  }
 0x519   :  { %v2930_v55 = vmul.f32 0.2, %v7467_v47  ;;  %5932 = vmatpush1.bf16.msra.mxu0 %v7965_v39  ;;  %6104 = vmatpush1.bf16.msra.mxu1 %v7968_v35  ;;  %v7472_v56 = vadd.f32 %v2903_v37, %v1277_v36  ;;  %v7469_v57 = vadd.f32 %v2819_v15, %v1265_v32  ;;  %v2905_v58 = vpop.f32.mrb[18].mxu1  ;;  %v2821_v38 = vpop.f32.mrb[11].mxu0  ;;  %vm2914_vm7 = vcmp.gt.f32.partialorder %v7467_v47, 0.0 }
 0x51a   :  { %5933 = vmatprep.subr.bf16.mxu0 %v7973_v44  ;;  %6105 = vmatprep.subr.bf16.mxu1 %v7976_v45  ;;  %vm2916_vm8 = vcmp.gt.f32.partialorder %v7471_v52, 0.0  ;;  %v2932_v62 = vmul.f32 0.2, %v7471_v52  ;;  %v2907_v0 = vpop.f32.mrb[19].mxu1  ;;  %vm2915_vm10 = vcmp.gt.f32.partialorder %v7468_v4, 0.0  ;;  %v7473_v48 = vadd.f32 %v2905_v58, %v1273_v33 }
 0x51b   :  { %vm2922_vm9 = vcmp.gt.f32.partialorder %v7469_v57, 0.0  ;;  %v2931_v43 = vmul.f32 0.2, %v7468_v4  ;;  %v2938_v46 = vmul.f32 0.2, %v7469_v57  ;;  %v2946_v49 = vsel %vm2914_vm7, %v7467_v47, %v2930_v55 }
 0x51c   :  { %vm2917_vm11 = vcmp.gt.f32.partialorder %v7472_v56, 0.0  ;;  %v7470_v1 = vadd.f32 %v2821_v38, %v1269_v34  ;;  %v7474_v2 = vadd.f32 %v2907_v0, %v1277_v36  ;;  %v2933_v6 = vmul.f32 0.2, %v7472_v56  ;;  %v7986_v32 = vld [vmem:[#allocation17 + $0xa88] ss:$28 sps:$4 sm:$0xff]  }
 0x51d   :  { %5934 = vmatpush1.bf16.msra.mxu0 %v7971_v53  ;;  %6106 = vmatpush1.bf16.msra.mxu1 %v7974_v9  ;;  %v2954_v7 = vsel %vm2922_vm9, %v7469_v57, %v2938_v46  ;;  %vm2924_vm12 = vcmp.gt.f32.partialorder %v7473_v48, 0.0  ;;  %v2940_v8 = vmul.f32 0.2, %v7473_v48  ;;  %v2948_v14 = vsel %vm2916_vm8, %v7471_v52, %v2932_v62  ;;  %v7991_v34 = vld [vmem:[#allocation17 + $0xabc] ss:$28 sps:$4 sm:$0xff]  }
 0x51e   :  { %5935 = vmatprep.subr.bf16.mxu0 %v7979_v60  ;;  %6107 = vmatprep.subr.bf16.mxu1 %v7982_v61  ;;  %v8980_v10 = vpack.c.bf16 %v2954_v7, %v2946_v49  ;;  %vm2923_vm13 = vcmp.gt.f32.partialorder %v7470_v1, 0.0  ;;  %v2939_v13 = vmul.f32 0.2, %v7470_v1  ;;  %vm2925_vm14 = vcmp.gt.f32.partialorder %v7474_v2, 0.0  ;;  %v7994_v39 = vld [vmem:[#allocation17 + $0xac4] ss:$28 sps:$4 sm:$0xff]  }
 0x51f   :  { %v2956_v19 = vsel %vm2924_vm12, %v7473_v48, %v2940_v8  ;;  %v2941_v20 = vmul.f32 0.2, %v7474_v2  ;;  %v2947_v22 = vsel %vm2915_vm10, %v7468_v4, %v2931_v43  ;;  %v2949_v28 = vsel %vm2917_vm11, %v7472_v56, %v2933_v6  ;;  %v7989_v35 = vld [vmem:[#allocation17 + $0xab8] ss:$28 sps:$4 sm:$0xff]   ;;  %v7992_v36 = vld [vmem:[#allocation17 + $0xac0] ss:$28 sps:$4 sm:$0xff]  }
 0x520   :  { %v8984_v23 = vpack.c.bf16 %v2956_v19, %v2948_v14  ;;  %v2955_v27 = vsel %vm2923_vm13, %v7470_v1, %v2939_v13  ;;  %v8000_v44 = vld [vmem:[#allocation17 + $0xafc] ss:$28 sps:$4 sm:$0xff]   ;;  %v7995_v45 = vld [vmem:[#allocation17 + $0xaf0] ss:$28 sps:$4 sm:$0xff]   ;;  %v8001_v52 = vld [vmem:[#allocation17 + $0xb28] ss:$28 sps:$4 sm:$0xff]  }
 0x521   :  { %5936 = vmatpush1.bf16.msra.mxu0 %v7977_v41  ;;  %6108 = vmatpush1.bf16.msra.mxu1 %v7980_v42  ;;  %v8987_v29 = vpack.c.bf16 %v2955_v27, %v2947_v22  ;;  %v2957_v30 = vsel %vm2925_vm14, %v7474_v2, %v2941_v20  ;;  %v7998_v47 = vld [vmem:[#allocation17 + $0xaf8] ss:$28 sps:$4 sm:$0xff]   ;;  %v8004_v4 = vld [vmem:[#allocation17 + $0xb30] ss:$28 sps:$4 sm:$0xff]   ;;  %v8009_v37 = vld [vmem:[#allocation17 + $0xb64] ss:$28 sps:$4 sm:$0xff]  }
 0x522   :  { %5948 = vmatprep.subr.bf16.mxu0 %v7985_v3  ;;  %6120 = vmatprep.subr.bf16.mxu1 %v7988_v5  ;;  %v8989_v33 = vpack.c.bf16 %v2957_v30, %v2949_v28  ;;  %v8012_v15 = vld [vmem:[#allocation17 + $0xb6c] ss:$28 sps:$4 sm:$0xff]   ;;  %v8007_v53 = vld [vmem:[#allocation17 + $0xb60] ss:$28 sps:$4 sm:$0xff]   ;;  %v8013_v58 = vld [vmem:[#allocation17 + $0xb98] ss:$28 sps:$4 sm:$0xff]  }
 0x523   :  { %5937 = vmatprep.mubr.bf16.mxu0 %v8987_v29  ;;  %6109 = vmatprep.mubr.bf16.mxu1 %v8987_v29  ;;  %v8010_v55 = vld [vmem:[#allocation17 + $0xb68] ss:$28 sps:$4 sm:$0xff]   ;;  %v8015_v56 = vld [vmem:[#allocation17 + $0xb9c] ss:$28 sps:$4 sm:$0xff]   ;;  %v8021_v9 = vld [vmem:[#allocation17 + $0xbd4] ss:$28 sps:$4 sm:$0xff]  }
 0x524   :  { %5938 = vmatmul.mubr.bf16.vlgmr.msra.gmra.mrb[12].mxu0 %v8980_v10  ;;  %6110 = vmatmul.mubr.bf16.vlgmr.msra.gmra.mrb[20].mxu1 %v8980_v10  ;;  %v8018_v57 = vld [vmem:[#allocation17 + $0xba4] ss:$28 sps:$4 sm:$0xff]   ;;  %v8024_v60 = vld [vmem:[#allocation17 + $0xbdc] ss:$28 sps:$4 sm:$0xff]   ;;  %v8019_v61 = vld [vmem:[#allocation17 + $0xbd0] ss:$28 sps:$4 sm:$0xff]  }
 0x525   :  { %5949 = vmatpush1.bf16.msra.mxu0 %v7983_v31  ;;  %6121 = vmatpush1.bf16.msra.mxu1 %v7986_v32  ;;  %v8016_v38 = vld [vmem:[#allocation17 + $0xba0] ss:$28 sps:$4 sm:$0xff]   ;;  %v8022_v62 = vld [vmem:[#allocation17 + $0xbd8] ss:$28 sps:$4 sm:$0xff]   ;;  %v8027_v0 = vld [vmem:[#allocation17 + $0xc0c] ss:$28 sps:$4 sm:$0xff]  }
 0x526   :  { %5980 = vmatprep.mubr.bf16.mxu0 %v8989_v33  ;;  %6152 = vmatprep.mubr.bf16.mxu1 %v8989_v33  ;;  %v8030_v41 = vld [vmem:[#allocation17 + $0xc14] ss:$28 sps:$4 sm:$0xff]   ;;  %v8025_v42 = vld [vmem:[#allocation17 + $0xc08] ss:$28 sps:$4 sm:$0xff]   ;;  %v8031_v49 = vld [vmem:[#allocation17 + $0xc40] ss:$28 sps:$4 sm:$0xff]  }
 0x527   :  { %5950 = vmatprep.subr.bf16.mxu0 %v7991_v34  ;;  %6122 = vmatprep.subr.bf16.mxu1 %v7994_v39  ;;  %v8028_v43 = vld [vmem:[#allocation17 + $0xc10] ss:$28 sps:$4 sm:$0xff]   ;;  %v8033_v46 = vld [vmem:[#allocation17 + $0xc44] ss:$28 sps:$4 sm:$0xff]   ;;  %v8039_v2 = vld [vmem:[#allocation17 + $0xc7c] ss:$28 sps:$4 sm:$0xff]  }
 0x528   :  { %v8036_v48 = vld [vmem:[#allocation17 + $0xc4c] ss:$28 sps:$4 sm:$0xff]   ;;  %v8042_v3 = vld [vmem:[#allocation17 + $0xc84] ss:$28 sps:$4 sm:$0xff]   ;;  %v8037_v5 = vld [vmem:[#allocation17 + $0xc78] ss:$28 sps:$4 sm:$0xff]  }
 0x529   :  { %5951 = vmatpush1.bf16.msra.mxu0 %v7989_v35  ;;  %6123 = vmatpush1.bf16.msra.mxu1 %v7992_v36  ;;  %v8034_v1 = vld [vmem:[#allocation17 + $0xc48] ss:$28 sps:$4 sm:$0xff]   ;;  %v8040_v6 = vld [vmem:[#allocation17 + $0xc80] ss:$28 sps:$4 sm:$0xff]   ;;  %v8045_v7 = vld [vmem:[#allocation17 + $0xcb4] ss:$28 sps:$4 sm:$0xff]  }
 0x52a   :  { %5952 = vmatprep.subr.bf16.mxu0 %v7997_v40  ;;  %6124 = vmatprep.subr.bf16.mxu1 %v8000_v44  ;;  %v8048_v8 = vld [vmem:[#allocation17 + $0xcbc] ss:$28 sps:$4 sm:$0xff]   ;;  %v8043_v13 = vld [vmem:[#allocation17 + $0xcb0] ss:$28 sps:$4 sm:$0xff]   ;;  %v8049_v22 = vld [vmem:[#allocation17 + $0xce8] ss:$28 sps:$4 sm:$0xff]  }
 0x52b   :  { %v8046_v14 = vld [vmem:[#allocation17 + $0xcb8] ss:$28 sps:$4 sm:$0xff]   ;;  %v8051_v19 = vld [vmem:[#allocation17 + $0xcec] ss:$28 sps:$4 sm:$0xff]   ;;  %v8057_v28 = vld [vmem:[#allocation17 + $0xd24] ss:$28 sps:$4 sm:$0xff]  }
 0x52c   :  { %v8054_v20 = vld [vmem:[#allocation17 + $0xcf4] ss:$28 sps:$4 sm:$0xff]   ;;  %v8060_v30 = vld [vmem:[#allocation17 + $0xd2c] ss:$28 sps:$4 sm:$0xff]   ;;  %v8055_v31 = vld [vmem:[#allocation17 + $0xd20] ss:$28 sps:$4 sm:$0xff]  }
 0x52d   :  { %5953 = vmatpush1.bf16.msra.mxu0 %v7995_v45  ;;  %6125 = vmatpush1.bf16.msra.mxu1 %v7998_v47  ;;  %v8052_v27 = vld [vmem:[#allocation17 + $0xcf0] ss:$28 sps:$4 sm:$0xff]   ;;  %v8058_v32 = vld [vmem:[#allocation17 + $0xd28] ss:$28 sps:$4 sm:$0xff]   ;;  %v8063_v34 = vld [vmem:[#allocation17 + $0xd5c] ss:$28 sps:$4 sm:$0xff]  }
 0x52e   :  { %5954 = vmatprep.subr.bf16.mxu0 %v8003_v50  ;;  %6126 = vmatprep.subr.bf16.mxu1 %v8006_v51  ;;  %v8066_v39 = vld [vmem:[#allocation17 + $0xd64] ss:$28 sps:$4 sm:$0xff]   ;;  %v8061_v35 = vld [vmem:[#allocation17 + $0xd58] ss:$28 sps:$4 sm:$0xff]   ;;  %v8067_v45 = vld [vmem:[#allocation17 + $0xd90] ss:$28 sps:$4 sm:$0xff]  }
 0x52f   :  { %v8064_v36 = vld [vmem:[#allocation17 + $0xd60] ss:$28 sps:$4 sm:$0xff]   ;;  %v8069_v40 = vld [vmem:[#allocation17 + $0xd94] ss:$28 sps:$4 sm:$0xff]   ;;  %v8075_v50 = vld [vmem:[#allocation17 + $0xdcc] ss:$28 sps:$4 sm:$0xff]  }
 0x530   :  { %v8072_v44 = vld [vmem:[#allocation17 + $0xd9c] ss:$28 sps:$4 sm:$0xff]   ;;  %v8078_v51 = vld [vmem:[#allocation17 + $0xdd4] ss:$28 sps:$4 sm:$0xff]  }
 0x531   :  { %5955 = vmatpush1.bf16.msra.mxu0 %v8001_v52  ;;  %6127 = vmatpush1.bf16.msra.mxu1 %v8004_v4  ;;  %v8070_v47 = vld [vmem:[#allocation17 + $0xd98] ss:$28 sps:$4 sm:$0xff]   ;;  %v8073_v52 = vld [vmem:[#allocation17 + $0xdc8] ss:$28 sps:$4 sm:$0xff]   ;;  %v8076_v4 = vld [vmem:[#allocation17 + $0xdd0] ss:$28 sps:$4 sm:$0xff]  }
 0x532   :  { %5956 = vmatprep.subr.bf16.mxu0 %v8009_v37  ;;  %6128 = vmatprep.subr.bf16.mxu1 %v8012_v15  ;;  %v8081_v37 = vld [vmem:[#allocation17 + $0x14] ss:$28 sps:$4 sm:$0xff]  }
 0x533   :  { %v8082_v15 = vld [vmem:[#allocation17 + $0x1d8] ss:$28 sps:$4 sm:$0xff]  }
 0x535   :  { %5957 = vmatpush1.bf16.msra.mxu0 %v8007_v53  ;;  %6129 = vmatpush1.bf16.msra.mxu1 %v8010_v55  ;;  %v8079_v53 = vld [vmem:[#allocation17 + $0x10] ss:$28 sps:$4 sm:$0xff]   ;;  %v8083_v55 = vld [vmem:[#allocation17 + $0x18] ss:$28 sps:$4 sm:$0xff]  }
 0x536   :  { %5958 = vmatprep.subr.bf16.mxu0 %v8015_v56  ;;  %6130 = vmatprep.subr.bf16.mxu1 %v8018_v57  ;;  %v8086_v56 = vld [vmem:[#allocation17 + $0x4c] ss:$28 sps:$4 sm:$0xff]  }
 0x537   :  { %v8087_v57 = vld [vmem:[#allocation17 + $0x210] ss:$28 sps:$4 sm:$0xff]  }
 0x539   :  { %5959 = vmatpush1.bf16.msra.mxu0 %v8013_v58  ;;  %6131 = vmatpush1.bf16.msra.mxu1 %v8016_v38  ;;  %v8084_v58 = vld [vmem:[#allocation17 + $0x48] ss:$28 sps:$4 sm:$0xff]   ;;  %v8088_v38 = vld [vmem:[#allocation17 + $0x50] ss:$28 sps:$4 sm:$0xff]  }
 0x53a   :  { %5960 = vmatprep.subr.bf16.mxu0 %v8021_v9  ;;  %6132 = vmatprep.subr.bf16.mxu1 %v8024_v60  ;;  %v8091_v9 = vld [vmem:[#allocation17 + $0x84] ss:$28 sps:$4 sm:$0xff]  }
 0x53b   :  { %v8092_v60 = vld [vmem:[#allocation17 + $0x248] ss:$28 sps:$4 sm:$0xff]  }
 0x53d   :  { %5961 = vmatpush1.bf16.msra.mxu0 %v8019_v61  ;;  %6133 = vmatpush1.bf16.msra.mxu1 %v8022_v62  ;;  %v8089_v61 = vld [vmem:[#allocation17 + $0x80] ss:$28 sps:$4 sm:$0xff]   ;;  %v8093_v62 = vld [vmem:[#allocation17 + $0x88] ss:$28 sps:$4 sm:$0xff]  }
 0x53e   :  { %5962 = vmatprep.subr.bf16.mxu0 %v8027_v0  ;;  %6134 = vmatprep.subr.bf16.mxu1 %v8030_v41  ;;  %v8096_v0 = vld [vmem:[#allocation17 + $0xbc] ss:$28 sps:$4 sm:$0xff]  }
 0x53f   :  { %v8097_v41 = vld [vmem:[#allocation17 + $0x280] ss:$28 sps:$4 sm:$0xff]  }
 0x541   :  { %5963 = vmatpush1.bf16.msra.mxu0 %v8025_v42  ;;  %6135 = vmatpush1.bf16.msra.mxu1 %v8028_v43  ;;  %v8094_v42 = vld [vmem:[#allocation17 + $0xb8] ss:$28 sps:$4 sm:$0xff]   ;;  %v8098_v43 = vld [vmem:[#allocation17 + $0xc0] ss:$28 sps:$4 sm:$0xff]  }
 0x542   :  { %5964 = vmatprep.subr.bf16.mxu0 %v8033_v46  ;;  %6136 = vmatprep.subr.bf16.mxu1 %v8036_v48  ;;  %v8101_v46 = vld [vmem:[#allocation17 + $0xf4] ss:$28 sps:$4 sm:$0xff]  }
 0x543   :  { %v8099_v48 = vld [vmem:[#allocation17 + $0xf0] ss:$28 sps:$4 sm:$0xff]  }
 0x545   :  { %5965 = vmatpush1.bf16.msra.mxu0 %v8031_v49  ;;  %6137 = vmatpush1.bf16.msra.mxu1 %v8034_v1  ;;  %v8103_v49 = vld [vmem:[#allocation17 + $0xf8] ss:$28 sps:$4 sm:$0xff]   ;;  %v8106_v1 = vld [vmem:[#allocation17 + $0x12c] ss:$28 sps:$4 sm:$0xff]  }
 0x546   :  { %5966 = vmatprep.subr.bf16.mxu0 %v8039_v2  ;;  %6138 = vmatprep.subr.bf16.mxu1 %v8042_v3  ;;  %v8107_v2 = vld [vmem:[#allocation17 + $0x2f0] ss:$28 sps:$4 sm:$0xff]   ;;  %v8104_v3 = vld [vmem:[#allocation17 + $0x128] ss:$28 sps:$4 sm:$0xff]  }
 0x549   :  { %5967 = vmatpush1.bf16.msra.mxu0 %v8037_v5  ;;  %6139 = vmatpush1.bf16.msra.mxu1 %v8040_v6  ;;  %v8108_v5 = vld [vmem:[#allocation17 + $0x130] ss:$28 sps:$4 sm:$0xff]   ;;  %v8111_v6 = vld [vmem:[#allocation17 + $0x164] ss:$28 sps:$4 sm:$0xff]  }
 0x54a   :  { %5968 = vmatprep.subr.bf16.mxu0 %v8045_v7  ;;  %6140 = vmatprep.subr.bf16.mxu1 %v8048_v8  ;;  %v8112_v7 = vld [vmem:[#allocation17 + $0x328] ss:$28 sps:$4 sm:$0xff]   ;;  %v8109_v8 = vld [vmem:[#allocation17 + $0x160] ss:$28 sps:$4 sm:$0xff]  }
 0x54d   :  { %5969 = vmatpush1.bf16.msra.mxu0 %v8043_v13  ;;  %6141 = vmatpush1.bf16.msra.mxu1 %v8046_v14  ;;  %v8113_v13 = vld [vmem:[#allocation17 + $0x168] ss:$28 sps:$4 sm:$0xff]   ;;  %v8116_v14 = vld [vmem:[#allocation17 + $0x19c] ss:$28 sps:$4 sm:$0xff]  }
 0x54e   :  { %5970 = vmatprep.subr.bf16.mxu0 %v8051_v19  ;;  %6142 = vmatprep.subr.bf16.mxu1 %v8054_v20  ;;  %v8117_v19 = vld [vmem:[#allocation17 + $0x360] ss:$28 sps:$4 sm:$0xff]   ;;  %v8114_v20 = vld [vmem:[#allocation17 + $0x198] ss:$28 sps:$4 sm:$0xff]  }
 0x551   :  { %5971 = vmatpush1.bf16.msra.mxu0 %v8049_v22  ;;  %6143 = vmatpush1.bf16.msra.mxu1 %v8052_v27  ;;  %v8118_v22 = vld [vmem:[#allocation17 + $0x1a0] ss:$28 sps:$4 sm:$0xff]   ;;  %v8121_v27 = vld [vmem:[#allocation17 + $0x1d4] ss:$28 sps:$4 sm:$0xff]  }
 0x552   :  { %5972 = vmatprep.subr.bf16.mxu0 %v8057_v28  ;;  %6144 = vmatprep.subr.bf16.mxu1 %v8060_v30  ;;  %v8122_v28 = vld [vmem:[#allocation17 + $0x558] ss:$28 sps:$4 sm:$0xff]   ;;  %v8119_v30 = vld [vmem:[#allocation17 + $0x1d0] ss:$28 sps:$4 sm:$0xff]  }
 0x555   :  { %5973 = vmatpush1.bf16.msra.mxu0 %v8055_v31  ;;  %6145 = vmatpush1.bf16.msra.mxu1 %v8058_v32  ;;  %v8123_v31 = vld [vmem:[#allocation17 + $0x398] ss:$28 sps:$4 sm:$0xff]   ;;  %v8126_v32 = vld [vmem:[#allocation17 + $0x20c] ss:$28 sps:$4 sm:$0xff]  }
 0x556   :  { %5974 = vmatprep.subr.bf16.mxu0 %v8063_v34  ;;  %6146 = vmatprep.subr.bf16.mxu1 %v8066_v39  ;;  %v8127_v34 = vld [vmem:[#allocation17 + $0x590] ss:$28 sps:$4 sm:$0xff]   ;;  %v8124_v39 = vld [vmem:[#allocation17 + $0x208] ss:$28 sps:$4 sm:$0xff]  }
 0x559   :  { %5975 = vmatpush1.bf16.msra.mxu0 %v8061_v35  ;;  %6147 = vmatpush1.bf16.msra.mxu1 %v8064_v36  ;;  %v8128_v35 = vld [vmem:[#allocation17 + $0x3d0] ss:$28 sps:$4 sm:$0xff]   ;;  %v8131_v36 = vld [vmem:[#allocation17 + $0x244] ss:$28 sps:$4 sm:$0xff]  }
 0x55a   :  { %5976 = vmatprep.subr.bf16.mxu0 %v8069_v40  ;;  %6148 = vmatprep.subr.bf16.mxu1 %v8072_v44  ;;  %v8132_v40 = vld [vmem:[#allocation17 + $0x5c8] ss:$28 sps:$4 sm:$0xff]   ;;  %v8129_v44 = vld [vmem:[#allocation17 + $0x240] ss:$28 sps:$4 sm:$0xff]  }
 0x55d   :  { %5977 = vmatpush1.bf16.msra.mxu0 %v8067_v45  ;;  %6149 = vmatpush1.bf16.msra.mxu1 %v8070_v47  ;;  %v8133_v45 = vld [vmem:[#allocation17 + $0x408] ss:$28 sps:$4 sm:$0xff]   ;;  %v8136_v47 = vld [vmem:[#allocation17 + $0x27c] ss:$28 sps:$4 sm:$0xff]  }
 0x55e   :  { %5978 = vmatprep.subr.bf16.mxu0 %v8075_v50  ;;  %6150 = vmatprep.subr.bf16.mxu1 %v8078_v51  ;;  %v8137_v50 = vld [vmem:[#allocation17 + $0x600] ss:$28 sps:$4 sm:$0xff]   ;;  %v8134_v51 = vld [vmem:[#allocation17 + $0x278] ss:$28 sps:$4 sm:$0xff]  }
 0x561   :  { %5979 = vmatpush1.bf16.msra.mxu0 %v8073_v52  ;;  %6151 = vmatpush1.bf16.msra.mxu1 %v8076_v4  ;;  %v8138_v52 = vld [vmem:[#allocation17 + $0x440] ss:$28 sps:$4 sm:$0xff]   ;;  %v8141_v4 = vld [vmem:[#allocation17 + $0x2b4] ss:$28 sps:$4 sm:$0xff]  }
 0x562   :  { %6163 = vmatprep.subr.bf16.mxu0 %v8081_v37  ;;  %7351 = vmatprep.subr.bf16.mxu1 %v8082_v15  ;;  %v8142_v37 = vld [vmem:[#allocation17 + $0x638] ss:$28 sps:$4 sm:$0xff]   ;;  %v8139_v15 = vld [vmem:[#allocation17 + $0x2b0] ss:$28 sps:$4 sm:$0xff]  }
 0x564   :  { %5981 = vmatmul.mubr.bf16.vlgmr.msra.gmra.mrb[12].mxu0 %v8984_v23  ;;  %6153 = vmatmul.mubr.bf16.vlgmr.msra.gmra.mrb[20].mxu1 %v8984_v23 }
 0x565   :  { %6164 = vmatpush1.bf16.msra.mxu0 %v8079_v53  ;;  %6195 = vmatprep.mubr.bf16.mxu0 %v8953_v16  ;;  %v8143_v53 = vld [vmem:[#allocation17 + $0x478] ss:$28 sps:$4 sm:$0xff]  }
 0x566   :  { %7352 = vmatpush3.bf16.msra.mxu1 %v8083_v55  ;;  %6367 = vmatprep.mubr.bf16.mxu1 %v8953_v16  ;;  %v8102_v16 = vld [vmem:[#allocation17 + $0x2b8] ss:$28 sps:$4 sm:$0xff]   ;;  %v8146_v55 = vld [vmem:[#allocation17 + $0x2ec] ss:$28 sps:$4 sm:$0xff]  }
 0x567   :  { %6165 = vmatprep.subr.bf16.mxu0 %v8086_v56  ;;  %7353 = vmatprep.subr.bf16.mxu1 %v8087_v57  ;;  %v8147_v56 = vld [vmem:[#allocation17 + $0x670] ss:$28 sps:$4 sm:$0xff]   ;;  %v8144_v57 = vld [vmem:[#allocation17 + $0x2e8] ss:$28 sps:$4 sm:$0xff]  }
 0x569   :  { %6166 = vmatpush1.bf16.msra.mxu0 %v8084_v58  ;;  %v8148_v58 = vld [vmem:[#allocation17 + $0x4b0] ss:$28 sps:$4 sm:$0xff]  }
 0x56a   :  { %7354 = vmatpush3.bf16.msra.mxu1 %v8088_v38  ;;  %6167 = vmatprep.subr.bf16.mxu0 %v8091_v9  ;;  %v8151_v38 = vld [vmem:[#allocation17 + $0x324] ss:$28 sps:$4 sm:$0xff]  }
 0x56b   :  { %7355 = vmatprep.subr.bf16.mxu1 %v8092_v60  ;;  %v8152_v9 = vld [vmem:[#allocation17 + $0x6a8] ss:$28 sps:$4 sm:$0xff]   ;;  %v8149_v60 = vld [vmem:[#allocation17 + $0x320] ss:$28 sps:$4 sm:$0xff]  }
 0x56d   :  { %6168 = vmatpush1.bf16.msra.mxu0 %v8089_v61  ;;  %v8153_v61 = vld [vmem:[#allocation17 + $0x4e8] ss:$28 sps:$4 sm:$0xff]  }
 0x56e   :  { %7356 = vmatpush3.bf16.msra.mxu1 %v8093_v62  ;;  %6169 = vmatprep.subr.bf16.mxu0 %v8096_v0  ;;  %v8156_v62 = vld [vmem:[#allocation17 + $0x35c] ss:$28 sps:$4 sm:$0xff]  }
 0x56f   :  { %7357 = vmatprep.subr.bf16.mxu1 %v8097_v41  ;;  %v8157_v0 = vld [vmem:[#allocation17 + $0x6e0] ss:$28 sps:$4 sm:$0xff]   ;;  %v8154_v41 = vld [vmem:[#allocation17 + $0x358] ss:$28 sps:$4 sm:$0xff]  }
 0x571   :  { %6170 = vmatpush1.bf16.msra.mxu0 %v8094_v42  ;;  %v8158_v42 = vld [vmem:[#allocation17 + $0x520] ss:$28 sps:$4 sm:$0xff]  }
 0x572   :  { %7358 = vmatpush3.bf16.msra.mxu1 %v8098_v43  ;;  %6171 = vmatprep.subr.bf16.mxu0 %v8101_v46  ;;  %v8161_v43 = vld [vmem:[#allocation17 + $0x394] ss:$28 sps:$4 sm:$0xff]  }
 0x573   :  { %7359 = vmatprep.subr.bf16.mxu1 %v8102_v16  ;;  %v8162_v46 = vld [vmem:[#allocation17 + $0x8d8] ss:$28 sps:$4 sm:$0xff]   ;;  %v8159_v16 = vld [vmem:[#allocation17 + $0x390] ss:$28 sps:$4 sm:$0xff]  }
 0x575   :  { %6172 = vmatpush1.bf16.msra.mxu0 %v8099_v48  ;;  %v8163_v48 = vld [vmem:[#allocation17 + $0x718] ss:$28 sps:$4 sm:$0xff]  }
 0x576   :  { %7360 = vmatpush3.bf16.msra.mxu1 %v8103_v49  ;;  %6173 = vmatprep.subr.bf16.mxu0 %v8106_v1  ;;  %v8166_v49 = vld [vmem:[#allocation17 + $0x3cc] ss:$28 sps:$4 sm:$0xff]  }
 0x577   :  { %7361 = vmatprep.subr.bf16.mxu1 %v8107_v2  ;;  %v8167_v1 = vld [vmem:[#allocation17 + $0x910] ss:$28 sps:$4 sm:$0xff]   ;;  %v8164_v2 = vld [vmem:[#allocation17 + $0x3c8] ss:$28 sps:$4 sm:$0xff]  }
 0x579   :  { %6174 = vmatpush1.bf16.msra.mxu0 %v8104_v3  ;;  %v8168_v3 = vld [vmem:[#allocation17 + $0x750] ss:$28 sps:$4 sm:$0xff]  }
 0x57a   :  { %7362 = vmatpush3.bf16.msra.mxu1 %v8108_v5  ;;  %6175 = vmatprep.subr.bf16.mxu0 %v8111_v6  ;;  %v8171_v5 = vld [vmem:[#allocation17 + $0x404] ss:$28 sps:$4 sm:$0xff]  }
 0x57b   :  { %7363 = vmatprep.subr.bf16.mxu1 %v8112_v7  ;;  %v8172_v6 = vld [vmem:[#allocation17 + $0x948] ss:$28 sps:$4 sm:$0xff]   ;;  %v8169_v7 = vld [vmem:[#allocation17 + $0x400] ss:$28 sps:$4 sm:$0xff]  }
 0x57d   :  { %6176 = vmatpush1.bf16.msra.mxu0 %v8109_v8  ;;  %v8176_v8 = vld [vmem:[#allocation17 + $0x43c] ss:$28 sps:$4 sm:$0xff]  }
 0x57e   :  { %7364 = vmatpush3.bf16.msra.mxu1 %v8113_v13  ;;  %6177 = vmatprep.subr.bf16.mxu0 %v8116_v14  ;;  %v8177_v13 = vld [vmem:[#allocation17 + $0x980] ss:$28 sps:$4 sm:$0xff]   ;;  %v8174_v14 = vld [vmem:[#allocation17 + $0x438] ss:$28 sps:$4 sm:$0xff]  }
 0x57f   :  { %7365 = vmatprep.subr.bf16.mxu1 %v8117_v19  ;;  %v8181_v19 = vld [vmem:[#allocation17 + $0x474] ss:$28 sps:$4 sm:$0xff]  }
 0x581   :  { %6178 = vmatpush1.bf16.msra.mxu0 %v8114_v20  ;;  %v8182_v20 = vld [vmem:[#allocation17 + $0x9b8] ss:$28 sps:$4 sm:$0xff]  }
 0x582   :  { %7366 = vmatpush3.bf16.msra.mxu1 %v8118_v22  ;;  %6179 = vmatprep.subr.bf16.mxu0 %v8121_v27  ;;  %v8179_v22 = vld [vmem:[#allocation17 + $0x470] ss:$28 sps:$4 sm:$0xff]   ;;  %v8183_v27 = vld [vmem:[#allocation17 + $0x7f8] ss:$28 sps:$4 sm:$0xff]  }
 0x583   :  { %7373 = vmatprep.subr.bf16.mxu1 %v8122_v28  ;;  %v8186_v28 = vld [vmem:[#allocation17 + $0x4ac] ss:$28 sps:$4 sm:$0xff]  }
 0x585   :  { %6368 = vmatmul.mubr.bf16.vlgmr.msra.gmra.mrb[24].mxu1 %v8949_v11  ;;  %6180 = vmatpush1.bf16.msra.mxu0 %v8119_v30  ;;  %v8187_v30 = vld [vmem:[#allocation17 + $0x9f0] ss:$28 sps:$4 sm:$0xff]  }
 0x586   :  { %7374 = vmatpush3.bf16.msra.mxu1 %v8123_v31  ;;  %6408 = vmatprep.mubr.bf16.mxu1 %v8955_v17  ;;  %v8184_v31 = vld [vmem:[#allocation17 + $0x4a8] ss:$28 sps:$4 sm:$0xff]  }
 0x587   :  { %6181 = vmatprep.subr.bf16.mxu0 %v8126_v32  ;;  %7375 = vmatprep.subr.bf16.mxu1 %v8127_v34  ;;  %v8188_v32 = vld [vmem:[#allocation17 + $0x830] ss:$28 sps:$4 sm:$0xff]   ;;  %v8191_v34 = vld [vmem:[#allocation17 + $0x4e4] ss:$28 sps:$4 sm:$0xff]  }
 0x589   :  { %6182 = vmatpush1.bf16.msra.mxu0 %v8124_v39  ;;  %v8192_v39 = vld [vmem:[#allocation17 + $0xa28] ss:$28 sps:$4 sm:$0xff]  }
 0x58a   :  { %7376 = vmatpush3.bf16.msra.mxu1 %v8128_v35  ;;  %6183 = vmatprep.subr.bf16.mxu0 %v8131_v36  ;;  %v8189_v35 = vld [vmem:[#allocation17 + $0x4e0] ss:$28 sps:$4 sm:$0xff]   ;;  %v8193_v36 = vld [vmem:[#allocation17 + $0x868] ss:$28 sps:$4 sm:$0xff]  }
 0x58b   :  { %7377 = vmatprep.subr.bf16.mxu1 %v8132_v40  ;;  %v8196_v40 = vld [vmem:[#allocation17 + $0x51c] ss:$28 sps:$4 sm:$0xff]  }
 0x58d   :  { %6184 = vmatpush1.bf16.msra.mxu0 %v8129_v44  ;;  %v8197_v44 = vld [vmem:[#allocation17 + $0xa60] ss:$28 sps:$4 sm:$0xff]  }
 0x58e   :  { %7378 = vmatpush3.bf16.msra.mxu1 %v8133_v45  ;;  %6185 = vmatprep.subr.bf16.mxu0 %v8136_v47  ;;  %v8194_v45 = vld [vmem:[#allocation17 + $0x518] ss:$28 sps:$4 sm:$0xff]   ;;  %v8198_v47 = vld [vmem:[#allocation17 + $0x8a0] ss:$28 sps:$4 sm:$0xff]  }
 0x58f   :  { %7379 = vmatprep.subr.bf16.mxu1 %v8137_v50  ;;  %v8201_v50 = vld [vmem:[#allocation17 + $0x554] ss:$28 sps:$4 sm:$0xff]  }
 0x591   :  { %6186 = vmatpush1.bf16.msra.mxu0 %v8134_v51  ;;  %v8202_v51 = vld [vmem:[#allocation17 + $0xc58] ss:$28 sps:$4 sm:$0xff]  }
 0x592   :  { %7380 = vmatpush3.bf16.msra.mxu1 %v8138_v52  ;;  %6187 = vmatprep.subr.bf16.mxu0 %v8141_v4  ;;  %v8199_v52 = vld [vmem:[#allocation17 + $0x550] ss:$28 sps:$4 sm:$0xff]   ;;  %v8203_v4 = vld [vmem:[#allocation17 + $0xa98] ss:$28 sps:$4 sm:$0xff]  }
 0x593   :  { %7381 = vmatprep.subr.bf16.mxu1 %v8142_v37  ;;  %v8206_v37 = vld [vmem:[#allocation17 + $0x58c] ss:$28 sps:$4 sm:$0xff]  }
 0x595   :  { %6188 = vmatpush1.bf16.msra.mxu0 %v8139_v15  ;;  %v8207_v15 = vld [vmem:[#allocation17 + $0xc90] ss:$28 sps:$4 sm:$0xff]  }
 0x596   :  { %7382 = vmatpush3.bf16.msra.mxu1 %v8143_v53  ;;  %6189 = vmatprep.subr.bf16.mxu0 %v8146_v55  ;;  %v8204_v53 = vld [vmem:[#allocation17 + $0x588] ss:$28 sps:$4 sm:$0xff]   ;;  %v8208_v55 = vld [vmem:[#allocation17 + $0xad0] ss:$28 sps:$4 sm:$0xff]  }
 0x597   :  { %7383 = vmatprep.subr.bf16.mxu1 %v8147_v56  ;;  %v8211_v56 = vld [vmem:[#allocation17 + $0x5c4] ss:$28 sps:$4 sm:$0xff]  }
 0x599   :  { %6190 = vmatpush1.bf16.msra.mxu0 %v8144_v57  ;;  %v8212_v57 = vld [vmem:[#allocation17 + $0xcc8] ss:$28 sps:$4 sm:$0xff]  }
 0x59a   :  { %7384 = vmatpush3.bf16.msra.mxu1 %v8148_v58  ;;  %6191 = vmatprep.subr.bf16.mxu0 %v8151_v38  ;;  %v8209_v58 = vld [vmem:[#allocation17 + $0x5c0] ss:$28 sps:$4 sm:$0xff]   ;;  %v8213_v38 = vld [vmem:[#allocation17 + $0xb08] ss:$28 sps:$4 sm:$0xff]  }
 0x59b   :  { %7385 = vmatprep.subr.bf16.mxu1 %v8152_v9  ;;  %v8216_v9 = vld [vmem:[#allocation17 + $0x5fc] ss:$28 sps:$4 sm:$0xff]  }
 0x59d   :  { %6192 = vmatpush1.bf16.msra.mxu0 %v8149_v60  ;;  %v8217_v60 = vld [vmem:[#allocation17 + $0xd00] ss:$28 sps:$4 sm:$0xff]  }
 0x59e   :  { %7386 = vmatpush3.bf16.msra.mxu1 %v8153_v61  ;;  %6193 = vmatprep.subr.bf16.mxu0 %v8156_v62  ;;  %v8214_v61 = vld [vmem:[#allocation17 + $0x5f8] ss:$28 sps:$4 sm:$0xff]   ;;  %v8218_v62 = vld [vmem:[#allocation17 + $0xb40] ss:$28 sps:$4 sm:$0xff]  }
 0x59f   :  { %7387 = vmatprep.subr.bf16.mxu1 %v8157_v0  ;;  %v8221_v0 = vld [vmem:[#allocation17 + $0x634] ss:$28 sps:$4 sm:$0xff]  }
 0x5a1   :  { %6194 = vmatpush1.bf16.msra.mxu0 %v8154_v41  ;;  %v8222_v41 = vld [vmem:[#allocation17 + $0xd38] ss:$28 sps:$4 sm:$0xff]  }
 0x5a2   :  { %7388 = vmatpush3.bf16.msra.mxu1 %v8158_v42  ;;  %6206 = vmatprep.subr.bf16.mxu0 %v8161_v43  ;;  %v8219_v42 = vld [vmem:[#allocation17 + $0x630] ss:$28 sps:$4 sm:$0xff]   ;;  %v8223_v43 = vld [vmem:[#allocation17 + $0xb78] ss:$28 sps:$4 sm:$0xff]  }
 0x5a3   :  { %7395 = vmatprep.subr.bf16.mxu1 %v8162_v46  ;;  %v8226_v46 = vld [vmem:[#allocation17 + $0x66c] ss:$28 sps:$4 sm:$0xff]  }
 0x5a4   :  { %6196 = vmatmul.mubr.bf16.vlgmr.msra.gmra.mrb[16].mxu0 %v8949_v11  ;;  %v8173_v11 = vld [vmem:[#allocation17 + $0x788] ss:$28 sps:$4 sm:$0xff]  }
 0x5a5   :  { %6409 = vmatmul.mubr.bf16.vlgmr.msra.gmra.mrb[28].mxu1 %v8951_v12  ;;  %6207 = vmatpush1.bf16.msra.mxu0 %v8159_v16  ;;  %v8227_v16 = vld [vmem:[#allocation17 + $0xd70] ss:$28 sps:$4 sm:$0xff]  }
 0x5a6   :  { %6238 = vmatprep.mubr.bf16.mxu0 %v8955_v17  ;;  %7396 = vmatpush3.bf16.msra.mxu1 %v8163_v48  ;;  %v8178_v17 = vld [vmem:[#allocation17 + $0x7c0] ss:$28 sps:$4 sm:$0xff]   ;;  %v8224_v48 = vld [vmem:[#allocation17 + $0x668] ss:$28 sps:$4 sm:$0xff]  }
 0x5a7   :  { %6449 = vmatprep.mubr.bf16.mxu1 %v8987_v29  ;;  %6208 = vmatprep.subr.bf16.mxu0 %v8166_v49  ;;  %v8228_v49 = vld [vmem:[#allocation17 + $0xbb0] ss:$28 sps:$4 sm:$0xff]  }
 0x5a8   :  { %7397 = vmatprep.subr.bf16.mxu1 %v8167_v1  ;;  %v8231_v1 = vld [vmem:[#allocation17 + $0x6a4] ss:$28 sps:$4 sm:$0xff]  }
 0x5a9   :  { %6209 = vmatpush1.bf16.msra.mxu0 %v8164_v2  ;;  %v8232_v2 = vld [vmem:[#allocation17 + $0xda8] ss:$28 sps:$4 sm:$0xff]  }
 0x5aa   :  { %7398 = vmatpush3.bf16.msra.mxu1 %v8168_v3  ;;  %6210 = vmatprep.subr.bf16.mxu0 %v8171_v5  ;;  %v8229_v3 = vld [vmem:[#allocation17 + $0x6a0] ss:$28 sps:$4 sm:$0xff]   ;;  %v8233_v5 = vld [vmem:[#allocation17 + $0xbe8] ss:$28 sps:$4 sm:$0xff]  }
 0x5ab   :  { %7399 = vmatprep.subr.bf16.mxu1 %v8172_v6  ;;  %v8236_v6 = vld [vmem:[#allocation17 + $0x6dc] ss:$28 sps:$4 sm:$0xff]  }
 0x5ad   :  { %6211 = vmatpush1.bf16.msra.mxu0 %v8169_v7  ;;  %v8237_v7 = vld [vmem:[#allocation17 + $0xde0] ss:$28 sps:$4 sm:$0xff]  }
 0x5ae   :  { %7400 = vmatpush3.bf16.msra.mxu1 %v8173_v11  ;;  %6212 = vmatprep.subr.bf16.mxu0 %v8176_v8  ;;  %v8234_v11 = vld [vmem:[#allocation17 + $0x6d8] ss:$28 sps:$4 sm:$0xff]   ;;  %v8238_v8 = vld [vmem:[#allocation17 + $0xc20] ss:$28 sps:$4 sm:$0xff]  }
 0x5af   :  { %7401 = vmatprep.subr.bf16.mxu1 %v8177_v13  ;;  %v8241_v13 = vld [vmem:[#allocation17 + $0x714] ss:$28 sps:$4 sm:$0xff]  }
 0x5b1   :  { %6213 = vmatpush1.bf16.msra.mxu0 %v8174_v14  ;;  %v8239_v14 = vld [vmem:[#allocation17 + $0x710] ss:$28 sps:$4 sm:$0xff]  }
 0x5b2   :  { %7402 = vmatpush3.bf16.msra.mxu1 %v8178_v17  ;;  %6214 = vmatprep.subr.bf16.mxu0 %v8181_v19  ;;  %v8244_v17 = vld [vmem:[#allocation17 + $0x74c] ss:$28 sps:$4 sm:$0xff]  }
 0x5b3   :  { %7403 = vmatprep.subr.bf16.mxu1 %v8182_v20  ;;  %v8242_v19 = vld [vmem:[#allocation17 + $0x748] ss:$28 sps:$4 sm:$0xff]  }
 0x5b4   :  { %v8247_v20 = vld [vmem:[#allocation17 + $0x784] ss:$28 sps:$4 sm:$0xff]  }
 0x5b5   :  { %6215 = vmatpush1.bf16.msra.mxu0 %v8179_v22  ;;  %v8245_v22 = vld [vmem:[#allocation17 + $0x780] ss:$28 sps:$4 sm:$0xff]  }
 0x5b6   :  { %7404 = vmatpush3.bf16.msra.mxu1 %v8183_v27  ;;  %6216 = vmatprep.subr.bf16.mxu0 %v8186_v28  ;;  %v8250_v27 = vld [vmem:[#allocation17 + $0x7bc] ss:$28 sps:$4 sm:$0xff]  }
 0x5b7   :  { %7405 = vmatprep.subr.bf16.mxu1 %v8187_v30  ;;  %v8248_v28 = vld [vmem:[#allocation17 + $0x7b8] ss:$28 sps:$4 sm:$0xff]  }
 0x5b8   :  { %v8253_v30 = vld [vmem:[#allocation17 + $0x7f4] ss:$28 sps:$4 sm:$0xff]  }
 0x5b9   :  { %6217 = vmatpush1.bf16.msra.mxu0 %v8184_v31  ;;  %v8251_v31 = vld [vmem:[#allocation17 + $0x7f0] ss:$28 sps:$4 sm:$0xff]  }
 0x5ba   :  { %7406 = vmatpush3.bf16.msra.mxu1 %v8188_v32  ;;  %6218 = vmatprep.subr.bf16.mxu0 %v8191_v34  ;;  %v8254_v32 = vld [vmem:[#allocation17 + $0x828] ss:$28 sps:$4 sm:$0xff]  }
 0x5bb   :  { %7407 = vmatprep.subr.bf16.mxu1 %v8192_v39  ;;  %v8259_v34 = vld [vmem:[#allocation17 + $0x864] ss:$28 sps:$4 sm:$0xff]   ;;  %v8262_v39 = vld [vmem:[#allocation17 + $0x89c] ss:$28 sps:$4 sm:$0xff]  }
 0x5bd   :  { %6219 = vmatpush1.bf16.msra.mxu0 %v8189_v35  ;;  %v8260_v35 = vld [vmem:[#allocation17 + $0x898] ss:$28 sps:$4 sm:$0xff]  }
 0x5be   :  { %7408 = vmatpush3.bf16.msra.mxu1 %v8193_v36  ;;  %6220 = vmatprep.subr.bf16.mxu0 %v8196_v40  ;;  %v8265_v36 = vld [vmem:[#allocation17 + $0x8d4] ss:$28 sps:$4 sm:$0xff]  }
 0x5bf   :  { %7409 = vmatprep.subr.bf16.mxu1 %v8197_v44  ;;  %v8263_v40 = vld [vmem:[#allocation17 + $0x8d0] ss:$28 sps:$4 sm:$0xff]  }
 0x5c0   :  { %v8268_v44 = vld [vmem:[#allocation17 + $0x90c] ss:$28 sps:$4 sm:$0xff]  }
 0x5c1   :  { %6221 = vmatpush1.bf16.msra.mxu0 %v8194_v45  ;;  %v8266_v45 = vld [vmem:[#allocation17 + $0x908] ss:$28 sps:$4 sm:$0xff]  }
 0x5c2   :  { %7410 = vmatpush3.bf16.msra.mxu1 %v8198_v47  ;;  %6222 = vmatprep.subr.bf16.mxu0 %v8201_v50  ;;  %v8271_v47 = vld [vmem:[#allocation17 + $0x944] ss:$28 sps:$4 sm:$0xff]  }
 0x5c3   :  { %7417 = vmatprep.subr.bf16.mxu1 %v8202_v51  ;;  %v8269_v50 = vld [vmem:[#allocation17 + $0x940] ss:$28 sps:$4 sm:$0xff]  }
 0x5c4   :  { %v8274_v51 = vld [vmem:[#allocation17 + $0x97c] ss:$28 sps:$4 sm:$0xff]  }
 0x5c5   :  { %6450 = vmatmul.mubr.bf16.vlgmr.msra.gmra.mrb[32].mxu1 %v8980_v10  ;;  %6223 = vmatpush1.bf16.msra.mxu0 %v8199_v52  ;;  %v8272_v52 = vld [vmem:[#allocation17 + $0x978] ss:$28 sps:$4 sm:$0xff]  }
 0x5c6   :  { %7418 = vmatpush3.bf16.msra.mxu1 %v8203_v4  ;;  %6490 = vmatprep.mubr.bf16.mxu1 %v8989_v33  ;;  %v8277_v4 = vld [vmem:[#allocation17 + $0x9b4] ss:$28 sps:$4 sm:$0xff]  }
 0x5c7   :  { %6224 = vmatprep.subr.bf16.mxu0 %v8206_v37  ;;  %7419 = vmatprep.subr.bf16.mxu1 %v8207_v15  ;;  %v8275_v37 = vld [vmem:[#allocation17 + $0x9b0] ss:$28 sps:$4 sm:$0xff]  }
 0x5c8   :  { %v8280_v15 = vld [vmem:[#allocation17 + $0x9ec] ss:$28 sps:$4 sm:$0xff]  }
 0x5c9   :  { %6225 = vmatpush1.bf16.msra.mxu0 %v8204_v53  ;;  %v8278_v53 = vld [vmem:[#allocation17 + $0x9e8] ss:$28 sps:$4 sm:$0xff]  }
 0x5ca   :  { %7420 = vmatpush3.bf16.msra.mxu1 %v8208_v55  ;;  %6226 = vmatprep.subr.bf16.mxu0 %v8211_v56  ;;  %v8283_v55 = vld [vmem:[#allocation17 + $0xa24] ss:$28 sps:$4 sm:$0xff]  }
 0x5cb   :  { %7421 = vmatprep.subr.bf16.mxu1 %v8212_v57  ;;  %v8281_v56 = vld [vmem:[#allocation17 + $0xa20] ss:$28 sps:$4 sm:$0xff]  }
 0x5cc   :  { %v8286_v57 = vld [vmem:[#allocation17 + $0xa5c] ss:$28 sps:$4 sm:$0xff]  }
 0x5cd   :  { %6227 = vmatpush1.bf16.msra.mxu0 %v8209_v58  ;;  %v8284_v58 = vld [vmem:[#allocation17 + $0xa58] ss:$28 sps:$4 sm:$0xff]  }
 0x5ce   :  { %7422 = vmatpush3.bf16.msra.mxu1 %v8213_v38  ;;  %6228 = vmatprep.subr.bf16.mxu0 %v8216_v9  ;;  %v8289_v38 = vld [vmem:[#allocation17 + $0xa94] ss:$28 sps:$4 sm:$0xff]  }
 0x5cf   :  { %7423 = vmatprep.subr.bf16.mxu1 %v8217_v60  ;;  %v8287_v9 = vld [vmem:[#allocation17 + $0xa90] ss:$28 sps:$4 sm:$0xff]  }
 0x5d0   :  { %v8292_v60 = vld [vmem:[#allocation17 + $0xacc] ss:$28 sps:$4 sm:$0xff]  }
 0x5d1   :  { %6229 = vmatpush1.bf16.msra.mxu0 %v8214_v61  ;;  %v8290_v61 = vld [vmem:[#allocation17 + $0xac8] ss:$28 sps:$4 sm:$0xff]  }
 0x5d2   :  { %7424 = vmatpush3.bf16.msra.mxu1 %v8218_v62  ;;  %6230 = vmatprep.subr.bf16.mxu0 %v8221_v0  ;;  %v8295_v62 = vld [vmem:[#allocation17 + $0xb04] ss:$28 sps:$4 sm:$0xff]  }
 0x5d3   :  { %7425 = vmatprep.subr.bf16.mxu1 %v8222_v41  ;;  %v8293_v0 = vld [vmem:[#allocation17 + $0xb00] ss:$28 sps:$4 sm:$0xff]  }
 0x5d4   :  { %v8298_v41 = vld [vmem:[#allocation17 + $0xb3c] ss:$28 sps:$4 sm:$0xff]  }
 0x5d5   :  { %6231 = vmatpush1.bf16.msra.mxu0 %v8219_v42  ;;  %v8296_v42 = vld [vmem:[#allocation17 + $0xb38] ss:$28 sps:$4 sm:$0xff]  }
 0x5d6   :  { %7426 = vmatpush3.bf16.msra.mxu1 %v8223_v43  ;;  %6232 = vmatprep.subr.bf16.mxu0 %v8226_v46  ;;  %v8301_v43 = vld [vmem:[#allocation17 + $0xb74] ss:$28 sps:$4 sm:$0xff]  }
 0x5d7   :  { %7427 = vmatprep.subr.bf16.mxu1 %v8227_v16  ;;  %v8299_v46 = vld [vmem:[#allocation17 + $0xb70] ss:$28 sps:$4 sm:$0xff]   ;;  %v9014_v16 = vld [vmem:[#allocation19] sm:$0xff] }
 0x5d9   :  { %6233 = vmatpush1.bf16.msra.mxu0 %v8224_v48  ;;  %v3491_v48 = vrot.slane %v9014_v16, %v8911_v18 }
 0x5da   :  { %7428 = vmatpush3.bf16.msra.mxu1 %v8228_v49  ;;  %6234 = vmatprep.subr.bf16.mxu0 %v8231_v1  ;;  %v3487_v49 = vrot.slane %v9014_v16, %v8866_v63  ;;  %v3495_v1 = vrot.slane %v9014_v16, %v8914_v21  ;;  %v8310_v21 = vld [vmem:[#allocation17 + $0xc1c] ss:$28 sps:$4 sm:$0xff]  }
 0x5db   :  { %7429 = vmatprep.subr.bf16.mxu1 %v8232_v2  ;;  %v8302_v2 = vld [vmem:[#allocation17 + $0xba8] ss:$28 sps:$4 sm:$0xff]  }
 0x5dd   :  { %6235 = vmatpush1.bf16.msra.mxu0 %v8229_v3  ;;  %v8307_v3 = vld [vmem:[#allocation17 + $0xbe4] ss:$28 sps:$4 sm:$0xff]  }
 0x5de   :  { %7430 = vmatpush3.bf16.msra.mxu1 %v8233_v5  ;;  %6236 = vmatprep.subr.bf16.mxu0 %v8236_v6 }
 0x5df   :  { %7431 = vmatprep.subr.bf16.mxu1 %v8237_v7 }
 0x5e1   :  { %6237 = vmatpush1.bf16.msra.mxu0 %v8234_v11 }
 0x5e2   :  { %7432 = vmatpush3.bf16.msra.mxu1 %v8238_v8  ;;  %6249 = vmatprep.subr.bf16.mxu0 %v8241_v13 }
 0x5e4   :  { %6239 = vmatmul.mubr.bf16.vlgmr.msra.gmra.mrb[16].mxu0 %v8951_v12  ;;  %v8256_v12 = vld [vmem:[#allocation17 + $0x82c] ss:$28 sps:$4 sm:$0xff]  }
 0x5e5   :  { %6491 = vmatmul.mubr.bf16.vlgmr.msra.gmra.mrb[36].mxu1 %v8984_v23  ;;  %6250 = vmatpush1.bf16.msra.mxu0 %v8239_v14 }
 0x5e6   :  { %6281 = vmatprep.mubr.bf16.mxu0 %v8987_v29  ;;  %6251 = vmatprep.subr.bf16.mxu0 %v8244_v17  ;;  %v8257_v29 = vld [vmem:[#allocation17 + $0x860] ss:$28 sps:$4 sm:$0xff]  }
 0x5e9   :  { %6252 = vmatpush1.bf16.msra.mxu0 %v8242_v19  ;;  %v8305_v19 = vld [vmem:[#allocation17 + $0xbe0] ss:$28 sps:$4 sm:$0xff]  }
 0x5ea   :  { %6253 = vmatprep.subr.bf16.mxu0 %v8247_v20 }
 0x5ed   :  { %6254 = vmatpush1.bf16.msra.mxu0 %v8245_v22 }
 0x5ee   :  { %6255 = vmatprep.subr.bf16.mxu0 %v8250_v27 }
 0x5f1   :  { %6256 = vmatpush1.bf16.msra.mxu0 %v8248_v28 }
 0x5f2   :  { %6257 = vmatprep.subr.bf16.mxu0 %v8253_v30 }
 0x5f5   :  { %6258 = vmatpush1.bf16.msra.mxu0 %v8251_v31  ;;  %v8308_v31 = vld [vmem:[#allocation17 + $0xc18] ss:$28 sps:$4 sm:$0xff]  }
 0x5f6   :  { %6259 = vmatprep.subr.bf16.mxu0 %v8256_v12  ;;  %v8313_v12 = vld [vmem:[#allocation17 + $0xc54] ss:$28 sps:$4 sm:$0xff]  }
 0x5f9   :  { %6260 = vmatpush1.bf16.msra.mxu0 %v8254_v32  ;;  %v8311_v32 = vld [vmem:[#allocation17 + $0xc50] ss:$28 sps:$4 sm:$0xff]  }
 0x5fa   :  { %6261 = vmatprep.subr.bf16.mxu0 %v8259_v34  ;;  %v8316_v34 = vld [vmem:[#allocation17 + $0xc8c] ss:$28 sps:$4 sm:$0xff]  }
 0x5fd   :  { %6262 = vmatpush1.bf16.msra.mxu0 %v8257_v29 }
 0x5fe   :  { %6263 = vmatprep.subr.bf16.mxu0 %v8262_v39 }
 0x601   :  { %6264 = vmatpush1.bf16.msra.mxu0 %v8260_v35  ;;  %v8314_v35 = vld [vmem:[#allocation17 + $0xc88] ss:$28 sps:$4 sm:$0xff]  }
 0x602   :  { %6265 = vmatprep.subr.bf16.mxu0 %v8265_v36 }
 0x605   :  { %6266 = vmatpush1.bf16.msra.mxu0 %v8263_v40  ;;  %v8319_v40 = vld [vmem:[#allocation17 + $0xcc4] ss:$28 sps:$4 sm:$0xff]  }
 0x606   :  { %6267 = vmatprep.subr.bf16.mxu0 %v8268_v44 }
 0x609   :  { %6268 = vmatpush1.bf16.msra.mxu0 %v8266_v45 }
 0x60a   :  { %6269 = vmatprep.subr.bf16.mxu0 %v8271_v47 }
 0x60d   :  { %6270 = vmatpush1.bf16.msra.mxu0 %v8269_v50  ;;  %v8317_v50 = vld [vmem:[#allocation17 + $0xcc0] ss:$28 sps:$4 sm:$0xff]  }
 0x60e   :  { %6271 = vmatprep.subr.bf16.mxu0 %v8274_v51 }
 0x611   :  { %6272 = vmatpush1.bf16.msra.mxu0 %v8272_v52  ;;  %v8322_v52 = vld [vmem:[#allocation17 + $0xcfc] ss:$28 sps:$4 sm:$0xff]  }
 0x612   :  { %6273 = vmatprep.subr.bf16.mxu0 %v8277_v4 }
 0x615   :  { %6274 = vmatpush1.bf16.msra.mxu0 %v8275_v37  ;;  %v8320_v37 = vld [vmem:[#allocation17 + $0xcf8] ss:$28 sps:$4 sm:$0xff]  }
 0x616   :  { %6275 = vmatprep.subr.bf16.mxu0 %v8280_v15  ;;  %v8325_v15 = vld [vmem:[#allocation17 + $0xd34] ss:$28 sps:$4 sm:$0xff]  }
 0x619   :  { %6276 = vmatpush1.bf16.msra.mxu0 %v8278_v53  ;;  %v8323_v53 = vld [vmem:[#allocation17 + $0xd30] ss:$28 sps:$4 sm:$0xff]  }
 0x61a   :  { %6277 = vmatprep.subr.bf16.mxu0 %v8283_v55  ;;  %v8328_v55 = vld [vmem:[#allocation17 + $0xd6c] ss:$28 sps:$4 sm:$0xff]  }
 0x61d   :  { %6278 = vmatpush1.bf16.msra.mxu0 %v8281_v56  ;;  %v8326_v56 = vld [vmem:[#allocation17 + $0xd68] ss:$28 sps:$4 sm:$0xff]  }
 0x61e   :  { %6279 = vmatprep.subr.bf16.mxu0 %v8286_v57  ;;  %v8331_v57 = vld [vmem:[#allocation17 + $0xda4] ss:$28 sps:$4 sm:$0xff]  }
 0x621   :  { %6280 = vmatpush1.bf16.msra.mxu0 %v8284_v58 }
 0x622   :  { %6292 = vmatprep.subr.bf16.mxu0 %v8289_v38 }
 0x624   :  { %6282 = vmatmul.mubr.bf16.vlgmr.msra.gmra.mrb[16].mxu0 %v8980_v10  ;;  %v8304_v10 = vld [vmem:[#allocation17 + $0xbac] ss:$28 sps:$4 sm:$0xff]  }
 0x625   :  { %6293 = vmatpush1.bf16.msra.mxu0 %v8287_v9  ;;  %6324 = vmatprep.mubr.bf16.mxu0 %v8989_v33  ;;  %v3483_v33 = vrot.slane %v9014_v16, %v8863_v59  ;;  %v8329_v9 = vld [vmem:[#allocation17 + $0xda0] ss:$28 sps:$4 sm:$0xff]  }
 0x626   :  { %6294 = vmatprep.subr.bf16.mxu0 %v8292_v60 }
 0x629   :  { %6295 = vmatpush1.bf16.msra.mxu0 %v8290_v61 }
 0x62a   :  { %6296 = vmatprep.subr.bf16.mxu0 %v8295_v62  ;;  %v8334_v62 = vld [vmem:[#allocation17 + $0xddc] ss:$28 sps:$4 sm:$0xff]  }
 0x62d   :  { %6297 = vmatpush1.bf16.msra.mxu0 %v8293_v0 }
 0x62e   :  { %6298 = vmatprep.subr.bf16.mxu0 %v8298_v41 }
 0x631   :  { %6299 = vmatpush1.bf16.msra.mxu0 %v8296_v42  ;;  %v8332_v42 = vld [vmem:[#allocation17 + $0xdd8] ss:$28 sps:$4 sm:$0xff]  }
 0x632   :  { %6300 = vmatprep.subr.bf16.mxu0 %v8301_v43  ;;  %v3507_v43 = vrot.slane %v9014_v16, %v1272_v25 }
 0x635   :  { %6301 = vmatpush1.bf16.msra.mxu0 %v8299_v46 }
 0x636   :  { %6302 = vmatprep.subr.bf16.mxu0 %v8304_v10 }
 0x637   :  { %v5982_v5 = vpop.f32.mrb[12].mxu0  ;;  %v6154_v6 = vpop.f32.mrb[20].mxu1 }
 0x638   :  { %v7475_v7 = vadd.f32 %v5982_v5, %v3483_v33  ;;  %v7479_v11 = vadd.f32 %v6154_v6, %v3491_v48  ;;  %v5984_v8 = vpop.f32.mrb[13].mxu0  ;;  %v6156_v13 = vpop.f32.mrb[21].mxu1 }
 0x639   :  { %v7476_v59 = vadd.f32 %v5984_v8, %v3487_v49  ;;  %v7480_v14 = vadd.f32 %v6156_v13, %v3495_v1  ;;  %v5986_v17 = vpop.f32.mrb[14].mxu0  ;;  %v6158_v18 = vpop.f32.mrb[22].mxu1  ;;  %6303 = vmatpush1.bf16.msra.mxu0 %v8302_v2 }
 0x63a   :  { %8335 = vtanh.f32 %v7475_v7  ;;  %v7477_v63 = vadd.f32 %v5986_v17, %v3483_v33  ;;  %v5988_v20 = vpop.f32.mrb[15].mxu0  ;;  %v6160_v22 = vpop.f32.mrb[23].mxu1  ;;  %6304 = vmatprep.subr.bf16.mxu0 %v8307_v3  ;;  %v7481_v27 = vadd.f32 %v6158_v18, %v3491_v48 }
 0x63b   :  { %8337 = vtanh.f32 %v7479_v11  ;;  %v7478_v28 = vadd.f32 %v5988_v20, %v3487_v49  ;;  %v7482_v30 = vadd.f32 %v6160_v22, %v3495_v1 }
 0x63c   :  { %8339 = vtanh.f32 %v7476_v59 }
 0x63d   :  { %8341 = vtanh.f32 %v7480_v14  ;;  %6305 = vmatpush1.bf16.msra.mxu0 %v8305_v19 }
 0x63e   :  { %8343 = vtanh.f32 %v7477_v63  ;;  %6306 = vmatprep.subr.bf16.mxu0 %v8310_v21 }
 0x63f   :  { %8345 = vtanh.f32 %v7481_v27 }
 0x640   :  { %8347 = vtanh.f32 %v7478_v28 }
 0x641   :  { %8349 = vtanh.f32 %v7482_v30  ;;  %6307 = vmatpush1.bf16.msra.mxu0 %v8308_v31  ;;  %v3499_v31 = vrot.slane %v9014_v16, %v1264_v24 }
 0x642   :  { %6308 = vmatprep.subr.bf16.mxu0 %v8313_v12  ;;  %v3503_v12 = vrot.slane %v9014_v16, %v1268_v26 }
 0x644   :  { %v8336_v29 = vpop.eup %8335 }
 0x645   :  { %v8338_v39 = vpop.eup %8337  ;;  %6513 = vst [vmem:[#allocation20] sm:$0xff] %v8336_v29  ;;  %6309 = vmatpush1.bf16.msra.mxu0 %v8311_v32 }
 0x646   :  { %v8340_v36 = vpop.eup %8339  ;;  %6515 = vst [vmem:[#allocation20 + $0x10] sm:$0xff] %v8338_v39  ;;  %6310 = vmatprep.subr.bf16.mxu0 %v8316_v34 }
 0x647   :  { %v8342_v44 = vpop.eup %8341  ;;  %6514 = vst [vmem:[#allocation20 + $0x8] sm:$0xff] %v8340_v36 }
 0x648   :  { %v8344_v45 = vpop.eup %8343  ;;  %6516 = vst [vmem:[#allocation20 + $0x18] sm:$0xff] %v8342_v44 }
 0x649   :  { %v8346_v47 = vpop.eup %8345  ;;  %6520 = vst [vmem:[#allocation20 + $0x38] sm:$0xff] %v8344_v45  ;;  %6311 = vmatpush1.bf16.msra.mxu0 %v8314_v35 }
 0x64a   :  { %v8348_v51 = vpop.eup %8347  ;;  %6522 = vst [vmem:[#allocation20 + $0x48] sm:$0xff] %v8346_v47  ;;  %6312 = vmatprep.subr.bf16.mxu0 %v8319_v40 }
 0x64b   :  { %v8350_v4 = vpop.eup %8349  ;;  %6521 = vst [vmem:[#allocation20 + $0x40] sm:$0xff] %v8348_v51 }
 0x64c   :  { %6523 = vst [vmem:[#allocation20 + $0x50] sm:$0xff] %v8350_v4 }
 0x64d   :  { %6313 = vmatpush1.bf16.msra.mxu0 %v8317_v50 }
 0x64e   :  { %6314 = vmatprep.subr.bf16.mxu0 %v8322_v52 }
 0x651   :  { %6315 = vmatpush1.bf16.msra.mxu0 %v8320_v37 }
 0x652   :  { %6316 = vmatprep.subr.bf16.mxu0 %v8325_v15 }
 0x655   :  { %6317 = vmatpush1.bf16.msra.mxu0 %v8323_v53 }
 0x656   :  { %6318 = vmatprep.subr.bf16.mxu0 %v8328_v55 }
 0x658   :  { %v7367_v58 = vpop.f32.mrb[24].mxu1 }
 0x659   :  { %v7368_v38 = vpop.f32.mrb[25].mxu1  ;;  %6319 = vmatpush1.bf16.msra.mxu0 %v8326_v56 }
 0x65a   :  { %v7369_v60 = vadd.f32 %v7368_v38, %v7367_v58  ;;  %v7370_v61 = vpop.f32.mrb[26].mxu1  ;;  %6320 = vmatprep.subr.bf16.mxu0 %v8331_v57 }
 0x65b   :  { %v7371_v0 = vpop.f32.mrb[27].mxu1 }
 0x65c   :  { %v7372_v41 = vadd.f32 %v7371_v0, %v7370_v61  ;;  %v6370_v33 = vadd.f32 %v7369_v60, %v3507_v43 }
 0x65d   :  { %6321 = vmatpush1.bf16.msra.mxu0 %v8329_v9 }
 0x65e   :  { %6322 = vmatprep.subr.bf16.mxu0 %v8334_v62  ;;  %v6373_v2 = vadd.f32 %v7372_v41, %v3507_v43 }
 0x661   :  { %6323 = vmatpush1.bf16.msra.mxu0 %v8332_v42 }
 0x664   :  { %6325 = vmatmul.mubr.bf16.vlgmr.msra.gmra.mrb[16].mxu0 %v8984_v23 }
 0x678   :  { %v7389_v46 = vpop.f32.mrb[28].mxu1 }
 0x679   :  { %v7390_v10 = vpop.f32.mrb[29].mxu1 }
 0x67a   :  { %v7391_v48 = vadd.f32 %v7390_v10, %v7389_v46  ;;  %v7392_v49 = vpop.f32.mrb[30].mxu1 }
 0x67b   :  { %v7393_v1 = vpop.f32.mrb[31].mxu1 }
 0x67c   :  { %v6411_v3 = vadd.f32 %v7391_v48, %v6370_v33  ;;  %v7394_v5 = vadd.f32 %v7393_v1, %v7392_v49 }
 0x67e   :  { %v6414_v6 = vadd.f32 %v7394_v5, %v6373_v2 }
 0x698   :  { %v7411_v7 = vpop.f32.mrb[32].mxu1 }
 0x699   :  { %v7412_v11 = vpop.f32.mrb[33].mxu1 }
 0x69a   :  { %v7413_v8 = vadd.f32 %v7412_v11, %v7411_v7  ;;  %v7414_v13 = vpop.f32.mrb[34].mxu1 }
 0x69b   :  { %v7415_v59 = vpop.f32.mrb[35].mxu1 }
 0x69c   :  { %v6452_v23 = vadd.f32 %v7413_v8, %v6411_v3  ;;  %v7416_v14 = vadd.f32 %v7415_v59, %v7414_v13 }
 0x69e   :  { %v6455_v17 = vadd.f32 %v7416_v14, %v6414_v6 }
 0x6b8   :  { %v7433_v18 = vpop.f32.mrb[36].mxu1 }
 0x6b9   :  { %v7434_v25 = vpop.f32.mrb[37].mxu1 }
 0x6ba   :  { %v7435_v19 = vadd.f32 %v7434_v25, %v7433_v18  ;;  %v7436_v63 = vpop.f32.mrb[38].mxu1 }
 0x6bb   :  { %v7437_v20 = vpop.f32.mrb[39].mxu1 }
 0x6bc   :  { %v6493_v22 = vadd.f32 %v7435_v19, %v6452_v23  ;;  %v7438_v21 = vadd.f32 %v7437_v20, %v7436_v63 }
 0x6be   :  { %8351 = vtanh.f32 %v6493_v22  ;;  %v6496_v27 = vadd.f32 %v7438_v21, %v6455_v17 }
 0x6c0   :  { %8353 = vtanh.f32 %v6496_v27 }
 0x6c8   :  { %v8352_v28 = vpop.eup %8351 }
 0x6c9   :  { %6519 = vst [vmem:[#allocation20 + $0x30] sm:$0xff] %v8352_v28 }
 0x6ca   :  { %v8354_v30 = vpop.eup %8353 }
 0x6cb   :  { %6526 = vst [vmem:[#allocation20 + $0x68] sm:$0xff] %v8354_v30 }
 0x737   :  { %v6326_v32 = vpop.f32.mrb[16].mxu0 }
 0x738   :  { %v7483_v34 = vadd.f32 %v6326_v32, %v3499_v31  ;;  %v6328_v29 = vpop.f32.mrb[17].mxu0 }
 0x739   :  { %v7484_v39 = vadd.f32 %v6328_v29, %v3503_v12  ;;  %v6330_v35 = vpop.f32.mrb[18].mxu0 }
 0x73a   :  { %8355 = vtanh.f32 %v7483_v34  ;;  %v7485_v36 = vadd.f32 %v6330_v35, %v3499_v31  ;;  %v6332_v40 = vpop.f32.mrb[19].mxu0 }
 0x73b   :  { %8357 = vtanh.f32 %v7484_v39  ;;  %v7486_v44 = vadd.f32 %v6332_v40, %v3503_v12 }
 0x73c   :  { %8359 = vtanh.f32 %v7485_v36 }
 0x73d   :  { %8361 = vtanh.f32 %v7486_v44 }
 0x744   :  { %v8356_v45 = vpop.eup %8355 }
 0x745   :  { %v8358_v24 = vpop.eup %8357  ;;  %6517 = vst [vmem:[#allocation20 + $0x20] sm:$0xff] %v8356_v45 }
 0x746   :  { %v8360_v54 = vpop.eup %8359  ;;  %6518 = vst [vmem:[#allocation20 + $0x28] sm:$0xff] %v8358_v24 }
 0x747   :  { %v8362_v26 = vpop.eup %8361  ;;  %6524 = vst [vmem:[#allocation20 + $0x58] sm:$0xff] %v8360_v54 }
 0x748   :  { %6525 = vst [vmem:[#allocation20 + $0x60] sm:$0xff] %v8362_v26 }
 0x749   :  { %8616 = shalt.err (!%p8613_p8)
}
 0x74a   :  { %s8617_s13 = scalar_lea.hbm %s9057_s11, 1792 }
 0x74b   :  { %p8618_p9 = scmp.ne.s32.totalorder %s9057_s11, %s8617_s13  ;;  %p8621_p10 = scmp.lt.u32.totalorder %s8617_s13, %s9057_s11 }
 0x74d   :  { %p8623_p11 = pnand %p8621_p10, %p8618_p9 }
 0x74f   :  { %8626 = shalt.err (!%p8623_p11)
}
 0x750   :  { %s8666_s25 = smov 896   ;;  %s8667_s26 = smov 56  }
 0x751   :  { %6538 = dma.vmem_to_hbm [thread:$0]  %s6533_s20, 1792, %s9057_s11, [#allocation4], %s8666_s25, %s8666_s25, %s8667_s26  }
 0x752   :  { %8639 = dma.done.wait [#allocation4], 1792  }
 0x753   :  { %8640 = vsyncadd [#allocation4], 4294965504 }
 0x754   :  { %6542 = vsyncpa [#allocation3], 1 }
 0x755   :  { %6543 = vsyncpa [#allocation6], 1 }
 0x756   :  { %6544 = vsyncpa [#allocation9], 1 }
 0x757   :  { %6545 = vsyncpa [#allocation12], 1 }
 0x758   :  { %6546 = vsyncpa [#allocation15], 1 }
 0x759   :  { %6547 = vsyncpa [#allocation18], 1 }
 0x75a   :  { %6548 = vsyncpa [#allocation4], 1 }

</bundles_post_ra>
